<compile_context>
chip_gen: v7x
topology: tpu7x:2x2x1
jax: 0.10.0
libtpu: 0.0.40
codegen_flags: <defaults>
</compile_context>

<pallas_src>
import math

import jax
import jax.numpy as jnp
from jax import lax
from jax.experimental import pallas as pl
from jax.experimental.pallas import tpu as pltpu

BN_EPS = 1e-5


# ---------------------------------------------------------------------------
# Parameter packing (one time, outside the per-call hot path).
# ---------------------------------------------------------------------------
def _pack_convT(weight, bias):
    """ConvTranspose1d -> tap-major equivalent forward-conv weight.

    weight: (Ci, Co, k) PyTorch ConvTranspose1d layout, bias: (Co,).
    Returns w3 (k, Co, Ci) with w3[j, o, c] = weight[c, o, k-1-j], bias (Co,1).
    """
    w3 = jnp.flip(weight, axis=-1).transpose(2, 1, 0)
    return w3, bias.reshape(-1, 1)


def _pack_cbr(weight, gamma, beta, mean, var, split=None):
    """Conv1d(bias=False)+BatchNorm1d(eval)+ReLU -> BN-folded tap weights.

    weight: (Co, Ci, k). Returns (k, Co, Ci) tap-major weight(s) with the BN
    scale folded in, and the BN shift as a (Co, 1) bias. `split` splits the
    weight along input channels (conv over a channel concatenation).
    """
    scale = gamma / jnp.sqrt(var + BN_EPS)
    w3 = (weight * scale[:, None, None]).transpose(2, 0, 1)      # (k, Co, Ci)
    shift = (beta - mean * scale).reshape(-1, 1)
    if split is None:
        return w3, shift
    return (w3[:, :, :split], w3[:, :, split:]), shift


def pack_params(raw):
    """raw: dict of PyTorch-layout tensors -> flat tuple in kernel order."""
    wu11, bu11 = _pack_convT(*raw["u11"])
    wu12, bu12 = _pack_convT(*raw["u12"])
    wu21, bu21 = _pack_convT(*raw["u21"])
    wu22, bu22 = _pack_convT(*raw["u22"])
    wu31, bu31 = _pack_convT(*raw["u31"])
    wu32, bu32 = _pack_convT(*raw["u32"])
    (wc1a, wc1b), sc1 = _pack_cbr(*raw["cat1"], split=raw["cat1"][0].shape[1] // 2)
    (wc2a, wc2b), sc2 = _pack_cbr(*raw["cat2"], split=raw["cat2"][0].shape[1] // 2)
    (wc3a, wc3b), sc3 = _pack_cbr(*raw["cat3"], split=raw["cat3"][0].shape[1] // 2)
    wco, sco = _pack_cbr(*raw["out"])
    return (wu11, bu11, wu12, bu12, wu21, bu21, wu22, bu22,
            wu31, bu31, wu32, bu32,
            wc1a, wc1b, sc1, wc2a, wc2b, sc2, wc3a, wc3b, sc3, wco, sco)


# ---------------------------------------------------------------------------
# Fused Pallas kernel (one batch element per grid step, everything in VMEM).
# ---------------------------------------------------------------------------
def _seg_decoder_kernel(*refs):
    (t0_ref, t1_ref, t2_ref, t3_ref,
     wu11, bu11, wu12, bu12, wu21, bu21, wu22, bu22, wu31, bu31, wu32, bu32,
     wc1a, wc1b, sc1, wc2a, wc2b, sc2, wc3a, wc3b, sc3, wco, sco,
     o_ref) = refs

    f32 = jnp.float32

    def taps(xpad, w3, lout):
        # Stride-1 correlation: sum_j w3[j] @ xpad[:, j:j+lout].
        # Each tap = one small MXU matmul over a static lane-shifted slice.
        k = w3.shape[0]
        acc = jnp.dot(w3[0], xpad[:, 0:lout], preferred_element_type=f32)
        for j in range(1, k):
            acc = acc + jnp.dot(w3[j], xpad[:, j:j + lout],
                                preferred_element_type=f32)
        return acc

    def conv_transpose(x, w3_ref, b_ref, s, p):
        # PyTorch ConvTranspose1d(Ci->Co, k, stride=s, padding=p), bias=True.
        w3 = w3_ref[...]                     # (k, Co, Ci), already flipped
        k = w3.shape[0]
        ci, l = x.shape
        pad = k - 1 - p
        lup = (l - 1) * s + 1 + 2 * pad
        lout = (l - 1) * s + k - 2 * p
        # Zero-insertion (stride) + edge padding as a single selection matmul.
        row = lax.broadcasted_iota(jnp.int32, (l, lup), 0)
        col = lax.broadcasted_iota(jnp.int32, (l, lup), 1)
        sel = (col == s * row + pad).astype(f32)            # (l, lup)
        xup = jnp.dot(x, sel, preferred_element_type=f32)   # (ci, lup)
        return taps(xup, w3, lout) + b_ref[...]

    def cbr(x, w3_ref, shift_ref, extra=None):
        # Conv1d(k, stride=1, pad=(k-1)//2, bias=False) + BN(eval, folded) +
        # ReLU.  `extra=(x2, w3b_ref)` implements the conv over
        # torch.cat([x, x2], dim=channels) without a sublane concat.
        w3 = w3_ref[...]
        k = w3.shape[0]
        p = (k - 1) // 2
        ci, l = x.shape
        z = jnp.zeros((ci, p), f32)
        xpad = jnp.concatenate([z, x, z], axis=1)
        y = taps(xpad, w3, l)
        if extra is not None:
            x2, w3b_ref = extra
            w3b = w3b_ref[...]
            ci2 = x2.shape[0]
            z2 = jnp.zeros((ci2, p), f32)
            x2pad = jnp.concatenate([z2, x2, z2], axis=1)
            y = y + taps(x2pad, w3b, l)
        return jnp.maximum(y + shift_ref[...], 0.0)

    # Decoder tokens (1, P, D) -> channels-first (D, P), transposed in VMEM.
    t0 = jnp.transpose(t0_ref[0], (1, 0)).astype(f32)
    t1 = jnp.transpose(t1_ref[0], (1, 0)).astype(f32)
    t2 = jnp.transpose(t2_ref[0], (1, 0)).astype(f32)
    t3 = jnp.transpose(t3_ref[0], (1, 0)).astype(f32)

    u11 = lambda x: conv_transpose(x, wu11, bu11, 2, 3)
    u12 = lambda x: conv_transpose(x, wu12, bu12, 2, 3)
    u21 = lambda x: conv_transpose(x, wu21, bu21, 3, 3)
    u22 = lambda x: conv_transpose(x, wu22, bu22, 3, 3)
    u31 = lambda x: conv_transpose(x, wu31, bu31, 2, 3)
    u32 = lambda x: conv_transpose(x, wu32, bu32, 2, 3)

    path1 = u11(t2)                                         # (8, 2P)
    out1 = u12(t3)                                          # (8, 2P)
    out2 = cbr(path1, wc1a, sc1, extra=(out1, wc1b))        # (8, 2P)
    out2 = u22(out2)                                        # (6, 6P)
    path2 = u21(u11(t1))                                    # (6, 6P)
    out3 = cbr(path2, wc2a, sc2, extra=(out2, wc2b))        # (6, 6P)
    out3 = u32(out3)                                        # (cls, 12P)
    path3 = u31(u21(u11(t0)))                               # (cls, 12P)
    out4 = cbr(path3, wc3a, sc3, extra=(out3, wc3b))        # (cls, 12P)
    final = cbr(out4, wco, sco)                             # (cls, 12P)

    o_ref[0] = final.astype(o_ref.dtype)


# ---------------------------------------------------------------------------
# Wrapper
# ---------------------------------------------------------------------------
def _const_index_map(ndim):
    def imap(b):
        return (0,) * ndim
    return imap


def _cost_estimate(batch, num_patches, class_n, operands, out_shape):
    flops = 0

    def ct(ci, co, k, s, p, l):
        nonlocal flops
        pad = k - 1 - p
        lup = (l - 1) * s + 1 + 2 * pad
        lo = (l - 1) * s + k - 2 * p
        flops += 2 * ci * l * lup + 2 * k * co * ci * lo
        return lo

    def cv(ci, co, k, l):
        nonlocal flops
        flops += 2 * k * co * ci * l
        return l

    l1 = ct(8, 8, 8, 2, 3, num_patches)                   # path1
    ct(8, 8, 8, 2, 3, num_patches)                        # out1
    cv(16, 8, 9, l1)                                      # conv_cat1
    l2 = ct(8, 6, 9, 3, 3, l1)                            # upsample_2_2
    ct(8, 8, 8, 2, 3, num_patches); ct(8, 6, 9, 3, 3, l1)  # path2
    cv(12, 6, 9, l2)                                      # conv_cat2
    l3 = ct(6, class_n, 8, 2, 3, l2)                      # upsample_3_2
    ct(8, 8, 8, 2, 3, num_patches); ct(8, 6, 9, 3, 3, l1)
    ct(6, class_n, 8, 2, 3, l2)                           # path3
    cv(2 * class_n, class_n, 9, l3)                       # conv_cat3
    cv(class_n, class_n, 9, l3)                           # conv_out

    in_bytes = sum(int(a.size) * a.dtype.itemsize for a in operands)
    out_bytes = int(out_shape[0] * out_shape[1] * out_shape[2]) * 4
    return flops * batch, in_bytes + out_bytes


def ecg_mae_seg_u_decoder(decoder_tokens, packed_params):
    """Forward of ECG_mae_segmentation_U after the (external) MAE backbone.

    decoder_tokens: list of 4 arrays, each (B, P, 8).
    packed_params:  tuple from pack_params().
    Returns (B, class_n, 12*P).
    """
    t0, t1, t2, t3 = decoder_tokens
    B, P, D = t0.shape
    class_n = packed_params[-2].shape[1]          # conv_out weight: (k, cls, cls)

    # output lengths through the x2 / x3 / x2 upsampling stages
    l1 = (P - 1) * 2 + 8 - 6
    l2 = (l1 - 1) * 3 + 9 - 6
    l3 = (l2 - 1) * 2 + 8 - 6

    operands = [t0, t1, t2, t3, *packed_params]

    tok_spec = lambda: pl.BlockSpec((1, P, D), lambda b: (b, 0, 0))
    in_specs = [tok_spec() for _ in range(4)] + [
        pl.BlockSpec(a.shape, _const_index_map(a.ndim)) for a in packed_params
    ]
    out_specs = pl.BlockSpec((1, class_n, l3), lambda b: (b, 0, 0))

    flops, bytes_accessed = _cost_estimate(B, P, class_n, operands,
                                           (B, class_n, l3))

    return pl.pallas_call(
        _seg_decoder_kernel,
        out_shape=jax.ShapeDtypeStruct((B, class_n, l3), t0.dtype),
        grid_spec=pltpu.PrefetchScalarGridSpec(
            num_scalar_prefetch=0,
            grid=(B,),
            in_specs=in_specs,
            out_specs=out_specs,
        ),
        compiler_params=pltpu.CompilerParams(
            dimension_semantics=("parallel",)),
        cost_estimate=pl.CostEstimate(flops=flops, transcendentals=0,
                                      bytes_accessed=bytes_accessed),
    )(*operands)


# ---------------------------------------------------------------------------
# Pure-JAX reference (same math via XLA convs) for validation.
# ---------------------------------------------------------------------------
def _reference_forward(tokens, raw):
    hp = lax.Precision.HIGHEST

    def convT(x, w, b, s, p):
        k = w.shape[-1]
        w_conv = jnp.flip(w, -1).transpose(1, 0, 2)          # (Co, Ci, k)
        y = lax.conv_general_dilated(
            x, w_conv, window_strides=(1,), padding=[(k - 1 - p, k - 1 - p)],
            lhs_dilation=(s,), dimension_numbers=("NCH", "OIH", "NCH"),
            precision=hp)
        return y + b[None, :, None]

    def cbr(x, w, gamma, beta, mean, var):
        k = w.shape[-1]
        p = (k - 1) // 2
        y = lax.conv_general_dilated(
            x, w, window_strides=(1,), padding=[(p, p)],
            dimension_numbers=("NCH", "OIH", "NCH"), precision=hp)
        scale = gamma / jnp.sqrt(var + BN_EPS)
        y = y * scale[None, :, None] + (beta - mean * scale)[None, :, None]
        return jnp.maximum(y, 0.0)

    t = [jnp.transpose(tk, (0, 2, 1)) for tk in tokens]
    u11 = lambda x: convT(x, *raw["u11"], 2, 3)
    u12 = lambda x: convT(x, *raw["u12"], 2, 3)
    u21 = lambda x: convT(x, *raw["u21"], 3, 3)
    u22 = lambda x: convT(x, *raw["u22"], 3, 3)
    u31 = lambda x: convT(x, *raw["u31"], 2, 3)
    u32 = lambda x: convT(x, *raw["u32"], 2, 3)

    path1 = u11(t[2]); out1 = u12(t[3])
    out2 = cbr(jnp.concatenate([path1, out1], axis=1), *raw["cat1"])
    out2 = u22(out2)
    path2 = u21(u11(t[1]))
    out3 = cbr(jnp.concatenate([path2, out2], axis=1), *raw["cat2"])
    out3 = u32(out3)
    path3 = u31(u21(u11(t[0])))
    out4 = cbr(jnp.concatenate([path3, out3], axis=1), *raw["cat3"])
    return cbr(out4, *raw["out"])


# ---------------------------------------------------------------------------
if __name__ == "__main__":
    B, P, D = 2, 16, 8          # batch, num_patches (192/12), decoder token dim
    class_n = 4                 # implied by conv_cat3 = CBR_1D(4+4, 4)

    key = jax.random.PRNGKey(0)
    keys = iter(jax.random.split(key, 64))

    def unif(shape, bound):
        return jax.random.uniform(next(keys), shape, minval=-bound,
                                  maxval=bound, dtype=jnp.float32)

    # Decoder tokens produced by the external MAE backbone (taken as inputs).
    tokens = [jax.random.normal(next(keys), (B, P, D), dtype=jnp.float32)
              for _ in range(4)]

    def convT_params(ci, co, k):
        bound = 1.0 / math.sqrt(ci * k)
        return unif((ci, co, k), bound), unif((co,), bound)

    def cbr_params(ci, co, k=9):
        bound = 1.0 / math.sqrt(ci * k)
        w = unif((co, ci, k), bound)
        gamma = jax.random.uniform(next(keys), (co,), minval=0.5, maxval=1.5,
                                   dtype=jnp.float32)
        beta = 0.1 * jax.random.normal(next(keys), (co,), dtype=jnp.float32)
        mean = 0.1 * jax.random.normal(next(keys), (co,), dtype=jnp.float32)
        var = jax.random.uniform(next(keys), (co,), minval=0.5, maxval=1.5,
                                 dtype=jnp.float32)
        return w, gamma, beta, mean, var

    raw = {
        "u11": convT_params(8, 8, 8), "u12": convT_params(8, 8, 8),
        "u21": convT_params(8, 6, 9), "u22": convT_params(8, 6, 9),
        "u31": convT_params(6, class_n, 8), "u32": convT_params(6, class_n, 8),
        "cat1": cbr_params(16, 8), "cat2": cbr_params(12, 6),
        "cat3": cbr_params(2 * class_n, class_n),
        "out": cbr_params(class_n, class_n),
    }

    packed = pack_params(raw)
    out = ecg_mae_seg_u_decoder(tokens, packed)
    out = jax.block_until_ready(out)
    assert out.shape == (B, class_n, 12 * P), out.shape

    ref = _reference_forward(tokens, raw)
    assert jnp.allclose(out, ref, atol=2e-4, rtol=2e-4), \
        float(jnp.max(jnp.abs(out - ref)))

    print("KERNEL_OK")
</pallas_src>

<mosaic_0001>
module attributes {stable_mosaic.version = 11 : i64} {
  func.func @_seg_decoder_kernel(%arg0: i32, %arg1: memref<1x16x8xf32, #tpu.memory_space<vmem>>, %arg2: memref<1x16x8xf32, #tpu.memory_space<vmem>>, %arg3: memref<1x16x8xf32, #tpu.memory_space<vmem>>, %arg4: memref<1x16x8xf32, #tpu.memory_space<vmem>>, %arg5: memref<8x8x8xf32, #tpu.memory_space<vmem>>, %arg6: memref<8x1xf32, #tpu.memory_space<vmem>>, %arg7: memref<8x8x8xf32, #tpu.memory_space<vmem>>, %arg8: memref<8x1xf32, #tpu.memory_space<vmem>>, %arg9: memref<9x6x8xf32, #tpu.memory_space<vmem>>, %arg10: memref<6x1xf32, #tpu.memory_space<vmem>>, %arg11: memref<9x6x8xf32, #tpu.memory_space<vmem>>, %arg12: memref<6x1xf32, #tpu.memory_space<vmem>>, %arg13: memref<8x4x6xf32, #tpu.memory_space<vmem>>, %arg14: memref<4x1xf32, #tpu.memory_space<vmem>>, %arg15: memref<8x4x6xf32, #tpu.memory_space<vmem>>, %arg16: memref<4x1xf32, #tpu.memory_space<vmem>>, %arg17: memref<9x8x8xf32, #tpu.memory_space<vmem>>, %arg18: memref<9x8x8xf32, #tpu.memory_space<vmem>>, %arg19: memref<8x1xf32, #tpu.memory_space<vmem>>, %arg20: memref<9x6x6xf32, #tpu.memory_space<vmem>>, %arg21: memref<9x6x6xf32, #tpu.memory_space<vmem>>, %arg22: memref<6x1xf32, #tpu.memory_space<vmem>>, %arg23: memref<9x4x4xf32, #tpu.memory_space<vmem>>, %arg24: memref<9x4x4xf32, #tpu.memory_space<vmem>>, %arg25: memref<4x1xf32, #tpu.memory_space<vmem>>, %arg26: memref<9x4x4xf32, #tpu.memory_space<vmem>>, %arg27: memref<4x1xf32, #tpu.memory_space<vmem>>, %arg28: memref<1x4x192xf32, #tpu.memory_space<vmem>>) attributes {dimension_semantics = [#tpu.dimension_semantics<parallel>], iteration_bounds = array<i64: 2>, scalar_prefetch = 0 : i64, scratch_operands = 0 : i64, tpu.core_type = #tpu.core_type<tc>, window_params = [{transform_indices = @transform_0, window_bounds = array<i64: 1, 16, 8>}, {transform_indices = @transform_1, window_bounds = array<i64: 1, 16, 8>}, {transform_indices = @transform_2, window_bounds = array<i64: 1, 16, 8>}, {transform_indices = @transform_3, window_bounds = array<i64: 1, 16, 8>}, {pipeline_mode = #tpu.pipeline_mode<synchronous>, transform_indices = @transform_4, window_bounds = array<i64: 8, 8, 8>}, {pipeline_mode = #tpu.pipeline_mode<synchronous>, transform_indices = @transform_5, window_bounds = array<i64: 8, 1>}, {pipeline_mode = #tpu.pipeline_mode<synchronous>, transform_indices = @transform_6, window_bounds = array<i64: 8, 8, 8>}, {pipeline_mode = #tpu.pipeline_mode<synchronous>, transform_indices = @transform_7, window_bounds = array<i64: 8, 1>}, {pipeline_mode = #tpu.pipeline_mode<synchronous>, transform_indices = @transform_8, window_bounds = array<i64: 9, 6, 8>}, {pipeline_mode = #tpu.pipeline_mode<synchronous>, transform_indices = @transform_9, window_bounds = array<i64: 6, 1>}, {pipeline_mode = #tpu.pipeline_mode<synchronous>, transform_indices = @transform_10, window_bounds = array<i64: 9, 6, 8>}, {pipeline_mode = #tpu.pipeline_mode<synchronous>, transform_indices = @transform_11, window_bounds = array<i64: 6, 1>}, {pipeline_mode = #tpu.pipeline_mode<synchronous>, transform_indices = @transform_12, window_bounds = array<i64: 8, 4, 6>}, {pipeline_mode = #tpu.pipeline_mode<synchronous>, transform_indices = @transform_13, window_bounds = array<i64: 4, 1>}, {pipeline_mode = #tpu.pipeline_mode<synchronous>, transform_indices = @transform_14, window_bounds = array<i64: 8, 4, 6>}, {pipeline_mode = #tpu.pipeline_mode<synchronous>, transform_indices = @transform_15, window_bounds = array<i64: 4, 1>}, {pipeline_mode = #tpu.pipeline_mode<synchronous>, transform_indices = @transform_16, window_bounds = array<i64: 9, 8, 8>}, {pipeline_mode = #tpu.pipeline_mode<synchronous>, transform_indices = @transform_17, window_bounds = array<i64: 9, 8, 8>}, {pipeline_mode = #tpu.pipeline_mode<synchronous>, transform_indices = @transform_18, window_bounds = array<i64: 8, 1>}, {pipeline_mode = #tpu.pipeline_mode<synchronous>, transform_indices = @transform_19, window_bounds = array<i64: 9, 6, 6>}, {pipeline_mode = #tpu.pipeline_mode<synchronous>, transform_indices = @transform_20, window_bounds = array<i64: 9, 6, 6>}, {pipeline_mode = #tpu.pipeline_mode<synchronous>, transform_indices = @transform_21, window_bounds = array<i64: 6, 1>}, {pipeline_mode = #tpu.pipeline_mode<synchronous>, transform_indices = @transform_22, window_bounds = array<i64: 9, 4, 4>}, {pipeline_mode = #tpu.pipeline_mode<synchronous>, transform_indices = @transform_23, window_bounds = array<i64: 9, 4, 4>}, {pipeline_mode = #tpu.pipeline_mode<synchronous>, transform_indices = @transform_24, window_bounds = array<i64: 4, 1>}, {pipeline_mode = #tpu.pipeline_mode<synchronous>, transform_indices = @transform_25, window_bounds = array<i64: 9, 4, 4>}, {pipeline_mode = #tpu.pipeline_mode<synchronous>, transform_indices = @transform_26, window_bounds = array<i64: 4, 1>}, {transform_indices = @transform_27, window_bounds = array<i64: 1, 4, 192>}]} {
    %c0 = arith.constant 0 : index
    %c0_0 = arith.constant 0 : index
    %c0_1 = arith.constant 0 : index
    %0 = vector.load %arg1[%c0, %c0_0, %c0_1] : memref<1x16x8xf32, #tpu.memory_space<vmem>>, vector<1x16x8xf32>
    %1 = vector.shape_cast %0 : vector<1x16x8xf32> to vector<16x8xf32>
    %2 = tpu.transpose %1, [1, 0] : vector<16x8xf32> -> vector<8x16xf32>
    %c0_2 = arith.constant 0 : index
    %c0_3 = arith.constant 0 : index
    %c0_4 = arith.constant 0 : index
    %3 = vector.load %arg2[%c0_2, %c0_3, %c0_4] : memref<1x16x8xf32, #tpu.memory_space<vmem>>, vector<1x16x8xf32>
    %4 = vector.shape_cast %3 : vector<1x16x8xf32> to vector<16x8xf32>
    %5 = tpu.transpose %4, [1, 0] : vector<16x8xf32> -> vector<8x16xf32>
    %c0_5 = arith.constant 0 : index
    %c0_6 = arith.constant 0 : index
    %c0_7 = arith.constant 0 : index
    %6 = vector.load %arg3[%c0_5, %c0_6, %c0_7] : memref<1x16x8xf32, #tpu.memory_space<vmem>>, vector<1x16x8xf32>
    %7 = vector.shape_cast %6 : vector<1x16x8xf32> to vector<16x8xf32>
    %8 = tpu.transpose %7, [1, 0] : vector<16x8xf32> -> vector<8x16xf32>
    %c0_8 = arith.constant 0 : index
    %c0_9 = arith.constant 0 : index
    %c0_10 = arith.constant 0 : index
    %9 = vector.load %arg4[%c0_8, %c0_9, %c0_10] : memref<1x16x8xf32, #tpu.memory_space<vmem>>, vector<1x16x8xf32>
    %10 = vector.shape_cast %9 : vector<1x16x8xf32> to vector<16x8xf32>
    %11 = tpu.transpose %10, [1, 0] : vector<16x8xf32> -> vector<8x16xf32>
    %c0_11 = arith.constant 0 : index
    %c0_12 = arith.constant 0 : index
    %c0_13 = arith.constant 0 : index
    %12 = vector.load %arg5[%c0_11, %c0_12, %c0_13] : memref<8x8x8xf32, #tpu.memory_space<vmem>>, vector<8x8x8xf32>
    %13 = tpu.iota {dimensions = array<i32: 0>} : vector<16x39xi32>
    %14 = tpu.iota {dimensions = array<i32: 1>} : vector<16x39xi32>
    %c2_i32 = arith.constant 2 : i32
    %15 = vector.broadcast %c2_i32 : i32 to vector<16x39xi32>
    %16 = arith.muli %15, %13 : vector<16x39xi32>
    %c4_i32 = arith.constant 4 : i32
    %17 = vector.broadcast %c4_i32 : i32 to vector<16x39xi32>
    %18 = arith.addi %16, %17 : vector<16x39xi32>
    %19 = arith.cmpi eq, %14, %18 : vector<16x39xi32>
    %20 = arith.extui %19 : vector<16x39xi1> to vector<16x39xi32>
    %21 = arith.sitofp %20 : vector<16x39xi32> to vector<16x39xf32>
    %cst = arith.constant dense<0.000000e+00> : vector<8x39xf32>
    %22 = tpu.matmul %8, %21, %cst {dimension_numbers = #tpu.dot_dimension_numbers<[1], [0], [0], [1], [0, 0, 1, 1], [], []>} : vector<8x16xf32>, vector<16x39xf32>, vector<8x39xf32> -> vector<8x39xf32>
    %23 = vector.extract_strided_slice %12 {offsets = [0, 0, 0], sizes = [1, 8, 8], strides = [1, 1, 1]} : vector<8x8x8xf32> to vector<1x8x8xf32>
    %24 = vector.shape_cast %23 : vector<1x8x8xf32> to vector<8x8xf32>
    %25 = vector.extract_strided_slice %22 {offsets = [0, 0], sizes = [8, 32], strides = [1, 1]} : vector<8x39xf32> to vector<8x32xf32>
    %cst_14 = arith.constant dense<0.000000e+00> : vector<8x32xf32>
    %26 = tpu.matmul %24, %25, %cst_14 {dimension_numbers = #tpu.dot_dimension_numbers<[1], [0], [0], [1], [0, 0, 1, 1], [], []>} : vector<8x8xf32>, vector<8x32xf32>, vector<8x32xf32> -> vector<8x32xf32>
    %27 = vector.extract_strided_slice %12 {offsets = [1, 0, 0], sizes = [1, 8, 8], strides = [1, 1, 1]} : vector<8x8x8xf32> to vector<1x8x8xf32>
    %28 = vector.shape_cast %27 : vector<1x8x8xf32> to vector<8x8xf32>
    %29 = vector.extract_strided_slice %22 {offsets = [0, 1], sizes = [8, 32], strides = [1, 1]} : vector<8x39xf32> to vector<8x32xf32>
    %cst_15 = arith.constant dense<0.000000e+00> : vector<8x32xf32>
    %30 = tpu.matmul %28, %29, %cst_15 {dimension_numbers = #tpu.dot_dimension_numbers<[1], [0], [0], [1], [0, 0, 1, 1], [], []>} : vector<8x8xf32>, vector<8x32xf32>, vector<8x32xf32> -> vector<8x32xf32>
    %31 = arith.addf %26, %30 : vector<8x32xf32>
    %32 = vector.extract_strided_slice %12 {offsets = [2, 0, 0], sizes = [1, 8, 8], strides = [1, 1, 1]} : vector<8x8x8xf32> to vector<1x8x8xf32>
    %33 = vector.shape_cast %32 : vector<1x8x8xf32> to vector<8x8xf32>
    %34 = vector.extract_strided_slice %22 {offsets = [0, 2], sizes = [8, 32], strides = [1, 1]} : vector<8x39xf32> to vector<8x32xf32>
    %cst_16 = arith.constant dense<0.000000e+00> : vector<8x32xf32>
    %35 = tpu.matmul %33, %34, %cst_16 {dimension_numbers = #tpu.dot_dimension_numbers<[1], [0], [0], [1], [0, 0, 1, 1], [], []>} : vector<8x8xf32>, vector<8x32xf32>, vector<8x32xf32> -> vector<8x32xf32>
    %36 = arith.addf %31, %35 : vector<8x32xf32>
    %37 = vector.extract_strided_slice %12 {offsets = [3, 0, 0], sizes = [1, 8, 8], strides = [1, 1, 1]} : vector<8x8x8xf32> to vector<1x8x8xf32>
    %38 = vector.shape_cast %37 : vector<1x8x8xf32> to vector<8x8xf32>
    %39 = vector.extract_strided_slice %22 {offsets = [0, 3], sizes = [8, 32], strides = [1, 1]} : vector<8x39xf32> to vector<8x32xf32>
    %cst_17 = arith.constant dense<0.000000e+00> : vector<8x32xf32>
    %40 = tpu.matmul %38, %39, %cst_17 {dimension_numbers = #tpu.dot_dimension_numbers<[1], [0], [0], [1], [0, 0, 1, 1], [], []>} : vector<8x8xf32>, vector<8x32xf32>, vector<8x32xf32> -> vector<8x32xf32>
    %41 = arith.addf %36, %40 : vector<8x32xf32>
    %42 = vector.extract_strided_slice %12 {offsets = [4, 0, 0], sizes = [1, 8, 8], strides = [1, 1, 1]} : vector<8x8x8xf32> to vector<1x8x8xf32>
    %43 = vector.shape_cast %42 : vector<1x8x8xf32> to vector<8x8xf32>
    %44 = vector.extract_strided_slice %22 {offsets = [0, 4], sizes = [8, 32], strides = [1, 1]} : vector<8x39xf32> to vector<8x32xf32>
    %cst_18 = arith.constant dense<0.000000e+00> : vector<8x32xf32>
    %45 = tpu.matmul %43, %44, %cst_18 {dimension_numbers = #tpu.dot_dimension_numbers<[1], [0], [0], [1], [0, 0, 1, 1], [], []>} : vector<8x8xf32>, vector<8x32xf32>, vector<8x32xf32> -> vector<8x32xf32>
    %46 = arith.addf %41, %45 : vector<8x32xf32>
    %47 = vector.extract_strided_slice %12 {offsets = [5, 0, 0], sizes = [1, 8, 8], strides = [1, 1, 1]} : vector<8x8x8xf32> to vector<1x8x8xf32>
    %48 = vector.shape_cast %47 : vector<1x8x8xf32> to vector<8x8xf32>
    %49 = vector.extract_strided_slice %22 {offsets = [0, 5], sizes = [8, 32], strides = [1, 1]} : vector<8x39xf32> to vector<8x32xf32>
    %cst_19 = arith.constant dense<0.000000e+00> : vector<8x32xf32>
    %50 = tpu.matmul %48, %49, %cst_19 {dimension_numbers = #tpu.dot_dimension_numbers<[1], [0], [0], [1], [0, 0, 1, 1], [], []>} : vector<8x8xf32>, vector<8x32xf32>, vector<8x32xf32> -> vector<8x32xf32>
    %51 = arith.addf %46, %50 : vector<8x32xf32>
    %52 = vector.extract_strided_slice %12 {offsets = [6, 0, 0], sizes = [1, 8, 8], strides = [1, 1, 1]} : vector<8x8x8xf32> to vector<1x8x8xf32>
    %53 = vector.shape_cast %52 : vector<1x8x8xf32> to vector<8x8xf32>
    %54 = vector.extract_strided_slice %22 {offsets = [0, 6], sizes = [8, 32], strides = [1, 1]} : vector<8x39xf32> to vector<8x32xf32>
    %cst_20 = arith.constant dense<0.000000e+00> : vector<8x32xf32>
    %55 = tpu.matmul %53, %54, %cst_20 {dimension_numbers = #tpu.dot_dimension_numbers<[1], [0], [0], [1], [0, 0, 1, 1], [], []>} : vector<8x8xf32>, vector<8x32xf32>, vector<8x32xf32> -> vector<8x32xf32>
    %56 = arith.addf %51, %55 : vector<8x32xf32>
    %57 = vector.extract_strided_slice %12 {offsets = [7, 0, 0], sizes = [1, 8, 8], strides = [1, 1, 1]} : vector<8x8x8xf32> to vector<1x8x8xf32>
    %58 = vector.shape_cast %57 : vector<1x8x8xf32> to vector<8x8xf32>
    %59 = vector.extract_strided_slice %22 {offsets = [0, 7], sizes = [8, 32], strides = [1, 1]} : vector<8x39xf32> to vector<8x32xf32>
    %cst_21 = arith.constant dense<0.000000e+00> : vector<8x32xf32>
    %60 = tpu.matmul %58, %59, %cst_21 {dimension_numbers = #tpu.dot_dimension_numbers<[1], [0], [0], [1], [0, 0, 1, 1], [], []>} : vector<8x8xf32>, vector<8x32xf32>, vector<8x32xf32> -> vector<8x32xf32>
    %61 = arith.addf %56, %60 : vector<8x32xf32>
    %c0_22 = arith.constant 0 : index
    %c0_23 = arith.constant 0 : index
    %62 = vector.load %arg6[%c0_22, %c0_23] : memref<8x1xf32, #tpu.memory_space<vmem>>, vector<8x1xf32>
    %63 = vector.broadcast %62 : vector<8x1xf32> to vector<8x32xf32>
    %64 = arith.addf %61, %63 : vector<8x32xf32>
    %c0_24 = arith.constant 0 : index
    %c0_25 = arith.constant 0 : index
    %c0_26 = arith.constant 0 : index
    %65 = vector.load %arg7[%c0_24, %c0_25, %c0_26] : memref<8x8x8xf32, #tpu.memory_space<vmem>>, vector<8x8x8xf32>
    %66 = tpu.iota {dimensions = array<i32: 0>} : vector<16x39xi32>
    %67 = tpu.iota {dimensions = array<i32: 1>} : vector<16x39xi32>
    %c2_i32_27 = arith.constant 2 : i32
    %68 = vector.broadcast %c2_i32_27 : i32 to vector<16x39xi32>
    %69 = arith.muli %68, %66 : vector<16x39xi32>
    %c4_i32_28 = arith.constant 4 : i32
    %70 = vector.broadcast %c4_i32_28 : i32 to vector<16x39xi32>
    %71 = arith.addi %69, %70 : vector<16x39xi32>
    %72 = arith.cmpi eq, %67, %71 : vector<16x39xi32>
    %73 = arith.extui %72 : vector<16x39xi1> to vector<16x39xi32>
    %74 = arith.sitofp %73 : vector<16x39xi32> to vector<16x39xf32>
    %cst_29 = arith.constant dense<0.000000e+00> : vector<8x39xf32>
    %75 = tpu.matmul %11, %74, %cst_29 {dimension_numbers = #tpu.dot_dimension_numbers<[1], [0], [0], [1], [0, 0, 1, 1], [], []>} : vector<8x16xf32>, vector<16x39xf32>, vector<8x39xf32> -> vector<8x39xf32>
    %76 = vector.extract_strided_slice %65 {offsets = [0, 0, 0], sizes = [1, 8, 8], strides = [1, 1, 1]} : vector<8x8x8xf32> to vector<1x8x8xf32>
    %77 = vector.shape_cast %76 : vector<1x8x8xf32> to vector<8x8xf32>
    %78 = vector.extract_strided_slice %75 {offsets = [0, 0], sizes = [8, 32], strides = [1, 1]} : vector<8x39xf32> to vector<8x32xf32>
    %cst_30 = arith.constant dense<0.000000e+00> : vector<8x32xf32>
    %79 = tpu.matmul %77, %78, %cst_30 {dimension_numbers = #tpu.dot_dimension_numbers<[1], [0], [0], [1], [0, 0, 1, 1], [], []>} : vector<8x8xf32>, vector<8x32xf32>, vector<8x32xf32> -> vector<8x32xf32>
    %80 = vector.extract_strided_slice %65 {offsets = [1, 0, 0], sizes = [1, 8, 8], strides = [1, 1, 1]} : vector<8x8x8xf32> to vector<1x8x8xf32>
    %81 = vector.shape_cast %80 : vector<1x8x8xf32> to vector<8x8xf32>
    %82 = vector.extract_strided_slice %75 {offsets = [0, 1], sizes = [8, 32], strides = [1, 1]} : vector<8x39xf32> to vector<8x32xf32>
    %cst_31 = arith.constant dense<0.000000e+00> : vector<8x32xf32>
    %83 = tpu.matmul %81, %82, %cst_31 {dimension_numbers = #tpu.dot_dimension_numbers<[1], [0], [0], [1], [0, 0, 1, 1], [], []>} : vector<8x8xf32>, vector<8x32xf32>, vector<8x32xf32> -> vector<8x32xf32>
    %84 = arith.addf %79, %83 : vector<8x32xf32>
    %85 = vector.extract_strided_slice %65 {offsets = [2, 0, 0], sizes = [1, 8, 8], strides = [1, 1, 1]} : vector<8x8x8xf32> to vector<1x8x8xf32>
    %86 = vector.shape_cast %85 : vector<1x8x8xf32> to vector<8x8xf32>
    %87 = vector.extract_strided_slice %75 {offsets = [0, 2], sizes = [8, 32], strides = [1, 1]} : vector<8x39xf32> to vector<8x32xf32>
    %cst_32 = arith.constant dense<0.000000e+00> : vector<8x32xf32>
    %88 = tpu.matmul %86, %87, %cst_32 {dimension_numbers = #tpu.dot_dimension_numbers<[1], [0], [0], [1], [0, 0, 1, 1], [], []>} : vector<8x8xf32>, vector<8x32xf32>, vector<8x32xf32> -> vector<8x32xf32>
    %89 = arith.addf %84, %88 : vector<8x32xf32>
    %90 = vector.extract_strided_slice %65 {offsets = [3, 0, 0], sizes = [1, 8, 8], strides = [1, 1, 1]} : vector<8x8x8xf32> to vector<1x8x8xf32>
    %91 = vector.shape_cast %90 : vector<1x8x8xf32> to vector<8x8xf32>
    %92 = vector.extract_strided_slice %75 {offsets = [0, 3], sizes = [8, 32], strides = [1, 1]} : vector<8x39xf32> to vector<8x32xf32>
    %cst_33 = arith.constant dense<0.000000e+00> : vector<8x32xf32>
    %93 = tpu.matmul %91, %92, %cst_33 {dimension_numbers = #tpu.dot_dimension_numbers<[1], [0], [0], [1], [0, 0, 1, 1], [], []>} : vector<8x8xf32>, vector<8x32xf32>, vector<8x32xf32> -> vector<8x32xf32>
    %94 = arith.addf %89, %93 : vector<8x32xf32>
    %95 = vector.extract_strided_slice %65 {offsets = [4, 0, 0], sizes = [1, 8, 8], strides = [1, 1, 1]} : vector<8x8x8xf32> to vector<1x8x8xf32>
    %96 = vector.shape_cast %95 : vector<1x8x8xf32> to vector<8x8xf32>
    %97 = vector.extract_strided_slice %75 {offsets = [0, 4], sizes = [8, 32], strides = [1, 1]} : vector<8x39xf32> to vector<8x32xf32>
    %cst_34 = arith.constant dense<0.000000e+00> : vector<8x32xf32>
    %98 = tpu.matmul %96, %97, %cst_34 {dimension_numbers = #tpu.dot_dimension_numbers<[1], [0], [0], [1], [0, 0, 1, 1], [], []>} : vector<8x8xf32>, vector<8x32xf32>, vector<8x32xf32> -> vector<8x32xf32>
    %99 = arith.addf %94, %98 : vector<8x32xf32>
    %100 = vector.extract_strided_slice %65 {offsets = [5, 0, 0], sizes = [1, 8, 8], strides = [1, 1, 1]} : vector<8x8x8xf32> to vector<1x8x8xf32>
    %101 = vector.shape_cast %100 : vector<1x8x8xf32> to vector<8x8xf32>
    %102 = vector.extract_strided_slice %75 {offsets = [0, 5], sizes = [8, 32], strides = [1, 1]} : vector<8x39xf32> to vector<8x32xf32>
    %cst_35 = arith.constant dense<0.000000e+00> : vector<8x32xf32>
    %103 = tpu.matmul %101, %102, %cst_35 {dimension_numbers = #tpu.dot_dimension_numbers<[1], [0], [0], [1], [0, 0, 1, 1], [], []>} : vector<8x8xf32>, vector<8x32xf32>, vector<8x32xf32> -> vector<8x32xf32>
    %104 = arith.addf %99, %103 : vector<8x32xf32>
    %105 = vector.extract_strided_slice %65 {offsets = [6, 0, 0], sizes = [1, 8, 8], strides = [1, 1, 1]} : vector<8x8x8xf32> to vector<1x8x8xf32>
    %106 = vector.shape_cast %105 : vector<1x8x8xf32> to vector<8x8xf32>
    %107 = vector.extract_strided_slice %75 {offsets = [0, 6], sizes = [8, 32], strides = [1, 1]} : vector<8x39xf32> to vector<8x32xf32>
    %cst_36 = arith.constant dense<0.000000e+00> : vector<8x32xf32>
    %108 = tpu.matmul %106, %107, %cst_36 {dimension_numbers = #tpu.dot_dimension_numbers<[1], [0], [0], [1], [0, 0, 1, 1], [], []>} : vector<8x8xf32>, vector<8x32xf32>, vector<8x32xf32> -> vector<8x32xf32>
    %109 = arith.addf %104, %108 : vector<8x32xf32>
    %110 = vector.extract_strided_slice %65 {offsets = [7, 0, 0], sizes = [1, 8, 8], strides = [1, 1, 1]} : vector<8x8x8xf32> to vector<1x8x8xf32>
    %111 = vector.shape_cast %110 : vector<1x8x8xf32> to vector<8x8xf32>
    %112 = vector.extract_strided_slice %75 {offsets = [0, 7], sizes = [8, 32], strides = [1, 1]} : vector<8x39xf32> to vector<8x32xf32>
    %cst_37 = arith.constant dense<0.000000e+00> : vector<8x32xf32>
    %113 = tpu.matmul %111, %112, %cst_37 {dimension_numbers = #tpu.dot_dimension_numbers<[1], [0], [0], [1], [0, 0, 1, 1], [], []>} : vector<8x8xf32>, vector<8x32xf32>, vector<8x32xf32> -> vector<8x32xf32>
    %114 = arith.addf %109, %113 : vector<8x32xf32>
    %c0_38 = arith.constant 0 : index
    %c0_39 = arith.constant 0 : index
    %115 = vector.load %arg8[%c0_38, %c0_39] : memref<8x1xf32, #tpu.memory_space<vmem>>, vector<8x1xf32>
    %116 = vector.broadcast %115 : vector<8x1xf32> to vector<8x32xf32>
    %117 = arith.addf %114, %116 : vector<8x32xf32>
    %c0_40 = arith.constant 0 : index
    %c0_41 = arith.constant 0 : index
    %c0_42 = arith.constant 0 : index
    %118 = vector.load %arg17[%c0_40, %c0_41, %c0_42] : memref<9x8x8xf32, #tpu.memory_space<vmem>>, vector<9x8x8xf32>
    %cst_43 = arith.constant 0.000000e+00 : f32
    %119 = vector.broadcast %cst_43 : f32 to vector<8x4xf32>
    %120 = tpu.concatenate %119, %64, %119 in 1 : vector<8x4xf32>, vector<8x32xf32>, vector<8x4xf32> -> vector<8x40xf32>
    %121 = vector.extract_strided_slice %118 {offsets = [0, 0, 0], sizes = [1, 8, 8], strides = [1, 1, 1]} : vector<9x8x8xf32> to vector<1x8x8xf32>
    %122 = vector.shape_cast %121 : vector<1x8x8xf32> to vector<8x8xf32>
    %123 = vector.extract_strided_slice %120 {offsets = [0, 0], sizes = [8, 32], strides = [1, 1]} : vector<8x40xf32> to vector<8x32xf32>
    %cst_44 = arith.constant dense<0.000000e+00> : vector<8x32xf32>
    %124 = tpu.matmul %122, %123, %cst_44 {dimension_numbers = #tpu.dot_dimension_numbers<[1], [0], [0], [1], [0, 0, 1, 1], [], []>} : vector<8x8xf32>, vector<8x32xf32>, vector<8x32xf32> -> vector<8x32xf32>
    %125 = vector.extract_strided_slice %118 {offsets = [1, 0, 0], sizes = [1, 8, 8], strides = [1, 1, 1]} : vector<9x8x8xf32> to vector<1x8x8xf32>
    %126 = vector.shape_cast %125 : vector<1x8x8xf32> to vector<8x8xf32>
    %127 = vector.extract_strided_slice %120 {offsets = [0, 1], sizes = [8, 32], strides = [1, 1]} : vector<8x40xf32> to vector<8x32xf32>
    %cst_45 = arith.constant dense<0.000000e+00> : vector<8x32xf32>
    %128 = tpu.matmul %126, %127, %cst_45 {dimension_numbers = #tpu.dot_dimension_numbers<[1], [0], [0], [1], [0, 0, 1, 1], [], []>} : vector<8x8xf32>, vector<8x32xf32>, vector<8x32xf32> -> vector<8x32xf32>
    %129 = arith.addf %124, %128 : vector<8x32xf32>
    %130 = vector.extract_strided_slice %118 {offsets = [2, 0, 0], sizes = [1, 8, 8], strides = [1, 1, 1]} : vector<9x8x8xf32> to vector<1x8x8xf32>
    %131 = vector.shape_cast %130 : vector<1x8x8xf32> to vector<8x8xf32>
    %132 = vector.extract_strided_slice %120 {offsets = [0, 2], sizes = [8, 32], strides = [1, 1]} : vector<8x40xf32> to vector<8x32xf32>
    %cst_46 = arith.constant dense<0.000000e+00> : vector<8x32xf32>
    %133 = tpu.matmul %131, %132, %cst_46 {dimension_numbers = #tpu.dot_dimension_numbers<[1], [0], [0], [1], [0, 0, 1, 1], [], []>} : vector<8x8xf32>, vector<8x32xf32>, vector<8x32xf32> -> vector<8x32xf32>
    %134 = arith.addf %129, %133 : vector<8x32xf32>
    %135 = vector.extract_strided_slice %118 {offsets = [3, 0, 0], sizes = [1, 8, 8], strides = [1, 1, 1]} : vector<9x8x8xf32> to vector<1x8x8xf32>
    %136 = vector.shape_cast %135 : vector<1x8x8xf32> to vector<8x8xf32>
    %137 = vector.extract_strided_slice %120 {offsets = [0, 3], sizes = [8, 32], strides = [1, 1]} : vector<8x40xf32> to vector<8x32xf32>
    %cst_47 = arith.constant dense<0.000000e+00> : vector<8x32xf32>
    %138 = tpu.matmul %136, %137, %cst_47 {dimension_numbers = #tpu.dot_dimension_numbers<[1], [0], [0], [1], [0, 0, 1, 1], [], []>} : vector<8x8xf32>, vector<8x32xf32>, vector<8x32xf32> -> vector<8x32xf32>
    %139 = arith.addf %134, %138 : vector<8x32xf32>
    %140 = vector.extract_strided_slice %118 {offsets = [4, 0, 0], sizes = [1, 8, 8], strides = [1, 1, 1]} : vector<9x8x8xf32> to vector<1x8x8xf32>
    %141 = vector.shape_cast %140 : vector<1x8x8xf32> to vector<8x8xf32>
    %142 = vector.extract_strided_slice %120 {offsets = [0, 4], sizes = [8, 32], strides = [1, 1]} : vector<8x40xf32> to vector<8x32xf32>
    %cst_48 = arith.constant dense<0.000000e+00> : vector<8x32xf32>
    %143 = tpu.matmul %141, %142, %cst_48 {dimension_numbers = #tpu.dot_dimension_numbers<[1], [0], [0], [1], [0, 0, 1, 1], [], []>} : vector<8x8xf32>, vector<8x32xf32>, vector<8x32xf32> -> vector<8x32xf32>
    %144 = arith.addf %139, %143 : vector<8x32xf32>
    %145 = vector.extract_strided_slice %118 {offsets = [5, 0, 0], sizes = [1, 8, 8], strides = [1, 1, 1]} : vector<9x8x8xf32> to vector<1x8x8xf32>
    %146 = vector.shape_cast %145 : vector<1x8x8xf32> to vector<8x8xf32>
    %147 = vector.extract_strided_slice %120 {offsets = [0, 5], sizes = [8, 32], strides = [1, 1]} : vector<8x40xf32> to vector<8x32xf32>
    %cst_49 = arith.constant dense<0.000000e+00> : vector<8x32xf32>
    %148 = tpu.matmul %146, %147, %cst_49 {dimension_numbers = #tpu.dot_dimension_numbers<[1], [0], [0], [1], [0, 0, 1, 1], [], []>} : vector<8x8xf32>, vector<8x32xf32>, vector<8x32xf32> -> vector<8x32xf32>
    %149 = arith.addf %144, %148 : vector<8x32xf32>
    %150 = vector.extract_strided_slice %118 {offsets = [6, 0, 0], sizes = [1, 8, 8], strides = [1, 1, 1]} : vector<9x8x8xf32> to vector<1x8x8xf32>
    %151 = vector.shape_cast %150 : vector<1x8x8xf32> to vector<8x8xf32>
    %152 = vector.extract_strided_slice %120 {offsets = [0, 6], sizes = [8, 32], strides = [1, 1]} : vector<8x40xf32> to vector<8x32xf32>
    %cst_50 = arith.constant dense<0.000000e+00> : vector<8x32xf32>
    %153 = tpu.matmul %151, %152, %cst_50 {dimension_numbers = #tpu.dot_dimension_numbers<[1], [0], [0], [1], [0, 0, 1, 1], [], []>} : vector<8x8xf32>, vector<8x32xf32>, vector<8x32xf32> -> vector<8x32xf32>
    %154 = arith.addf %149, %153 : vector<8x32xf32>
    %155 = vector.extract_strided_slice %118 {offsets = [7, 0, 0], sizes = [1, 8, 8], strides = [1, 1, 1]} : vector<9x8x8xf32> to vector<1x8x8xf32>
    %156 = vector.shape_cast %155 : vector<1x8x8xf32> to vector<8x8xf32>
    %157 = vector.extract_strided_slice %120 {offsets = [0, 7], sizes = [8, 32], strides = [1, 1]} : vector<8x40xf32> to vector<8x32xf32>
    %cst_51 = arith.constant dense<0.000000e+00> : vector<8x32xf32>
    %158 = tpu.matmul %156, %157, %cst_51 {dimension_numbers = #tpu.dot_dimension_numbers<[1], [0], [0], [1], [0, 0, 1, 1], [], []>} : vector<8x8xf32>, vector<8x32xf32>, vector<8x32xf32> -> vector<8x32xf32>
    %159 = arith.addf %154, %158 : vector<8x32xf32>
    %160 = vector.extract_strided_slice %118 {offsets = [8, 0, 0], sizes = [1, 8, 8], strides = [1, 1, 1]} : vector<9x8x8xf32> to vector<1x8x8xf32>
    %161 = vector.shape_cast %160 : vector<1x8x8xf32> to vector<8x8xf32>
    %162 = vector.extract_strided_slice %120 {offsets = [0, 8], sizes = [8, 32], strides = [1, 1]} : vector<8x40xf32> to vector<8x32xf32>
    %cst_52 = arith.constant dense<0.000000e+00> : vector<8x32xf32>
    %163 = tpu.matmul %161, %162, %cst_52 {dimension_numbers = #tpu.dot_dimension_numbers<[1], [0], [0], [1], [0, 0, 1, 1], [], []>} : vector<8x8xf32>, vector<8x32xf32>, vector<8x32xf32> -> vector<8x32xf32>
    %164 = arith.addf %159, %163 : vector<8x32xf32>
    %c0_53 = arith.constant 0 : index
    %c0_54 = arith.constant 0 : index
    %c0_55 = arith.constant 0 : index
    %165 = vector.load %arg18[%c0_53, %c0_54, %c0_55] : memref<9x8x8xf32, #tpu.memory_space<vmem>>, vector<9x8x8xf32>
    %cst_56 = arith.constant 0.000000e+00 : f32
    %166 = vector.broadcast %cst_56 : f32 to vector<8x4xf32>
    %167 = tpu.concatenate %166, %117, %166 in 1 : vector<8x4xf32>, vector<8x32xf32>, vector<8x4xf32> -> vector<8x40xf32>
    %168 = vector.extract_strided_slice %165 {offsets = [0, 0, 0], sizes = [1, 8, 8], strides = [1, 1, 1]} : vector<9x8x8xf32> to vector<1x8x8xf32>
    %169 = vector.shape_cast %168 : vector<1x8x8xf32> to vector<8x8xf32>
    %170 = vector.extract_strided_slice %167 {offsets = [0, 0], sizes = [8, 32], strides = [1, 1]} : vector<8x40xf32> to vector<8x32xf32>
    %cst_57 = arith.constant dense<0.000000e+00> : vector<8x32xf32>
    %171 = tpu.matmul %169, %170, %cst_57 {dimension_numbers = #tpu.dot_dimension_numbers<[1], [0], [0], [1], [0, 0, 1, 1], [], []>} : vector<8x8xf32>, vector<8x32xf32>, vector<8x32xf32> -> vector<8x32xf32>
    %172 = vector.extract_strided_slice %165 {offsets = [1, 0, 0], sizes = [1, 8, 8], strides = [1, 1, 1]} : vector<9x8x8xf32> to vector<1x8x8xf32>
    %173 = vector.shape_cast %172 : vector<1x8x8xf32> to vector<8x8xf32>
    %174 = vector.extract_strided_slice %167 {offsets = [0, 1], sizes = [8, 32], strides = [1, 1]} : vector<8x40xf32> to vector<8x32xf32>
    %cst_58 = arith.constant dense<0.000000e+00> : vector<8x32xf32>
    %175 = tpu.matmul %173, %174, %cst_58 {dimension_numbers = #tpu.dot_dimension_numbers<[1], [0], [0], [1], [0, 0, 1, 1], [], []>} : vector<8x8xf32>, vector<8x32xf32>, vector<8x32xf32> -> vector<8x32xf32>
    %176 = arith.addf %171, %175 : vector<8x32xf32>
    %177 = vector.extract_strided_slice %165 {offsets = [2, 0, 0], sizes = [1, 8, 8], strides = [1, 1, 1]} : vector<9x8x8xf32> to vector<1x8x8xf32>
    %178 = vector.shape_cast %177 : vector<1x8x8xf32> to vector<8x8xf32>
    %179 = vector.extract_strided_slice %167 {offsets = [0, 2], sizes = [8, 32], strides = [1, 1]} : vector<8x40xf32> to vector<8x32xf32>
    %cst_59 = arith.constant dense<0.000000e+00> : vector<8x32xf32>
    %180 = tpu.matmul %178, %179, %cst_59 {dimension_numbers = #tpu.dot_dimension_numbers<[1], [0], [0], [1], [0, 0, 1, 1], [], []>} : vector<8x8xf32>, vector<8x32xf32>, vector<8x32xf32> -> vector<8x32xf32>
    %181 = arith.addf %176, %180 : vector<8x32xf32>
    %182 = vector.extract_strided_slice %165 {offsets = [3, 0, 0], sizes = [1, 8, 8], strides = [1, 1, 1]} : vector<9x8x8xf32> to vector<1x8x8xf32>
    %183 = vector.shape_cast %182 : vector<1x8x8xf32> to vector<8x8xf32>
    %184 = vector.extract_strided_slice %167 {offsets = [0, 3], sizes = [8, 32], strides = [1, 1]} : vector<8x40xf32> to vector<8x32xf32>
    %cst_60 = arith.constant dense<0.000000e+00> : vector<8x32xf32>
    %185 = tpu.matmul %183, %184, %cst_60 {dimension_numbers = #tpu.dot_dimension_numbers<[1], [0], [0], [1], [0, 0, 1, 1], [], []>} : vector<8x8xf32>, vector<8x32xf32>, vector<8x32xf32> -> vector<8x32xf32>
    %186 = arith.addf %181, %185 : vector<8x32xf32>
    %187 = vector.extract_strided_slice %165 {offsets = [4, 0, 0], sizes = [1, 8, 8], strides = [1, 1, 1]} : vector<9x8x8xf32> to vector<1x8x8xf32>
    %188 = vector.shape_cast %187 : vector<1x8x8xf32> to vector<8x8xf32>
    %189 = vector.extract_strided_slice %167 {offsets = [0, 4], sizes = [8, 32], strides = [1, 1]} : vector<8x40xf32> to vector<8x32xf32>
    %cst_61 = arith.constant dense<0.000000e+00> : vector<8x32xf32>
    %190 = tpu.matmul %188, %189, %cst_61 {dimension_numbers = #tpu.dot_dimension_numbers<[1], [0], [0], [1], [0, 0, 1, 1], [], []>} : vector<8x8xf32>, vector<8x32xf32>, vector<8x32xf32> -> vector<8x32xf32>
    %191 = arith.addf %186, %190 : vector<8x32xf32>
    %192 = vector.extract_strided_slice %165 {offsets = [5, 0, 0], sizes = [1, 8, 8], strides = [1, 1, 1]} : vector<9x8x8xf32> to vector<1x8x8xf32>
    %193 = vector.shape_cast %192 : vector<1x8x8xf32> to vector<8x8xf32>
    %194 = vector.extract_strided_slice %167 {offsets = [0, 5], sizes = [8, 32], strides = [1, 1]} : vector<8x40xf32> to vector<8x32xf32>
    %cst_62 = arith.constant dense<0.000000e+00> : vector<8x32xf32>
    %195 = tpu.matmul %193, %194, %cst_62 {dimension_numbers = #tpu.dot_dimension_numbers<[1], [0], [0], [1], [0, 0, 1, 1], [], []>} : vector<8x8xf32>, vector<8x32xf32>, vector<8x32xf32> -> vector<8x32xf32>
    %196 = arith.addf %191, %195 : vector<8x32xf32>
    %197 = vector.extract_strided_slice %165 {offsets = [6, 0, 0], sizes = [1, 8, 8], strides = [1, 1, 1]} : vector<9x8x8xf32> to vector<1x8x8xf32>
    %198 = vector.shape_cast %197 : vector<1x8x8xf32> to vector<8x8xf32>
    %199 = vector.extract_strided_slice %167 {offsets = [0, 6], sizes = [8, 32], strides = [1, 1]} : vector<8x40xf32> to vector<8x32xf32>
    %cst_63 = arith.constant dense<0.000000e+00> : vector<8x32xf32>
    %200 = tpu.matmul %198, %199, %cst_63 {dimension_numbers = #tpu.dot_dimension_numbers<[1], [0], [0], [1], [0, 0, 1, 1], [], []>} : vector<8x8xf32>, vector<8x32xf32>, vector<8x32xf32> -> vector<8x32xf32>
    %201 = arith.addf %196, %200 : vector<8x32xf32>
    %202 = vector.extract_strided_slice %165 {offsets = [7, 0, 0], sizes = [1, 8, 8], strides = [1, 1, 1]} : vector<9x8x8xf32> to vector<1x8x8xf32>
    %203 = vector.shape_cast %202 : vector<1x8x8xf32> to vector<8x8xf32>
    %204 = vector.extract_strided_slice %167 {offsets = [0, 7], sizes = [8, 32], strides = [1, 1]} : vector<8x40xf32> to vector<8x32xf32>
    %cst_64 = arith.constant dense<0.000000e+00> : vector<8x32xf32>
    %205 = tpu.matmul %203, %204, %cst_64 {dimension_numbers = #tpu.dot_dimension_numbers<[1], [0], [0], [1], [0, 0, 1, 1], [], []>} : vector<8x8xf32>, vector<8x32xf32>, vector<8x32xf32> -> vector<8x32xf32>
    %206 = arith.addf %201, %205 : vector<8x32xf32>
    %207 = vector.extract_strided_slice %165 {offsets = [8, 0, 0], sizes = [1, 8, 8], strides = [1, 1, 1]} : vector<9x8x8xf32> to vector<1x8x8xf32>
    %208 = vector.shape_cast %207 : vector<1x8x8xf32> to vector<8x8xf32>
    %209 = vector.extract_strided_slice %167 {offsets = [0, 8], sizes = [8, 32], strides = [1, 1]} : vector<8x40xf32> to vector<8x32xf32>
    %cst_65 = arith.constant dense<0.000000e+00> : vector<8x32xf32>
    %210 = tpu.matmul %208, %209, %cst_65 {dimension_numbers = #tpu.dot_dimension_numbers<[1], [0], [0], [1], [0, 0, 1, 1], [], []>} : vector<8x8xf32>, vector<8x32xf32>, vector<8x32xf32> -> vector<8x32xf32>
    %211 = arith.addf %206, %210 : vector<8x32xf32>
    %212 = arith.addf %164, %211 : vector<8x32xf32>
    %c0_66 = arith.constant 0 : index
    %c0_67 = arith.constant 0 : index
    %213 = vector.load %arg19[%c0_66, %c0_67] : memref<8x1xf32, #tpu.memory_space<vmem>>, vector<8x1xf32>
    %214 = vector.broadcast %213 : vector<8x1xf32> to vector<8x32xf32>
    %215 = arith.addf %212, %214 : vector<8x32xf32>
    %cst_68 = arith.constant 0.000000e+00 : f32
    %216 = vector.broadcast %cst_68 : f32 to vector<8x32xf32>
    %217 = arith.maximumf %215, %216 : vector<8x32xf32>
    %c0_69 = arith.constant 0 : index
    %c0_70 = arith.constant 0 : index
    %c0_71 = arith.constant 0 : index
    %218 = vector.load %arg11[%c0_69, %c0_70, %c0_71] : memref<9x6x8xf32, #tpu.memory_space<vmem>>, vector<9x6x8xf32>
    %219 = tpu.iota {dimensions = array<i32: 0>} : vector<32x104xi32>
    %220 = tpu.iota {dimensions = array<i32: 1>} : vector<32x104xi32>
    %c3_i32 = arith.constant 3 : i32
    %221 = vector.broadcast %c3_i32 : i32 to vector<32x104xi32>
    %222 = arith.muli %221, %219 : vector<32x104xi32>
    %c5_i32 = arith.constant 5 : i32
    %223 = vector.broadcast %c5_i32 : i32 to vector<32x104xi32>
    %224 = arith.addi %222, %223 : vector<32x104xi32>
    %225 = arith.cmpi eq, %220, %224 : vector<32x104xi32>
    %226 = arith.extui %225 : vector<32x104xi1> to vector<32x104xi32>
    %227 = arith.sitofp %226 : vector<32x104xi32> to vector<32x104xf32>
    %cst_72 = arith.constant dense<0.000000e+00> : vector<8x104xf32>
    %228 = tpu.matmul %217, %227, %cst_72 {dimension_numbers = #tpu.dot_dimension_numbers<[1], [0], [0], [1], [0, 0, 1, 1], [], []>} : vector<8x32xf32>, vector<32x104xf32>, vector<8x104xf32> -> vector<8x104xf32>
    %229 = vector.extract_strided_slice %218 {offsets = [0, 0, 0], sizes = [1, 6, 8], strides = [1, 1, 1]} : vector<9x6x8xf32> to vector<1x6x8xf32>
    %230 = vector.shape_cast %229 : vector<1x6x8xf32> to vector<6x8xf32>
    %231 = vector.extract_strided_slice %228 {offsets = [0, 0], sizes = [8, 96], strides = [1, 1]} : vector<8x104xf32> to vector<8x96xf32>
    %cst_73 = arith.constant dense<0.000000e+00> : vector<6x96xf32>
    %232 = tpu.matmul %230, %231, %cst_73 {dimension_numbers = #tpu.dot_dimension_numbers<[1], [0], [0], [1], [0, 0, 1, 1], [], []>} : vector<6x8xf32>, vector<8x96xf32>, vector<6x96xf32> -> vector<6x96xf32>
    %233 = vector.extract_strided_slice %218 {offsets = [1, 0, 0], sizes = [1, 6, 8], strides = [1, 1, 1]} : vector<9x6x8xf32> to vector<1x6x8xf32>
    %234 = vector.shape_cast %233 : vector<1x6x8xf32> to vector<6x8xf32>
    %235 = vector.extract_strided_slice %228 {offsets = [0, 1], sizes = [8, 96], strides = [1, 1]} : vector<8x104xf32> to vector<8x96xf32>
    %cst_74 = arith.constant dense<0.000000e+00> : vector<6x96xf32>
    %236 = tpu.matmul %234, %235, %cst_74 {dimension_numbers = #tpu.dot_dimension_numbers<[1], [0], [0], [1], [0, 0, 1, 1], [], []>} : vector<6x8xf32>, vector<8x96xf32>, vector<6x96xf32> -> vector<6x96xf32>
    %237 = arith.addf %232, %236 : vector<6x96xf32>
    %238 = vector.extract_strided_slice %218 {offsets = [2, 0, 0], sizes = [1, 6, 8], strides = [1, 1, 1]} : vector<9x6x8xf32> to vector<1x6x8xf32>
    %239 = vector.shape_cast %238 : vector<1x6x8xf32> to vector<6x8xf32>
    %240 = vector.extract_strided_slice %228 {offsets = [0, 2], sizes = [8, 96], strides = [1, 1]} : vector<8x104xf32> to vector<8x96xf32>
    %cst_75 = arith.constant dense<0.000000e+00> : vector<6x96xf32>
    %241 = tpu.matmul %239, %240, %cst_75 {dimension_numbers = #tpu.dot_dimension_numbers<[1], [0], [0], [1], [0, 0, 1, 1], [], []>} : vector<6x8xf32>, vector<8x96xf32>, vector<6x96xf32> -> vector<6x96xf32>
    %242 = arith.addf %237, %241 : vector<6x96xf32>
    %243 = vector.extract_strided_slice %218 {offsets = [3, 0, 0], sizes = [1, 6, 8], strides = [1, 1, 1]} : vector<9x6x8xf32> to vector<1x6x8xf32>
    %244 = vector.shape_cast %243 : vector<1x6x8xf32> to vector<6x8xf32>
    %245 = vector.extract_strided_slice %228 {offsets = [0, 3], sizes = [8, 96], strides = [1, 1]} : vector<8x104xf32> to vector<8x96xf32>
    %cst_76 = arith.constant dense<0.000000e+00> : vector<6x96xf32>
    %246 = tpu.matmul %244, %245, %cst_76 {dimension_numbers = #tpu.dot_dimension_numbers<[1], [0], [0], [1], [0, 0, 1, 1], [], []>} : vector<6x8xf32>, vector<8x96xf32>, vector<6x96xf32> -> vector<6x96xf32>
    %247 = arith.addf %242, %246 : vector<6x96xf32>
    %248 = vector.extract_strided_slice %218 {offsets = [4, 0, 0], sizes = [1, 6, 8], strides = [1, 1, 1]} : vector<9x6x8xf32> to vector<1x6x8xf32>
    %249 = vector.shape_cast %248 : vector<1x6x8xf32> to vector<6x8xf32>
    %250 = vector.extract_strided_slice %228 {offsets = [0, 4], sizes = [8, 96], strides = [1, 1]} : vector<8x104xf32> to vector<8x96xf32>
    %cst_77 = arith.constant dense<0.000000e+00> : vector<6x96xf32>
    %251 = tpu.matmul %249, %250, %cst_77 {dimension_numbers = #tpu.dot_dimension_numbers<[1], [0], [0], [1], [0, 0, 1, 1], [], []>} : vector<6x8xf32>, vector<8x96xf32>, vector<6x96xf32> -> vector<6x96xf32>
    %252 = arith.addf %247, %251 : vector<6x96xf32>
    %253 = vector.extract_strided_slice %218 {offsets = [5, 0, 0], sizes = [1, 6, 8], strides = [1, 1, 1]} : vector<9x6x8xf32> to vector<1x6x8xf32>
    %254 = vector.shape_cast %253 : vector<1x6x8xf32> to vector<6x8xf32>
    %255 = vector.extract_strided_slice %228 {offsets = [0, 5], sizes = [8, 96], strides = [1, 1]} : vector<8x104xf32> to vector<8x96xf32>
    %cst_78 = arith.constant dense<0.000000e+00> : vector<6x96xf32>
    %256 = tpu.matmul %254, %255, %cst_78 {dimension_numbers = #tpu.dot_dimension_numbers<[1], [0], [0], [1], [0, 0, 1, 1], [], []>} : vector<6x8xf32>, vector<8x96xf32>, vector<6x96xf32> -> vector<6x96xf32>
    %257 = arith.addf %252, %256 : vector<6x96xf32>
    %258 = vector.extract_strided_slice %218 {offsets = [6, 0, 0], sizes = [1, 6, 8], strides = [1, 1, 1]} : vector<9x6x8xf32> to vector<1x6x8xf32>
    %259 = vector.shape_cast %258 : vector<1x6x8xf32> to vector<6x8xf32>
    %260 = vector.extract_strided_slice %228 {offsets = [0, 6], sizes = [8, 96], strides = [1, 1]} : vector<8x104xf32> to vector<8x96xf32>
    %cst_79 = arith.constant dense<0.000000e+00> : vector<6x96xf32>
    %261 = tpu.matmul %259, %260, %cst_79 {dimension_numbers = #tpu.dot_dimension_numbers<[1], [0], [0], [1], [0, 0, 1, 1], [], []>} : vector<6x8xf32>, vector<8x96xf32>, vector<6x96xf32> -> vector<6x96xf32>
    %262 = arith.addf %257, %261 : vector<6x96xf32>
    %263 = vector.extract_strided_slice %218 {offsets = [7, 0, 0], sizes = [1, 6, 8], strides = [1, 1, 1]} : vector<9x6x8xf32> to vector<1x6x8xf32>
    %264 = vector.shape_cast %263 : vector<1x6x8xf32> to vector<6x8xf32>
    %265 = vector.extract_strided_slice %228 {offsets = [0, 7], sizes = [8, 96], strides = [1, 1]} : vector<8x104xf32> to vector<8x96xf32>
    %cst_80 = arith.constant dense<0.000000e+00> : vector<6x96xf32>
    %266 = tpu.matmul %264, %265, %cst_80 {dimension_numbers = #tpu.dot_dimension_numbers<[1], [0], [0], [1], [0, 0, 1, 1], [], []>} : vector<6x8xf32>, vector<8x96xf32>, vector<6x96xf32> -> vector<6x96xf32>
    %267 = arith.addf %262, %266 : vector<6x96xf32>
    %268 = vector.extract_strided_slice %218 {offsets = [8, 0, 0], sizes = [1, 6, 8], strides = [1, 1, 1]} : vector<9x6x8xf32> to vector<1x6x8xf32>
    %269 = vector.shape_cast %268 : vector<1x6x8xf32> to vector<6x8xf32>
    %270 = vector.extract_strided_slice %228 {offsets = [0, 8], sizes = [8, 96], strides = [1, 1]} : vector<8x104xf32> to vector<8x96xf32>
    %cst_81 = arith.constant dense<0.000000e+00> : vector<6x96xf32>
    %271 = tpu.matmul %269, %270, %cst_81 {dimension_numbers = #tpu.dot_dimension_numbers<[1], [0], [0], [1], [0, 0, 1, 1], [], []>} : vector<6x8xf32>, vector<8x96xf32>, vector<6x96xf32> -> vector<6x96xf32>
    %272 = arith.addf %267, %271 : vector<6x96xf32>
    %c0_82 = arith.constant 0 : index
    %c0_83 = arith.constant 0 : index
    %273 = vector.load %arg12[%c0_82, %c0_83] : memref<6x1xf32, #tpu.memory_space<vmem>>, vector<6x1xf32>
    %274 = vector.broadcast %273 : vector<6x1xf32> to vector<6x96xf32>
    %275 = arith.addf %272, %274 : vector<6x96xf32>
    %c0_84 = arith.constant 0 : index
    %c0_85 = arith.constant 0 : index
    %c0_86 = arith.constant 0 : index
    %276 = vector.load %arg5[%c0_84, %c0_85, %c0_86] : memref<8x8x8xf32, #tpu.memory_space<vmem>>, vector<8x8x8xf32>
    %277 = tpu.iota {dimensions = array<i32: 0>} : vector<16x39xi32>
    %278 = tpu.iota {dimensions = array<i32: 1>} : vector<16x39xi32>
    %c2_i32_87 = arith.constant 2 : i32
    %279 = vector.broadcast %c2_i32_87 : i32 to vector<16x39xi32>
    %280 = arith.muli %279, %277 : vector<16x39xi32>
    %c4_i32_88 = arith.constant 4 : i32
    %281 = vector.broadcast %c4_i32_88 : i32 to vector<16x39xi32>
    %282 = arith.addi %280, %281 : vector<16x39xi32>
    %283 = arith.cmpi eq, %278, %282 : vector<16x39xi32>
    %284 = arith.extui %283 : vector<16x39xi1> to vector<16x39xi32>
    %285 = arith.sitofp %284 : vector<16x39xi32> to vector<16x39xf32>
    %cst_89 = arith.constant dense<0.000000e+00> : vector<8x39xf32>
    %286 = tpu.matmul %5, %285, %cst_89 {dimension_numbers = #tpu.dot_dimension_numbers<[1], [0], [0], [1], [0, 0, 1, 1], [], []>} : vector<8x16xf32>, vector<16x39xf32>, vector<8x39xf32> -> vector<8x39xf32>
    %287 = vector.extract_strided_slice %276 {offsets = [0, 0, 0], sizes = [1, 8, 8], strides = [1, 1, 1]} : vector<8x8x8xf32> to vector<1x8x8xf32>
    %288 = vector.shape_cast %287 : vector<1x8x8xf32> to vector<8x8xf32>
    %289 = vector.extract_strided_slice %286 {offsets = [0, 0], sizes = [8, 32], strides = [1, 1]} : vector<8x39xf32> to vector<8x32xf32>
    %cst_90 = arith.constant dense<0.000000e+00> : vector<8x32xf32>
    %290 = tpu.matmul %288, %289, %cst_90 {dimension_numbers = #tpu.dot_dimension_numbers<[1], [0], [0], [1], [0, 0, 1, 1], [], []>} : vector<8x8xf32>, vector<8x32xf32>, vector<8x32xf32> -> vector<8x32xf32>
    %291 = vector.extract_strided_slice %276 {offsets = [1, 0, 0], sizes = [1, 8, 8], strides = [1, 1, 1]} : vector<8x8x8xf32> to vector<1x8x8xf32>
    %292 = vector.shape_cast %291 : vector<1x8x8xf32> to vector<8x8xf32>
    %293 = vector.extract_strided_slice %286 {offsets = [0, 1], sizes = [8, 32], strides = [1, 1]} : vector<8x39xf32> to vector<8x32xf32>
    %cst_91 = arith.constant dense<0.000000e+00> : vector<8x32xf32>
    %294 = tpu.matmul %292, %293, %cst_91 {dimension_numbers = #tpu.dot_dimension_numbers<[1], [0], [0], [1], [0, 0, 1, 1], [], []>} : vector<8x8xf32>, vector<8x32xf32>, vector<8x32xf32> -> vector<8x32xf32>
    %295 = arith.addf %290, %294 : vector<8x32xf32>
    %296 = vector.extract_strided_slice %276 {offsets = [2, 0, 0], sizes = [1, 8, 8], strides = [1, 1, 1]} : vector<8x8x8xf32> to vector<1x8x8xf32>
    %297 = vector.shape_cast %296 : vector<1x8x8xf32> to vector<8x8xf32>
    %298 = vector.extract_strided_slice %286 {offsets = [0, 2], sizes = [8, 32], strides = [1, 1]} : vector<8x39xf32> to vector<8x32xf32>
    %cst_92 = arith.constant dense<0.000000e+00> : vector<8x32xf32>
    %299 = tpu.matmul %297, %298, %cst_92 {dimension_numbers = #tpu.dot_dimension_numbers<[1], [0], [0], [1], [0, 0, 1, 1], [], []>} : vector<8x8xf32>, vector<8x32xf32>, vector<8x32xf32> -> vector<8x32xf32>
    %300 = arith.addf %295, %299 : vector<8x32xf32>
    %301 = vector.extract_strided_slice %276 {offsets = [3, 0, 0], sizes = [1, 8, 8], strides = [1, 1, 1]} : vector<8x8x8xf32> to vector<1x8x8xf32>
    %302 = vector.shape_cast %301 : vector<1x8x8xf32> to vector<8x8xf32>
    %303 = vector.extract_strided_slice %286 {offsets = [0, 3], sizes = [8, 32], strides = [1, 1]} : vector<8x39xf32> to vector<8x32xf32>
    %cst_93 = arith.constant dense<0.000000e+00> : vector<8x32xf32>
    %304 = tpu.matmul %302, %303, %cst_93 {dimension_numbers = #tpu.dot_dimension_numbers<[1], [0], [0], [1], [0, 0, 1, 1], [], []>} : vector<8x8xf32>, vector<8x32xf32>, vector<8x32xf32> -> vector<8x32xf32>
    %305 = arith.addf %300, %304 : vector<8x32xf32>
    %306 = vector.extract_strided_slice %276 {offsets = [4, 0, 0], sizes = [1, 8, 8], strides = [1, 1, 1]} : vector<8x8x8xf32> to vector<1x8x8xf32>
    %307 = vector.shape_cast %306 : vector<1x8x8xf32> to vector<8x8xf32>
    %308 = vector.extract_strided_slice %286 {offsets = [0, 4], sizes = [8, 32], strides = [1, 1]} : vector<8x39xf32> to vector<8x32xf32>
    %cst_94 = arith.constant dense<0.000000e+00> : vector<8x32xf32>
    %309 = tpu.matmul %307, %308, %cst_94 {dimension_numbers = #tpu.dot_dimension_numbers<[1], [0], [0], [1], [0, 0, 1, 1], [], []>} : vector<8x8xf32>, vector<8x32xf32>, vector<8x32xf32> -> vector<8x32xf32>
    %310 = arith.addf %305, %309 : vector<8x32xf32>
    %311 = vector.extract_strided_slice %276 {offsets = [5, 0, 0], sizes = [1, 8, 8], strides = [1, 1, 1]} : vector<8x8x8xf32> to vector<1x8x8xf32>
    %312 = vector.shape_cast %311 : vector<1x8x8xf32> to vector<8x8xf32>
    %313 = vector.extract_strided_slice %286 {offsets = [0, 5], sizes = [8, 32], strides = [1, 1]} : vector<8x39xf32> to vector<8x32xf32>
    %cst_95 = arith.constant dense<0.000000e+00> : vector<8x32xf32>
    %314 = tpu.matmul %312, %313, %cst_95 {dimension_numbers = #tpu.dot_dimension_numbers<[1], [0], [0], [1], [0, 0, 1, 1], [], []>} : vector<8x8xf32>, vector<8x32xf32>, vector<8x32xf32> -> vector<8x32xf32>
    %315 = arith.addf %310, %314 : vector<8x32xf32>
    %316 = vector.extract_strided_slice %276 {offsets = [6, 0, 0], sizes = [1, 8, 8], strides = [1, 1, 1]} : vector<8x8x8xf32> to vector<1x8x8xf32>
    %317 = vector.shape_cast %316 : vector<1x8x8xf32> to vector<8x8xf32>
    %318 = vector.extract_strided_slice %286 {offsets = [0, 6], sizes = [8, 32], strides = [1, 1]} : vector<8x39xf32> to vector<8x32xf32>
    %cst_96 = arith.constant dense<0.000000e+00> : vector<8x32xf32>
    %319 = tpu.matmul %317, %318, %cst_96 {dimension_numbers = #tpu.dot_dimension_numbers<[1], [0], [0], [1], [0, 0, 1, 1], [], []>} : vector<8x8xf32>, vector<8x32xf32>, vector<8x32xf32> -> vector<8x32xf32>
    %320 = arith.addf %315, %319 : vector<8x32xf32>
    %321 = vector.extract_strided_slice %276 {offsets = [7, 0, 0], sizes = [1, 8, 8], strides = [1, 1, 1]} : vector<8x8x8xf32> to vector<1x8x8xf32>
    %322 = vector.shape_cast %321 : vector<1x8x8xf32> to vector<8x8xf32>
    %323 = vector.extract_strided_slice %286 {offsets = [0, 7], sizes = [8, 32], strides = [1, 1]} : vector<8x39xf32> to vector<8x32xf32>
    %cst_97 = arith.constant dense<0.000000e+00> : vector<8x32xf32>
    %324 = tpu.matmul %322, %323, %cst_97 {dimension_numbers = #tpu.dot_dimension_numbers<[1], [0], [0], [1], [0, 0, 1, 1], [], []>} : vector<8x8xf32>, vector<8x32xf32>, vector<8x32xf32> -> vector<8x32xf32>
    %325 = arith.addf %320, %324 : vector<8x32xf32>
    %c0_98 = arith.constant 0 : index
    %c0_99 = arith.constant 0 : index
    %326 = vector.load %arg6[%c0_98, %c0_99] : memref<8x1xf32, #tpu.memory_space<vmem>>, vector<8x1xf32>
    %327 = vector.broadcast %326 : vector<8x1xf32> to vector<8x32xf32>
    %328 = arith.addf %325, %327 : vector<8x32xf32>
    %c0_100 = arith.constant 0 : index
    %c0_101 = arith.constant 0 : index
    %c0_102 = arith.constant 0 : index
    %329 = vector.load %arg9[%c0_100, %c0_101, %c0_102] : memref<9x6x8xf32, #tpu.memory_space<vmem>>, vector<9x6x8xf32>
    %330 = tpu.iota {dimensions = array<i32: 0>} : vector<32x104xi32>
    %331 = tpu.iota {dimensions = array<i32: 1>} : vector<32x104xi32>
    %c3_i32_103 = arith.constant 3 : i32
    %332 = vector.broadcast %c3_i32_103 : i32 to vector<32x104xi32>
    %333 = arith.muli %332, %330 : vector<32x104xi32>
    %c5_i32_104 = arith.constant 5 : i32
    %334 = vector.broadcast %c5_i32_104 : i32 to vector<32x104xi32>
    %335 = arith.addi %333, %334 : vector<32x104xi32>
    %336 = arith.cmpi eq, %331, %335 : vector<32x104xi32>
    %337 = arith.extui %336 : vector<32x104xi1> to vector<32x104xi32>
    %338 = arith.sitofp %337 : vector<32x104xi32> to vector<32x104xf32>
    %cst_105 = arith.constant dense<0.000000e+00> : vector<8x104xf32>
    %339 = tpu.matmul %328, %338, %cst_105 {dimension_numbers = #tpu.dot_dimension_numbers<[1], [0], [0], [1], [0, 0, 1, 1], [], []>} : vector<8x32xf32>, vector<32x104xf32>, vector<8x104xf32> -> vector<8x104xf32>
    %340 = vector.extract_strided_slice %329 {offsets = [0, 0, 0], sizes = [1, 6, 8], strides = [1, 1, 1]} : vector<9x6x8xf32> to vector<1x6x8xf32>
    %341 = vector.shape_cast %340 : vector<1x6x8xf32> to vector<6x8xf32>
    %342 = vector.extract_strided_slice %339 {offsets = [0, 0], sizes = [8, 96], strides = [1, 1]} : vector<8x104xf32> to vector<8x96xf32>
    %cst_106 = arith.constant dense<0.000000e+00> : vector<6x96xf32>
    %343 = tpu.matmul %341, %342, %cst_106 {dimension_numbers = #tpu.dot_dimension_numbers<[1], [0], [0], [1], [0, 0, 1, 1], [], []>} : vector<6x8xf32>, vector<8x96xf32>, vector<6x96xf32> -> vector<6x96xf32>
    %344 = vector.extract_strided_slice %329 {offsets = [1, 0, 0], sizes = [1, 6, 8], strides = [1, 1, 1]} : vector<9x6x8xf32> to vector<1x6x8xf32>
    %345 = vector.shape_cast %344 : vector<1x6x8xf32> to vector<6x8xf32>
    %346 = vector.extract_strided_slice %339 {offsets = [0, 1], sizes = [8, 96], strides = [1, 1]} : vector<8x104xf32> to vector<8x96xf32>
    %cst_107 = arith.constant dense<0.000000e+00> : vector<6x96xf32>
    %347 = tpu.matmul %345, %346, %cst_107 {dimension_numbers = #tpu.dot_dimension_numbers<[1], [0], [0], [1], [0, 0, 1, 1], [], []>} : vector<6x8xf32>, vector<8x96xf32>, vector<6x96xf32> -> vector<6x96xf32>
    %348 = arith.addf %343, %347 : vector<6x96xf32>
    %349 = vector.extract_strided_slice %329 {offsets = [2, 0, 0], sizes = [1, 6, 8], strides = [1, 1, 1]} : vector<9x6x8xf32> to vector<1x6x8xf32>
    %350 = vector.shape_cast %349 : vector<1x6x8xf32> to vector<6x8xf32>
    %351 = vector.extract_strided_slice %339 {offsets = [0, 2], sizes = [8, 96], strides = [1, 1]} : vector<8x104xf32> to vector<8x96xf32>
    %cst_108 = arith.constant dense<0.000000e+00> : vector<6x96xf32>
    %352 = tpu.matmul %350, %351, %cst_108 {dimension_numbers = #tpu.dot_dimension_numbers<[1], [0], [0], [1], [0, 0, 1, 1], [], []>} : vector<6x8xf32>, vector<8x96xf32>, vector<6x96xf32> -> vector<6x96xf32>
    %353 = arith.addf %348, %352 : vector<6x96xf32>
    %354 = vector.extract_strided_slice %329 {offsets = [3, 0, 0], sizes = [1, 6, 8], strides = [1, 1, 1]} : vector<9x6x8xf32> to vector<1x6x8xf32>
    %355 = vector.shape_cast %354 : vector<1x6x8xf32> to vector<6x8xf32>
    %356 = vector.extract_strided_slice %339 {offsets = [0, 3], sizes = [8, 96], strides = [1, 1]} : vector<8x104xf32> to vector<8x96xf32>
    %cst_109 = arith.constant dense<0.000000e+00> : vector<6x96xf32>
    %357 = tpu.matmul %355, %356, %cst_109 {dimension_numbers = #tpu.dot_dimension_numbers<[1], [0], [0], [1], [0, 0, 1, 1], [], []>} : vector<6x8xf32>, vector<8x96xf32>, vector<6x96xf32> -> vector<6x96xf32>
    %358 = arith.addf %353, %357 : vector<6x96xf32>
    %359 = vector.extract_strided_slice %329 {offsets = [4, 0, 0], sizes = [1, 6, 8], strides = [1, 1, 1]} : vector<9x6x8xf32> to vector<1x6x8xf32>
    %360 = vector.shape_cast %359 : vector<1x6x8xf32> to vector<6x8xf32>
    %361 = vector.extract_strided_slice %339 {offsets = [0, 4], sizes = [8, 96], strides = [1, 1]} : vector<8x104xf32> to vector<8x96xf32>
    %cst_110 = arith.constant dense<0.000000e+00> : vector<6x96xf32>
    %362 = tpu.matmul %360, %361, %cst_110 {dimension_numbers = #tpu.dot_dimension_numbers<[1], [0], [0], [1], [0, 0, 1, 1], [], []>} : vector<6x8xf32>, vector<8x96xf32>, vector<6x96xf32> -> vector<6x96xf32>
    %363 = arith.addf %358, %362 : vector<6x96xf32>
    %364 = vector.extract_strided_slice %329 {offsets = [5, 0, 0], sizes = [1, 6, 8], strides = [1, 1, 1]} : vector<9x6x8xf32> to vector<1x6x8xf32>
    %365 = vector.shape_cast %364 : vector<1x6x8xf32> to vector<6x8xf32>
    %366 = vector.extract_strided_slice %339 {offsets = [0, 5], sizes = [8, 96], strides = [1, 1]} : vector<8x104xf32> to vector<8x96xf32>
    %cst_111 = arith.constant dense<0.000000e+00> : vector<6x96xf32>
    %367 = tpu.matmul %365, %366, %cst_111 {dimension_numbers = #tpu.dot_dimension_numbers<[1], [0], [0], [1], [0, 0, 1, 1], [], []>} : vector<6x8xf32>, vector<8x96xf32>, vector<6x96xf32> -> vector<6x96xf32>
    %368 = arith.addf %363, %367 : vector<6x96xf32>
    %369 = vector.extract_strided_slice %329 {offsets = [6, 0, 0], sizes = [1, 6, 8], strides = [1, 1, 1]} : vector<9x6x8xf32> to vector<1x6x8xf32>
    %370 = vector.shape_cast %369 : vector<1x6x8xf32> to vector<6x8xf32>
    %371 = vector.extract_strided_slice %339 {offsets = [0, 6], sizes = [8, 96], strides = [1, 1]} : vector<8x104xf32> to vector<8x96xf32>
    %cst_112 = arith.constant dense<0.000000e+00> : vector<6x96xf32>
    %372 = tpu.matmul %370, %371, %cst_112 {dimension_numbers = #tpu.dot_dimension_numbers<[1], [0], [0], [1], [0, 0, 1, 1], [], []>} : vector<6x8xf32>, vector<8x96xf32>, vector<6x96xf32> -> vector<6x96xf32>
    %373 = arith.addf %368, %372 : vector<6x96xf32>
    %374 = vector.extract_strided_slice %329 {offsets = [7, 0, 0], sizes = [1, 6, 8], strides = [1, 1, 1]} : vector<9x6x8xf32> to vector<1x6x8xf32>
    %375 = vector.shape_cast %374 : vector<1x6x8xf32> to vector<6x8xf32>
    %376 = vector.extract_strided_slice %339 {offsets = [0, 7], sizes = [8, 96], strides = [1, 1]} : vector<8x104xf32> to vector<8x96xf32>
    %cst_113 = arith.constant dense<0.000000e+00> : vector<6x96xf32>
    %377 = tpu.matmul %375, %376, %cst_113 {dimension_numbers = #tpu.dot_dimension_numbers<[1], [0], [0], [1], [0, 0, 1, 1], [], []>} : vector<6x8xf32>, vector<8x96xf32>, vector<6x96xf32> -> vector<6x96xf32>
    %378 = arith.addf %373, %377 : vector<6x96xf32>
    %379 = vector.extract_strided_slice %329 {offsets = [8, 0, 0], sizes = [1, 6, 8], strides = [1, 1, 1]} : vector<9x6x8xf32> to vector<1x6x8xf32>
    %380 = vector.shape_cast %379 : vector<1x6x8xf32> to vector<6x8xf32>
    %381 = vector.extract_strided_slice %339 {offsets = [0, 8], sizes = [8, 96], strides = [1, 1]} : vector<8x104xf32> to vector<8x96xf32>
    %cst_114 = arith.constant dense<0.000000e+00> : vector<6x96xf32>
    %382 = tpu.matmul %380, %381, %cst_114 {dimension_numbers = #tpu.dot_dimension_numbers<[1], [0], [0], [1], [0, 0, 1, 1], [], []>} : vector<6x8xf32>, vector<8x96xf32>, vector<6x96xf32> -> vector<6x96xf32>
    %383 = arith.addf %378, %382 : vector<6x96xf32>
    %c0_115 = arith.constant 0 : index
    %c0_116 = arith.constant 0 : index
    %384 = vector.load %arg10[%c0_115, %c0_116] : memref<6x1xf32, #tpu.memory_space<vmem>>, vector<6x1xf32>
    %385 = vector.broadcast %384 : vector<6x1xf32> to vector<6x96xf32>
    %386 = arith.addf %383, %385 : vector<6x96xf32>
    %c0_117 = arith.constant 0 : index
    %c0_118 = arith.constant 0 : index
    %c0_119 = arith.constant 0 : index
    %387 = vector.load %arg20[%c0_117, %c0_118, %c0_119] : memref<9x6x6xf32, #tpu.memory_space<vmem>>, vector<9x6x6xf32>
    %cst_120 = arith.constant 0.000000e+00 : f32
    %388 = vector.broadcast %cst_120 : f32 to vector<6x4xf32>
    %389 = tpu.concatenate %388, %386, %388 in 1 : vector<6x4xf32>, vector<6x96xf32>, vector<6x4xf32> -> vector<6x104xf32>
    %390 = vector.extract_strided_slice %387 {offsets = [0, 0, 0], sizes = [1, 6, 6], strides = [1, 1, 1]} : vector<9x6x6xf32> to vector<1x6x6xf32>
    %391 = vector.shape_cast %390 : vector<1x6x6xf32> to vector<6x6xf32>
    %392 = vector.extract_strided_slice %389 {offsets = [0, 0], sizes = [6, 96], strides = [1, 1]} : vector<6x104xf32> to vector<6x96xf32>
    %cst_121 = arith.constant dense<0.000000e+00> : vector<6x96xf32>
    %393 = tpu.matmul %391, %392, %cst_121 {dimension_numbers = #tpu.dot_dimension_numbers<[1], [0], [0], [1], [0, 0, 1, 1], [], []>} : vector<6x6xf32>, vector<6x96xf32>, vector<6x96xf32> -> vector<6x96xf32>
    %394 = vector.extract_strided_slice %387 {offsets = [1, 0, 0], sizes = [1, 6, 6], strides = [1, 1, 1]} : vector<9x6x6xf32> to vector<1x6x6xf32>
    %395 = vector.shape_cast %394 : vector<1x6x6xf32> to vector<6x6xf32>
    %396 = vector.extract_strided_slice %389 {offsets = [0, 1], sizes = [6, 96], strides = [1, 1]} : vector<6x104xf32> to vector<6x96xf32>
    %cst_122 = arith.constant dense<0.000000e+00> : vector<6x96xf32>
    %397 = tpu.matmul %395, %396, %cst_122 {dimension_numbers = #tpu.dot_dimension_numbers<[1], [0], [0], [1], [0, 0, 1, 1], [], []>} : vector<6x6xf32>, vector<6x96xf32>, vector<6x96xf32> -> vector<6x96xf32>
    %398 = arith.addf %393, %397 : vector<6x96xf32>
    %399 = vector.extract_strided_slice %387 {offsets = [2, 0, 0], sizes = [1, 6, 6], strides = [1, 1, 1]} : vector<9x6x6xf32> to vector<1x6x6xf32>
    %400 = vector.shape_cast %399 : vector<1x6x6xf32> to vector<6x6xf32>
    %401 = vector.extract_strided_slice %389 {offsets = [0, 2], sizes = [6, 96], strides = [1, 1]} : vector<6x104xf32> to vector<6x96xf32>
    %cst_123 = arith.constant dense<0.000000e+00> : vector<6x96xf32>
    %402 = tpu.matmul %400, %401, %cst_123 {dimension_numbers = #tpu.dot_dimension_numbers<[1], [0], [0], [1], [0, 0, 1, 1], [], []>} : vector<6x6xf32>, vector<6x96xf32>, vector<6x96xf32> -> vector<6x96xf32>
    %403 = arith.addf %398, %402 : vector<6x96xf32>
    %404 = vector.extract_strided_slice %387 {offsets = [3, 0, 0], sizes = [1, 6, 6], strides = [1, 1, 1]} : vector<9x6x6xf32> to vector<1x6x6xf32>
    %405 = vector.shape_cast %404 : vector<1x6x6xf32> to vector<6x6xf32>
    %406 = vector.extract_strided_slice %389 {offsets = [0, 3], sizes = [6, 96], strides = [1, 1]} : vector<6x104xf32> to vector<6x96xf32>
    %cst_124 = arith.constant dense<0.000000e+00> : vector<6x96xf32>
    %407 = tpu.matmul %405, %406, %cst_124 {dimension_numbers = #tpu.dot_dimension_numbers<[1], [0], [0], [1], [0, 0, 1, 1], [], []>} : vector<6x6xf32>, vector<6x96xf32>, vector<6x96xf32> -> vector<6x96xf32>
    %408 = arith.addf %403, %407 : vector<6x96xf32>
    %409 = vector.extract_strided_slice %387 {offsets = [4, 0, 0], sizes = [1, 6, 6], strides = [1, 1, 1]} : vector<9x6x6xf32> to vector<1x6x6xf32>
    %410 = vector.shape_cast %409 : vector<1x6x6xf32> to vector<6x6xf32>
    %411 = vector.extract_strided_slice %389 {offsets = [0, 4], sizes = [6, 96], strides = [1, 1]} : vector<6x104xf32> to vector<6x96xf32>
    %cst_125 = arith.constant dense<0.000000e+00> : vector<6x96xf32>
    %412 = tpu.matmul %410, %411, %cst_125 {dimension_numbers = #tpu.dot_dimension_numbers<[1], [0], [0], [1], [0, 0, 1, 1], [], []>} : vector<6x6xf32>, vector<6x96xf32>, vector<6x96xf32> -> vector<6x96xf32>
    %413 = arith.addf %408, %412 : vector<6x96xf32>
    %414 = vector.extract_strided_slice %387 {offsets = [5, 0, 0], sizes = [1, 6, 6], strides = [1, 1, 1]} : vector<9x6x6xf32> to vector<1x6x6xf32>
    %415 = vector.shape_cast %414 : vector<1x6x6xf32> to vector<6x6xf32>
    %416 = vector.extract_strided_slice %389 {offsets = [0, 5], sizes = [6, 96], strides = [1, 1]} : vector<6x104xf32> to vector<6x96xf32>
    %cst_126 = arith.constant dense<0.000000e+00> : vector<6x96xf32>
    %417 = tpu.matmul %415, %416, %cst_126 {dimension_numbers = #tpu.dot_dimension_numbers<[1], [0], [0], [1], [0, 0, 1, 1], [], []>} : vector<6x6xf32>, vector<6x96xf32>, vector<6x96xf32> -> vector<6x96xf32>
    %418 = arith.addf %413, %417 : vector<6x96xf32>
    %419 = vector.extract_strided_slice %387 {offsets = [6, 0, 0], sizes = [1, 6, 6], strides = [1, 1, 1]} : vector<9x6x6xf32> to vector<1x6x6xf32>
    %420 = vector.shape_cast %419 : vector<1x6x6xf32> to vector<6x6xf32>
    %421 = vector.extract_strided_slice %389 {offsets = [0, 6], sizes = [6, 96], strides = [1, 1]} : vector<6x104xf32> to vector<6x96xf32>
    %cst_127 = arith.constant dense<0.000000e+00> : vector<6x96xf32>
    %422 = tpu.matmul %420, %421, %cst_127 {dimension_numbers = #tpu.dot_dimension_numbers<[1], [0], [0], [1], [0, 0, 1, 1], [], []>} : vector<6x6xf32>, vector<6x96xf32>, vector<6x96xf32> -> vector<6x96xf32>
    %423 = arith.addf %418, %422 : vector<6x96xf32>
    %424 = vector.extract_strided_slice %387 {offsets = [7, 0, 0], sizes = [1, 6, 6], strides = [1, 1, 1]} : vector<9x6x6xf32> to vector<1x6x6xf32>
    %425 = vector.shape_cast %424 : vector<1x6x6xf32> to vector<6x6xf32>
    %426 = vector.extract_strided_slice %389 {offsets = [0, 7], sizes = [6, 96], strides = [1, 1]} : vector<6x104xf32> to vector<6x96xf32>
    %cst_128 = arith.constant dense<0.000000e+00> : vector<6x96xf32>
    %427 = tpu.matmul %425, %426, %cst_128 {dimension_numbers = #tpu.dot_dimension_numbers<[1], [0], [0], [1], [0, 0, 1, 1], [], []>} : vector<6x6xf32>, vector<6x96xf32>, vector<6x96xf32> -> vector<6x96xf32>
    %428 = arith.addf %423, %427 : vector<6x96xf32>
    %429 = vector.extract_strided_slice %387 {offsets = [8, 0, 0], sizes = [1, 6, 6], strides = [1, 1, 1]} : vector<9x6x6xf32> to vector<1x6x6xf32>
    %430 = vector.shape_cast %429 : vector<1x6x6xf32> to vector<6x6xf32>
    %431 = vector.extract_strided_slice %389 {offsets = [0, 8], sizes = [6, 96], strides = [1, 1]} : vector<6x104xf32> to vector<6x96xf32>
    %cst_129 = arith.constant dense<0.000000e+00> : vector<6x96xf32>
    %432 = tpu.matmul %430, %431, %cst_129 {dimension_numbers = #tpu.dot_dimension_numbers<[1], [0], [0], [1], [0, 0, 1, 1], [], []>} : vector<6x6xf32>, vector<6x96xf32>, vector<6x96xf32> -> vector<6x96xf32>
    %433 = arith.addf %428, %432 : vector<6x96xf32>
    %c0_130 = arith.constant 0 : index
    %c0_131 = arith.constant 0 : index
    %c0_132 = arith.constant 0 : index
    %434 = vector.load %arg21[%c0_130, %c0_131, %c0_132] : memref<9x6x6xf32, #tpu.memory_space<vmem>>, vector<9x6x6xf32>
    %cst_133 = arith.constant 0.000000e+00 : f32
    %435 = vector.broadcast %cst_133 : f32 to vector<6x4xf32>
    %436 = tpu.concatenate %435, %275, %435 in 1 : vector<6x4xf32>, vector<6x96xf32>, vector<6x4xf32> -> vector<6x104xf32>
    %437 = vector.extract_strided_slice %434 {offsets = [0, 0, 0], sizes = [1, 6, 6], strides = [1, 1, 1]} : vector<9x6x6xf32> to vector<1x6x6xf32>
    %438 = vector.shape_cast %437 : vector<1x6x6xf32> to vector<6x6xf32>
    %439 = vector.extract_strided_slice %436 {offsets = [0, 0], sizes = [6, 96], strides = [1, 1]} : vector<6x104xf32> to vector<6x96xf32>
    %cst_134 = arith.constant dense<0.000000e+00> : vector<6x96xf32>
    %440 = tpu.matmul %438, %439, %cst_134 {dimension_numbers = #tpu.dot_dimension_numbers<[1], [0], [0], [1], [0, 0, 1, 1], [], []>} : vector<6x6xf32>, vector<6x96xf32>, vector<6x96xf32> -> vector<6x96xf32>
    %441 = vector.extract_strided_slice %434 {offsets = [1, 0, 0], sizes = [1, 6, 6], strides = [1, 1, 1]} : vector<9x6x6xf32> to vector<1x6x6xf32>
    %442 = vector.shape_cast %441 : vector<1x6x6xf32> to vector<6x6xf32>
    %443 = vector.extract_strided_slice %436 {offsets = [0, 1], sizes = [6, 96], strides = [1, 1]} : vector<6x104xf32> to vector<6x96xf32>
    %cst_135 = arith.constant dense<0.000000e+00> : vector<6x96xf32>
    %444 = tpu.matmul %442, %443, %cst_135 {dimension_numbers = #tpu.dot_dimension_numbers<[1], [0], [0], [1], [0, 0, 1, 1], [], []>} : vector<6x6xf32>, vector<6x96xf32>, vector<6x96xf32> -> vector<6x96xf32>
    %445 = arith.addf %440, %444 : vector<6x96xf32>
    %446 = vector.extract_strided_slice %434 {offsets = [2, 0, 0], sizes = [1, 6, 6], strides = [1, 1, 1]} : vector<9x6x6xf32> to vector<1x6x6xf32>
    %447 = vector.shape_cast %446 : vector<1x6x6xf32> to vector<6x6xf32>
    %448 = vector.extract_strided_slice %436 {offsets = [0, 2], sizes = [6, 96], strides = [1, 1]} : vector<6x104xf32> to vector<6x96xf32>
    %cst_136 = arith.constant dense<0.000000e+00> : vector<6x96xf32>
    %449 = tpu.matmul %447, %448, %cst_136 {dimension_numbers = #tpu.dot_dimension_numbers<[1], [0], [0], [1], [0, 0, 1, 1], [], []>} : vector<6x6xf32>, vector<6x96xf32>, vector<6x96xf32> -> vector<6x96xf32>
    %450 = arith.addf %445, %449 : vector<6x96xf32>
    %451 = vector.extract_strided_slice %434 {offsets = [3, 0, 0], sizes = [1, 6, 6], strides = [1, 1, 1]} : vector<9x6x6xf32> to vector<1x6x6xf32>
    %452 = vector.shape_cast %451 : vector<1x6x6xf32> to vector<6x6xf32>
    %453 = vector.extract_strided_slice %436 {offsets = [0, 3], sizes = [6, 96], strides = [1, 1]} : vector<6x104xf32> to vector<6x96xf32>
    %cst_137 = arith.constant dense<0.000000e+00> : vector<6x96xf32>
    %454 = tpu.matmul %452, %453, %cst_137 {dimension_numbers = #tpu.dot_dimension_numbers<[1], [0], [0], [1], [0, 0, 1, 1], [], []>} : vector<6x6xf32>, vector<6x96xf32>, vector<6x96xf32> -> vector<6x96xf32>
    %455 = arith.addf %450, %454 : vector<6x96xf32>
    %456 = vector.extract_strided_slice %434 {offsets = [4, 0, 0], sizes = [1, 6, 6], strides = [1, 1, 1]} : vector<9x6x6xf32> to vector<1x6x6xf32>
    %457 = vector.shape_cast %456 : vector<1x6x6xf32> to vector<6x6xf32>
    %458 = vector.extract_strided_slice %436 {offsets = [0, 4], sizes = [6, 96], strides = [1, 1]} : vector<6x104xf32> to vector<6x96xf32>
    %cst_138 = arith.constant dense<0.000000e+00> : vector<6x96xf32>
    %459 = tpu.matmul %457, %458, %cst_138 {dimension_numbers = #tpu.dot_dimension_numbers<[1], [0], [0], [1], [0, 0, 1, 1], [], []>} : vector<6x6xf32>, vector<6x96xf32>, vector<6x96xf32> -> vector<6x96xf32>
    %460 = arith.addf %455, %459 : vector<6x96xf32>
    %461 = vector.extract_strided_slice %434 {offsets = [5, 0, 0], sizes = [1, 6, 6], strides = [1, 1, 1]} : vector<9x6x6xf32> to vector<1x6x6xf32>
    %462 = vector.shape_cast %461 : vector<1x6x6xf32> to vector<6x6xf32>
    %463 = vector.extract_strided_slice %436 {offsets = [0, 5], sizes = [6, 96], strides = [1, 1]} : vector<6x104xf32> to vector<6x96xf32>
    %cst_139 = arith.constant dense<0.000000e+00> : vector<6x96xf32>
    %464 = tpu.matmul %462, %463, %cst_139 {dimension_numbers = #tpu.dot_dimension_numbers<[1], [0], [0], [1], [0, 0, 1, 1], [], []>} : vector<6x6xf32>, vector<6x96xf32>, vector<6x96xf32> -> vector<6x96xf32>
    %465 = arith.addf %460, %464 : vector<6x96xf32>
    %466 = vector.extract_strided_slice %434 {offsets = [6, 0, 0], sizes = [1, 6, 6], strides = [1, 1, 1]} : vector<9x6x6xf32> to vector<1x6x6xf32>
    %467 = vector.shape_cast %466 : vector<1x6x6xf32> to vector<6x6xf32>
    %468 = vector.extract_strided_slice %436 {offsets = [0, 6], sizes = [6, 96], strides = [1, 1]} : vector<6x104xf32> to vector<6x96xf32>
    %cst_140 = arith.constant dense<0.000000e+00> : vector<6x96xf32>
    %469 = tpu.matmul %467, %468, %cst_140 {dimension_numbers = #tpu.dot_dimension_numbers<[1], [0], [0], [1], [0, 0, 1, 1], [], []>} : vector<6x6xf32>, vector<6x96xf32>, vector<6x96xf32> -> vector<6x96xf32>
    %470 = arith.addf %465, %469 : vector<6x96xf32>
    %471 = vector.extract_strided_slice %434 {offsets = [7, 0, 0], sizes = [1, 6, 6], strides = [1, 1, 1]} : vector<9x6x6xf32> to vector<1x6x6xf32>
    %472 = vector.shape_cast %471 : vector<1x6x6xf32> to vector<6x6xf32>
    %473 = vector.extract_strided_slice %436 {offsets = [0, 7], sizes = [6, 96], strides = [1, 1]} : vector<6x104xf32> to vector<6x96xf32>
    %cst_141 = arith.constant dense<0.000000e+00> : vector<6x96xf32>
    %474 = tpu.matmul %472, %473, %cst_141 {dimension_numbers = #tpu.dot_dimension_numbers<[1], [0], [0], [1], [0, 0, 1, 1], [], []>} : vector<6x6xf32>, vector<6x96xf32>, vector<6x96xf32> -> vector<6x96xf32>
    %475 = arith.addf %470, %474 : vector<6x96xf32>
    %476 = vector.extract_strided_slice %434 {offsets = [8, 0, 0], sizes = [1, 6, 6], strides = [1, 1, 1]} : vector<9x6x6xf32> to vector<1x6x6xf32>
    %477 = vector.shape_cast %476 : vector<1x6x6xf32> to vector<6x6xf32>
    %478 = vector.extract_strided_slice %436 {offsets = [0, 8], sizes = [6, 96], strides = [1, 1]} : vector<6x104xf32> to vector<6x96xf32>
    %cst_142 = arith.constant dense<0.000000e+00> : vector<6x96xf32>
    %479 = tpu.matmul %477, %478, %cst_142 {dimension_numbers = #tpu.dot_dimension_numbers<[1], [0], [0], [1], [0, 0, 1, 1], [], []>} : vector<6x6xf32>, vector<6x96xf32>, vector<6x96xf32> -> vector<6x96xf32>
    %480 = arith.addf %475, %479 : vector<6x96xf32>
    %481 = arith.addf %433, %480 : vector<6x96xf32>
    %c0_143 = arith.constant 0 : index
    %c0_144 = arith.constant 0 : index
    %482 = vector.load %arg22[%c0_143, %c0_144] : memref<6x1xf32, #tpu.memory_space<vmem>>, vector<6x1xf32>
    %483 = vector.broadcast %482 : vector<6x1xf32> to vector<6x96xf32>
    %484 = arith.addf %481, %483 : vector<6x96xf32>
    %cst_145 = arith.constant 0.000000e+00 : f32
    %485 = vector.broadcast %cst_145 : f32 to vector<6x96xf32>
    %486 = arith.maximumf %484, %485 : vector<6x96xf32>
    %c0_146 = arith.constant 0 : index
    %c0_147 = arith.constant 0 : index
    %c0_148 = arith.constant 0 : index
    %487 = vector.load %arg15[%c0_146, %c0_147, %c0_148] : memref<8x4x6xf32, #tpu.memory_space<vmem>>, vector<8x4x6xf32>
    %488 = tpu.iota {dimensions = array<i32: 0>} : vector<96x199xi32>
    %489 = tpu.iota {dimensions = array<i32: 1>} : vector<96x199xi32>
    %c2_i32_149 = arith.constant 2 : i32
    %490 = vector.broadcast %c2_i32_149 : i32 to vector<96x199xi32>
    %491 = arith.muli %490, %488 : vector<96x199xi32>
    %c4_i32_150 = arith.constant 4 : i32
    %492 = vector.broadcast %c4_i32_150 : i32 to vector<96x199xi32>
    %493 = arith.addi %491, %492 : vector<96x199xi32>
    %494 = arith.cmpi eq, %489, %493 : vector<96x199xi32>
    %495 = arith.extui %494 : vector<96x199xi1> to vector<96x199xi32>
    %496 = arith.sitofp %495 : vector<96x199xi32> to vector<96x199xf32>
    %cst_151 = arith.constant dense<0.000000e+00> : vector<6x199xf32>
    %497 = tpu.matmul %486, %496, %cst_151 {dimension_numbers = #tpu.dot_dimension_numbers<[1], [0], [0], [1], [0, 0, 1, 1], [], []>} : vector<6x96xf32>, vector<96x199xf32>, vector<6x199xf32> -> vector<6x199xf32>
    %498 = vector.extract_strided_slice %487 {offsets = [0, 0, 0], sizes = [1, 4, 6], strides = [1, 1, 1]} : vector<8x4x6xf32> to vector<1x4x6xf32>
    %499 = vector.shape_cast %498 : vector<1x4x6xf32> to vector<4x6xf32>
    %500 = vector.extract_strided_slice %497 {offsets = [0, 0], sizes = [6, 192], strides = [1, 1]} : vector<6x199xf32> to vector<6x192xf32>
    %cst_152 = arith.constant dense<0.000000e+00> : vector<4x192xf32>
    %501 = tpu.matmul %499, %500, %cst_152 {dimension_numbers = #tpu.dot_dimension_numbers<[1], [0], [0], [1], [0, 0, 1, 1], [], []>} : vector<4x6xf32>, vector<6x192xf32>, vector<4x192xf32> -> vector<4x192xf32>
    %502 = vector.extract_strided_slice %487 {offsets = [1, 0, 0], sizes = [1, 4, 6], strides = [1, 1, 1]} : vector<8x4x6xf32> to vector<1x4x6xf32>
    %503 = vector.shape_cast %502 : vector<1x4x6xf32> to vector<4x6xf32>
    %504 = vector.extract_strided_slice %497 {offsets = [0, 1], sizes = [6, 192], strides = [1, 1]} : vector<6x199xf32> to vector<6x192xf32>
    %cst_153 = arith.constant dense<0.000000e+00> : vector<4x192xf32>
    %505 = tpu.matmul %503, %504, %cst_153 {dimension_numbers = #tpu.dot_dimension_numbers<[1], [0], [0], [1], [0, 0, 1, 1], [], []>} : vector<4x6xf32>, vector<6x192xf32>, vector<4x192xf32> -> vector<4x192xf32>
    %506 = arith.addf %501, %505 : vector<4x192xf32>
    %507 = vector.extract_strided_slice %487 {offsets = [2, 0, 0], sizes = [1, 4, 6], strides = [1, 1, 1]} : vector<8x4x6xf32> to vector<1x4x6xf32>
    %508 = vector.shape_cast %507 : vector<1x4x6xf32> to vector<4x6xf32>
    %509 = vector.extract_strided_slice %497 {offsets = [0, 2], sizes = [6, 192], strides = [1, 1]} : vector<6x199xf32> to vector<6x192xf32>
    %cst_154 = arith.constant dense<0.000000e+00> : vector<4x192xf32>
    %510 = tpu.matmul %508, %509, %cst_154 {dimension_numbers = #tpu.dot_dimension_numbers<[1], [0], [0], [1], [0, 0, 1, 1], [], []>} : vector<4x6xf32>, vector<6x192xf32>, vector<4x192xf32> -> vector<4x192xf32>
    %511 = arith.addf %506, %510 : vector<4x192xf32>
    %512 = vector.extract_strided_slice %487 {offsets = [3, 0, 0], sizes = [1, 4, 6], strides = [1, 1, 1]} : vector<8x4x6xf32> to vector<1x4x6xf32>
    %513 = vector.shape_cast %512 : vector<1x4x6xf32> to vector<4x6xf32>
    %514 = vector.extract_strided_slice %497 {offsets = [0, 3], sizes = [6, 192], strides = [1, 1]} : vector<6x199xf32> to vector<6x192xf32>
    %cst_155 = arith.constant dense<0.000000e+00> : vector<4x192xf32>
    %515 = tpu.matmul %513, %514, %cst_155 {dimension_numbers = #tpu.dot_dimension_numbers<[1], [0], [0], [1], [0, 0, 1, 1], [], []>} : vector<4x6xf32>, vector<6x192xf32>, vector<4x192xf32> -> vector<4x192xf32>
    %516 = arith.addf %511, %515 : vector<4x192xf32>
    %517 = vector.extract_strided_slice %487 {offsets = [4, 0, 0], sizes = [1, 4, 6], strides = [1, 1, 1]} : vector<8x4x6xf32> to vector<1x4x6xf32>
    %518 = vector.shape_cast %517 : vector<1x4x6xf32> to vector<4x6xf32>
    %519 = vector.extract_strided_slice %497 {offsets = [0, 4], sizes = [6, 192], strides = [1, 1]} : vector<6x199xf32> to vector<6x192xf32>
    %cst_156 = arith.constant dense<0.000000e+00> : vector<4x192xf32>
    %520 = tpu.matmul %518, %519, %cst_156 {dimension_numbers = #tpu.dot_dimension_numbers<[1], [0], [0], [1], [0, 0, 1, 1], [], []>} : vector<4x6xf32>, vector<6x192xf32>, vector<4x192xf32> -> vector<4x192xf32>
    %521 = arith.addf %516, %520 : vector<4x192xf32>
    %522 = vector.extract_strided_slice %487 {offsets = [5, 0, 0], sizes = [1, 4, 6], strides = [1, 1, 1]} : vector<8x4x6xf32> to vector<1x4x6xf32>
    %523 = vector.shape_cast %522 : vector<1x4x6xf32> to vector<4x6xf32>
    %524 = vector.extract_strided_slice %497 {offsets = [0, 5], sizes = [6, 192], strides = [1, 1]} : vector<6x199xf32> to vector<6x192xf32>
    %cst_157 = arith.constant dense<0.000000e+00> : vector<4x192xf32>
    %525 = tpu.matmul %523, %524, %cst_157 {dimension_numbers = #tpu.dot_dimension_numbers<[1], [0], [0], [1], [0, 0, 1, 1], [], []>} : vector<4x6xf32>, vector<6x192xf32>, vector<4x192xf32> -> vector<4x192xf32>
    %526 = arith.addf %521, %525 : vector<4x192xf32>
    %527 = vector.extract_strided_slice %487 {offsets = [6, 0, 0], sizes = [1, 4, 6], strides = [1, 1, 1]} : vector<8x4x6xf32> to vector<1x4x6xf32>
    %528 = vector.shape_cast %527 : vector<1x4x6xf32> to vector<4x6xf32>
    %529 = vector.extract_strided_slice %497 {offsets = [0, 6], sizes = [6, 192], strides = [1, 1]} : vector<6x199xf32> to vector<6x192xf32>
    %cst_158 = arith.constant dense<0.000000e+00> : vector<4x192xf32>
    %530 = tpu.matmul %528, %529, %cst_158 {dimension_numbers = #tpu.dot_dimension_numbers<[1], [0], [0], [1], [0, 0, 1, 1], [], []>} : vector<4x6xf32>, vector<6x192xf32>, vector<4x192xf32> -> vector<4x192xf32>
    %531 = arith.addf %526, %530 : vector<4x192xf32>
    %532 = vector.extract_strided_slice %487 {offsets = [7, 0, 0], sizes = [1, 4, 6], strides = [1, 1, 1]} : vector<8x4x6xf32> to vector<1x4x6xf32>
    %533 = vector.shape_cast %532 : vector<1x4x6xf32> to vector<4x6xf32>
    %534 = vector.extract_strided_slice %497 {offsets = [0, 7], sizes = [6, 192], strides = [1, 1]} : vector<6x199xf32> to vector<6x192xf32>
    %cst_159 = arith.constant dense<0.000000e+00> : vector<4x192xf32>
    %535 = tpu.matmul %533, %534, %cst_159 {dimension_numbers = #tpu.dot_dimension_numbers<[1], [0], [0], [1], [0, 0, 1, 1], [], []>} : vector<4x6xf32>, vector<6x192xf32>, vector<4x192xf32> -> vector<4x192xf32>
    %536 = arith.addf %531, %535 : vector<4x192xf32>
    %c0_160 = arith.constant 0 : index
    %c0_161 = arith.constant 0 : index
    %537 = vector.load %arg16[%c0_160, %c0_161] : memref<4x1xf32, #tpu.memory_space<vmem>>, vector<4x1xf32>
    %538 = vector.broadcast %537 : vector<4x1xf32> to vector<4x192xf32>
    %539 = arith.addf %536, %538 : vector<4x192xf32>
    %c0_162 = arith.constant 0 : index
    %c0_163 = arith.constant 0 : index
    %c0_164 = arith.constant 0 : index
    %540 = vector.load %arg5[%c0_162, %c0_163, %c0_164] : memref<8x8x8xf32, #tpu.memory_space<vmem>>, vector<8x8x8xf32>
    %541 = tpu.iota {dimensions = array<i32: 0>} : vector<16x39xi32>
    %542 = tpu.iota {dimensions = array<i32: 1>} : vector<16x39xi32>
    %c2_i32_165 = arith.constant 2 : i32
    %543 = vector.broadcast %c2_i32_165 : i32 to vector<16x39xi32>
    %544 = arith.muli %543, %541 : vector<16x39xi32>
    %c4_i32_166 = arith.constant 4 : i32
    %545 = vector.broadcast %c4_i32_166 : i32 to vector<16x39xi32>
    %546 = arith.addi %544, %545 : vector<16x39xi32>
    %547 = arith.cmpi eq, %542, %546 : vector<16x39xi32>
    %548 = arith.extui %547 : vector<16x39xi1> to vector<16x39xi32>
    %549 = arith.sitofp %548 : vector<16x39xi32> to vector<16x39xf32>
    %cst_167 = arith.constant dense<0.000000e+00> : vector<8x39xf32>
    %550 = tpu.matmul %2, %549, %cst_167 {dimension_numbers = #tpu.dot_dimension_numbers<[1], [0], [0], [1], [0, 0, 1, 1], [], []>} : vector<8x16xf32>, vector<16x39xf32>, vector<8x39xf32> -> vector<8x39xf32>
    %551 = vector.extract_strided_slice %540 {offsets = [0, 0, 0], sizes = [1, 8, 8], strides = [1, 1, 1]} : vector<8x8x8xf32> to vector<1x8x8xf32>
    %552 = vector.shape_cast %551 : vector<1x8x8xf32> to vector<8x8xf32>
    %553 = vector.extract_strided_slice %550 {offsets = [0, 0], sizes = [8, 32], strides = [1, 1]} : vector<8x39xf32> to vector<8x32xf32>
    %cst_168 = arith.constant dense<0.000000e+00> : vector<8x32xf32>
    %554 = tpu.matmul %552, %553, %cst_168 {dimension_numbers = #tpu.dot_dimension_numbers<[1], [0], [0], [1], [0, 0, 1, 1], [], []>} : vector<8x8xf32>, vector<8x32xf32>, vector<8x32xf32> -> vector<8x32xf32>
    %555 = vector.extract_strided_slice %540 {offsets = [1, 0, 0], sizes = [1, 8, 8], strides = [1, 1, 1]} : vector<8x8x8xf32> to vector<1x8x8xf32>
    %556 = vector.shape_cast %555 : vector<1x8x8xf32> to vector<8x8xf32>
    %557 = vector.extract_strided_slice %550 {offsets = [0, 1], sizes = [8, 32], strides = [1, 1]} : vector<8x39xf32> to vector<8x32xf32>
    %cst_169 = arith.constant dense<0.000000e+00> : vector<8x32xf32>
    %558 = tpu.matmul %556, %557, %cst_169 {dimension_numbers = #tpu.dot_dimension_numbers<[1], [0], [0], [1], [0, 0, 1, 1], [], []>} : vector<8x8xf32>, vector<8x32xf32>, vector<8x32xf32> -> vector<8x32xf32>
    %559 = arith.addf %554, %558 : vector<8x32xf32>
    %560 = vector.extract_strided_slice %540 {offsets = [2, 0, 0], sizes = [1, 8, 8], strides = [1, 1, 1]} : vector<8x8x8xf32> to vector<1x8x8xf32>
    %561 = vector.shape_cast %560 : vector<1x8x8xf32> to vector<8x8xf32>
    %562 = vector.extract_strided_slice %550 {offsets = [0, 2], sizes = [8, 32], strides = [1, 1]} : vector<8x39xf32> to vector<8x32xf32>
    %cst_170 = arith.constant dense<0.000000e+00> : vector<8x32xf32>
    %563 = tpu.matmul %561, %562, %cst_170 {dimension_numbers = #tpu.dot_dimension_numbers<[1], [0], [0], [1], [0, 0, 1, 1], [], []>} : vector<8x8xf32>, vector<8x32xf32>, vector<8x32xf32> -> vector<8x32xf32>
    %564 = arith.addf %559, %563 : vector<8x32xf32>
    %565 = vector.extract_strided_slice %540 {offsets = [3, 0, 0], sizes = [1, 8, 8], strides = [1, 1, 1]} : vector<8x8x8xf32> to vector<1x8x8xf32>
    %566 = vector.shape_cast %565 : vector<1x8x8xf32> to vector<8x8xf32>
    %567 = vector.extract_strided_slice %550 {offsets = [0, 3], sizes = [8, 32], strides = [1, 1]} : vector<8x39xf32> to vector<8x32xf32>
    %cst_171 = arith.constant dense<0.000000e+00> : vector<8x32xf32>
    %568 = tpu.matmul %566, %567, %cst_171 {dimension_numbers = #tpu.dot_dimension_numbers<[1], [0], [0], [1], [0, 0, 1, 1], [], []>} : vector<8x8xf32>, vector<8x32xf32>, vector<8x32xf32> -> vector<8x32xf32>
    %569 = arith.addf %564, %568 : vector<8x32xf32>
    %570 = vector.extract_strided_slice %540 {offsets = [4, 0, 0], sizes = [1, 8, 8], strides = [1, 1, 1]} : vector<8x8x8xf32> to vector<1x8x8xf32>
    %571 = vector.shape_cast %570 : vector<1x8x8xf32> to vector<8x8xf32>
    %572 = vector.extract_strided_slice %550 {offsets = [0, 4], sizes = [8, 32], strides = [1, 1]} : vector<8x39xf32> to vector<8x32xf32>
    %cst_172 = arith.constant dense<0.000000e+00> : vector<8x32xf32>
    %573 = tpu.matmul %571, %572, %cst_172 {dimension_numbers = #tpu.dot_dimension_numbers<[1], [0], [0], [1], [0, 0, 1, 1], [], []>} : vector<8x8xf32>, vector<8x32xf32>, vector<8x32xf32> -> vector<8x32xf32>
    %574 = arith.addf %569, %573 : vector<8x32xf32>
    %575 = vector.extract_strided_slice %540 {offsets = [5, 0, 0], sizes = [1, 8, 8], strides = [1, 1, 1]} : vector<8x8x8xf32> to vector<1x8x8xf32>
    %576 = vector.shape_cast %575 : vector<1x8x8xf32> to vector<8x8xf32>
    %577 = vector.extract_strided_slice %550 {offsets = [0, 5], sizes = [8, 32], strides = [1, 1]} : vector<8x39xf32> to vector<8x32xf32>
    %cst_173 = arith.constant dense<0.000000e+00> : vector<8x32xf32>
    %578 = tpu.matmul %576, %577, %cst_173 {dimension_numbers = #tpu.dot_dimension_numbers<[1], [0], [0], [1], [0, 0, 1, 1], [], []>} : vector<8x8xf32>, vector<8x32xf32>, vector<8x32xf32> -> vector<8x32xf32>
    %579 = arith.addf %574, %578 : vector<8x32xf32>
    %580 = vector.extract_strided_slice %540 {offsets = [6, 0, 0], sizes = [1, 8, 8], strides = [1, 1, 1]} : vector<8x8x8xf32> to vector<1x8x8xf32>
    %581 = vector.shape_cast %580 : vector<1x8x8xf32> to vector<8x8xf32>
    %582 = vector.extract_strided_slice %550 {offsets = [0, 6], sizes = [8, 32], strides = [1, 1]} : vector<8x39xf32> to vector<8x32xf32>
    %cst_174 = arith.constant dense<0.000000e+00> : vector<8x32xf32>
    %583 = tpu.matmul %581, %582, %cst_174 {dimension_numbers = #tpu.dot_dimension_numbers<[1], [0], [0], [1], [0, 0, 1, 1], [], []>} : vector<8x8xf32>, vector<8x32xf32>, vector<8x32xf32> -> vector<8x32xf32>
    %584 = arith.addf %579, %583 : vector<8x32xf32>
    %585 = vector.extract_strided_slice %540 {offsets = [7, 0, 0], sizes = [1, 8, 8], strides = [1, 1, 1]} : vector<8x8x8xf32> to vector<1x8x8xf32>
    %586 = vector.shape_cast %585 : vector<1x8x8xf32> to vector<8x8xf32>
    %587 = vector.extract_strided_slice %550 {offsets = [0, 7], sizes = [8, 32], strides = [1, 1]} : vector<8x39xf32> to vector<8x32xf32>
    %cst_175 = arith.constant dense<0.000000e+00> : vector<8x32xf32>
    %588 = tpu.matmul %586, %587, %cst_175 {dimension_numbers = #tpu.dot_dimension_numbers<[1], [0], [0], [1], [0, 0, 1, 1], [], []>} : vector<8x8xf32>, vector<8x32xf32>, vector<8x32xf32> -> vector<8x32xf32>
    %589 = arith.addf %584, %588 : vector<8x32xf32>
    %c0_176 = arith.constant 0 : index
    %c0_177 = arith.constant 0 : index
    %590 = vector.load %arg6[%c0_176, %c0_177] : memref<8x1xf32, #tpu.memory_space<vmem>>, vector<8x1xf32>
    %591 = vector.broadcast %590 : vector<8x1xf32> to vector<8x32xf32>
    %592 = arith.addf %589, %591 : vector<8x32xf32>
    %c0_178 = arith.constant 0 : index
    %c0_179 = arith.constant 0 : index
    %c0_180 = arith.constant 0 : index
    %593 = vector.load %arg9[%c0_178, %c0_179, %c0_180] : memref<9x6x8xf32, #tpu.memory_space<vmem>>, vector<9x6x8xf32>
    %594 = tpu.iota {dimensions = array<i32: 0>} : vector<32x104xi32>
    %595 = tpu.iota {dimensions = array<i32: 1>} : vector<32x104xi32>
    %c3_i32_181 = arith.constant 3 : i32
    %596 = vector.broadcast %c3_i32_181 : i32 to vector<32x104xi32>
    %597 = arith.muli %596, %594 : vector<32x104xi32>
    %c5_i32_182 = arith.constant 5 : i32
    %598 = vector.broadcast %c5_i32_182 : i32 to vector<32x104xi32>
    %599 = arith.addi %597, %598 : vector<32x104xi32>
    %600 = arith.cmpi eq, %595, %599 : vector<32x104xi32>
    %601 = arith.extui %600 : vector<32x104xi1> to vector<32x104xi32>
    %602 = arith.sitofp %601 : vector<32x104xi32> to vector<32x104xf32>
    %cst_183 = arith.constant dense<0.000000e+00> : vector<8x104xf32>
    %603 = tpu.matmul %592, %602, %cst_183 {dimension_numbers = #tpu.dot_dimension_numbers<[1], [0], [0], [1], [0, 0, 1, 1], [], []>} : vector<8x32xf32>, vector<32x104xf32>, vector<8x104xf32> -> vector<8x104xf32>
    %604 = vector.extract_strided_slice %593 {offsets = [0, 0, 0], sizes = [1, 6, 8], strides = [1, 1, 1]} : vector<9x6x8xf32> to vector<1x6x8xf32>
    %605 = vector.shape_cast %604 : vector<1x6x8xf32> to vector<6x8xf32>
    %606 = vector.extract_strided_slice %603 {offsets = [0, 0], sizes = [8, 96], strides = [1, 1]} : vector<8x104xf32> to vector<8x96xf32>
    %cst_184 = arith.constant dense<0.000000e+00> : vector<6x96xf32>
    %607 = tpu.matmul %605, %606, %cst_184 {dimension_numbers = #tpu.dot_dimension_numbers<[1], [0], [0], [1], [0, 0, 1, 1], [], []>} : vector<6x8xf32>, vector<8x96xf32>, vector<6x96xf32> -> vector<6x96xf32>
    %608 = vector.extract_strided_slice %593 {offsets = [1, 0, 0], sizes = [1, 6, 8], strides = [1, 1, 1]} : vector<9x6x8xf32> to vector<1x6x8xf32>
    %609 = vector.shape_cast %608 : vector<1x6x8xf32> to vector<6x8xf32>
    %610 = vector.extract_strided_slice %603 {offsets = [0, 1], sizes = [8, 96], strides = [1, 1]} : vector<8x104xf32> to vector<8x96xf32>
    %cst_185 = arith.constant dense<0.000000e+00> : vector<6x96xf32>
    %611 = tpu.matmul %609, %610, %cst_185 {dimension_numbers = #tpu.dot_dimension_numbers<[1], [0], [0], [1], [0, 0, 1, 1], [], []>} : vector<6x8xf32>, vector<8x96xf32>, vector<6x96xf32> -> vector<6x96xf32>
    %612 = arith.addf %607, %611 : vector<6x96xf32>
    %613 = vector.extract_strided_slice %593 {offsets = [2, 0, 0], sizes = [1, 6, 8], strides = [1, 1, 1]} : vector<9x6x8xf32> to vector<1x6x8xf32>
    %614 = vector.shape_cast %613 : vector<1x6x8xf32> to vector<6x8xf32>
    %615 = vector.extract_strided_slice %603 {offsets = [0, 2], sizes = [8, 96], strides = [1, 1]} : vector<8x104xf32> to vector<8x96xf32>
    %cst_186 = arith.constant dense<0.000000e+00> : vector<6x96xf32>
    %616 = tpu.matmul %614, %615, %cst_186 {dimension_numbers = #tpu.dot_dimension_numbers<[1], [0], [0], [1], [0, 0, 1, 1], [], []>} : vector<6x8xf32>, vector<8x96xf32>, vector<6x96xf32> -> vector<6x96xf32>
    %617 = arith.addf %612, %616 : vector<6x96xf32>
    %618 = vector.extract_strided_slice %593 {offsets = [3, 0, 0], sizes = [1, 6, 8], strides = [1, 1, 1]} : vector<9x6x8xf32> to vector<1x6x8xf32>
    %619 = vector.shape_cast %618 : vector<1x6x8xf32> to vector<6x8xf32>
    %620 = vector.extract_strided_slice %603 {offsets = [0, 3], sizes = [8, 96], strides = [1, 1]} : vector<8x104xf32> to vector<8x96xf32>
    %cst_187 = arith.constant dense<0.000000e+00> : vector<6x96xf32>
    %621 = tpu.matmul %619, %620, %cst_187 {dimension_numbers = #tpu.dot_dimension_numbers<[1], [0], [0], [1], [0, 0, 1, 1], [], []>} : vector<6x8xf32>, vector<8x96xf32>, vector<6x96xf32> -> vector<6x96xf32>
    %622 = arith.addf %617, %621 : vector<6x96xf32>
    %623 = vector.extract_strided_slice %593 {offsets = [4, 0, 0], sizes = [1, 6, 8], strides = [1, 1, 1]} : vector<9x6x8xf32> to vector<1x6x8xf32>
    %624 = vector.shape_cast %623 : vector<1x6x8xf32> to vector<6x8xf32>
    %625 = vector.extract_strided_slice %603 {offsets = [0, 4], sizes = [8, 96], strides = [1, 1]} : vector<8x104xf32> to vector<8x96xf32>
    %cst_188 = arith.constant dense<0.000000e+00> : vector<6x96xf32>
    %626 = tpu.matmul %624, %625, %cst_188 {dimension_numbers = #tpu.dot_dimension_numbers<[1], [0], [0], [1], [0, 0, 1, 1], [], []>} : vector<6x8xf32>, vector<8x96xf32>, vector<6x96xf32> -> vector<6x96xf32>
    %627 = arith.addf %622, %626 : vector<6x96xf32>
    %628 = vector.extract_strided_slice %593 {offsets = [5, 0, 0], sizes = [1, 6, 8], strides = [1, 1, 1]} : vector<9x6x8xf32> to vector<1x6x8xf32>
    %629 = vector.shape_cast %628 : vector<1x6x8xf32> to vector<6x8xf32>
    %630 = vector.extract_strided_slice %603 {offsets = [0, 5], sizes = [8, 96], strides = [1, 1]} : vector<8x104xf32> to vector<8x96xf32>
    %cst_189 = arith.constant dense<0.000000e+00> : vector<6x96xf32>
    %631 = tpu.matmul %629, %630, %cst_189 {dimension_numbers = #tpu.dot_dimension_numbers<[1], [0], [0], [1], [0, 0, 1, 1], [], []>} : vector<6x8xf32>, vector<8x96xf32>, vector<6x96xf32> -> vector<6x96xf32>
    %632 = arith.addf %627, %631 : vector<6x96xf32>
    %633 = vector.extract_strided_slice %593 {offsets = [6, 0, 0], sizes = [1, 6, 8], strides = [1, 1, 1]} : vector<9x6x8xf32> to vector<1x6x8xf32>
    %634 = vector.shape_cast %633 : vector<1x6x8xf32> to vector<6x8xf32>
    %635 = vector.extract_strided_slice %603 {offsets = [0, 6], sizes = [8, 96], strides = [1, 1]} : vector<8x104xf32> to vector<8x96xf32>
    %cst_190 = arith.constant dense<0.000000e+00> : vector<6x96xf32>
    %636 = tpu.matmul %634, %635, %cst_190 {dimension_numbers = #tpu.dot_dimension_numbers<[1], [0], [0], [1], [0, 0, 1, 1], [], []>} : vector<6x8xf32>, vector<8x96xf32>, vector<6x96xf32> -> vector<6x96xf32>
    %637 = arith.addf %632, %636 : vector<6x96xf32>
    %638 = vector.extract_strided_slice %593 {offsets = [7, 0, 0], sizes = [1, 6, 8], strides = [1, 1, 1]} : vector<9x6x8xf32> to vector<1x6x8xf32>
    %639 = vector.shape_cast %638 : vector<1x6x8xf32> to vector<6x8xf32>
    %640 = vector.extract_strided_slice %603 {offsets = [0, 7], sizes = [8, 96], strides = [1, 1]} : vector<8x104xf32> to vector<8x96xf32>
    %cst_191 = arith.constant dense<0.000000e+00> : vector<6x96xf32>
    %641 = tpu.matmul %639, %640, %cst_191 {dimension_numbers = #tpu.dot_dimension_numbers<[1], [0], [0], [1], [0, 0, 1, 1], [], []>} : vector<6x8xf32>, vector<8x96xf32>, vector<6x96xf32> -> vector<6x96xf32>
    %642 = arith.addf %637, %641 : vector<6x96xf32>
    %643 = vector.extract_strided_slice %593 {offsets = [8, 0, 0], sizes = [1, 6, 8], strides = [1, 1, 1]} : vector<9x6x8xf32> to vector<1x6x8xf32>
    %644 = vector.shape_cast %643 : vector<1x6x8xf32> to vector<6x8xf32>
    %645 = vector.extract_strided_slice %603 {offsets = [0, 8], sizes = [8, 96], strides = [1, 1]} : vector<8x104xf32> to vector<8x96xf32>
    %cst_192 = arith.constant dense<0.000000e+00> : vector<6x96xf32>
    %646 = tpu.matmul %644, %645, %cst_192 {dimension_numbers = #tpu.dot_dimension_numbers<[1], [0], [0], [1], [0, 0, 1, 1], [], []>} : vector<6x8xf32>, vector<8x96xf32>, vector<6x96xf32> -> vector<6x96xf32>
    %647 = arith.addf %642, %646 : vector<6x96xf32>
    %c0_193 = arith.constant 0 : index
    %c0_194 = arith.constant 0 : index
    %648 = vector.load %arg10[%c0_193, %c0_194] : memref<6x1xf32, #tpu.memory_space<vmem>>, vector<6x1xf32>
    %649 = vector.broadcast %648 : vector<6x1xf32> to vector<6x96xf32>
    %650 = arith.addf %647, %649 : vector<6x96xf32>
    %c0_195 = arith.constant 0 : index
    %c0_196 = arith.constant 0 : index
    %c0_197 = arith.constant 0 : index
    %651 = vector.load %arg13[%c0_195, %c0_196, %c0_197] : memref<8x4x6xf32, #tpu.memory_space<vmem>>, vector<8x4x6xf32>
    %652 = tpu.iota {dimensions = array<i32: 0>} : vector<96x199xi32>
    %653 = tpu.iota {dimensions = array<i32: 1>} : vector<96x199xi32>
    %c2_i32_198 = arith.constant 2 : i32
    %654 = vector.broadcast %c2_i32_198 : i32 to vector<96x199xi32>
    %655 = arith.muli %654, %652 : vector<96x199xi32>
    %c4_i32_199 = arith.constant 4 : i32
    %656 = vector.broadcast %c4_i32_199 : i32 to vector<96x199xi32>
    %657 = arith.addi %655, %656 : vector<96x199xi32>
    %658 = arith.cmpi eq, %653, %657 : vector<96x199xi32>
    %659 = arith.extui %658 : vector<96x199xi1> to vector<96x199xi32>
    %660 = arith.sitofp %659 : vector<96x199xi32> to vector<96x199xf32>
    %cst_200 = arith.constant dense<0.000000e+00> : vector<6x199xf32>
    %661 = tpu.matmul %650, %660, %cst_200 {dimension_numbers = #tpu.dot_dimension_numbers<[1], [0], [0], [1], [0, 0, 1, 1], [], []>} : vector<6x96xf32>, vector<96x199xf32>, vector<6x199xf32> -> vector<6x199xf32>
    %662 = vector.extract_strided_slice %651 {offsets = [0, 0, 0], sizes = [1, 4, 6], strides = [1, 1, 1]} : vector<8x4x6xf32> to vector<1x4x6xf32>
    %663 = vector.shape_cast %662 : vector<1x4x6xf32> to vector<4x6xf32>
    %664 = vector.extract_strided_slice %661 {offsets = [0, 0], sizes = [6, 192], strides = [1, 1]} : vector<6x199xf32> to vector<6x192xf32>
    %cst_201 = arith.constant dense<0.000000e+00> : vector<4x192xf32>
    %665 = tpu.matmul %663, %664, %cst_201 {dimension_numbers = #tpu.dot_dimension_numbers<[1], [0], [0], [1], [0, 0, 1, 1], [], []>} : vector<4x6xf32>, vector<6x192xf32>, vector<4x192xf32> -> vector<4x192xf32>
    %666 = vector.extract_strided_slice %651 {offsets = [1, 0, 0], sizes = [1, 4, 6], strides = [1, 1, 1]} : vector<8x4x6xf32> to vector<1x4x6xf32>
    %667 = vector.shape_cast %666 : vector<1x4x6xf32> to vector<4x6xf32>
    %668 = vector.extract_strided_slice %661 {offsets = [0, 1], sizes = [6, 192], strides = [1, 1]} : vector<6x199xf32> to vector<6x192xf32>
    %cst_202 = arith.constant dense<0.000000e+00> : vector<4x192xf32>
    %669 = tpu.matmul %667, %668, %cst_202 {dimension_numbers = #tpu.dot_dimension_numbers<[1], [0], [0], [1], [0, 0, 1, 1], [], []>} : vector<4x6xf32>, vector<6x192xf32>, vector<4x192xf32> -> vector<4x192xf32>
    %670 = arith.addf %665, %669 : vector<4x192xf32>
    %671 = vector.extract_strided_slice %651 {offsets = [2, 0, 0], sizes = [1, 4, 6], strides = [1, 1, 1]} : vector<8x4x6xf32> to vector<1x4x6xf32>
    %672 = vector.shape_cast %671 : vector<1x4x6xf32> to vector<4x6xf32>
    %673 = vector.extract_strided_slice %661 {offsets = [0, 2], sizes = [6, 192], strides = [1, 1]} : vector<6x199xf32> to vector<6x192xf32>
    %cst_203 = arith.constant dense<0.000000e+00> : vector<4x192xf32>
    %674 = tpu.matmul %672, %673, %cst_203 {dimension_numbers = #tpu.dot_dimension_numbers<[1], [0], [0], [1], [0, 0, 1, 1], [], []>} : vector<4x6xf32>, vector<6x192xf32>, vector<4x192xf32> -> vector<4x192xf32>
    %675 = arith.addf %670, %674 : vector<4x192xf32>
    %676 = vector.extract_strided_slice %651 {offsets = [3, 0, 0], sizes = [1, 4, 6], strides = [1, 1, 1]} : vector<8x4x6xf32> to vector<1x4x6xf32>
    %677 = vector.shape_cast %676 : vector<1x4x6xf32> to vector<4x6xf32>
    %678 = vector.extract_strided_slice %661 {offsets = [0, 3], sizes = [6, 192], strides = [1, 1]} : vector<6x199xf32> to vector<6x192xf32>
    %cst_204 = arith.constant dense<0.000000e+00> : vector<4x192xf32>
    %679 = tpu.matmul %677, %678, %cst_204 {dimension_numbers = #tpu.dot_dimension_numbers<[1], [0], [0], [1], [0, 0, 1, 1], [], []>} : vector<4x6xf32>, vector<6x192xf32>, vector<4x192xf32> -> vector<4x192xf32>
    %680 = arith.addf %675, %679 : vector<4x192xf32>
    %681 = vector.extract_strided_slice %651 {offsets = [4, 0, 0], sizes = [1, 4, 6], strides = [1, 1, 1]} : vector<8x4x6xf32> to vector<1x4x6xf32>
    %682 = vector.shape_cast %681 : vector<1x4x6xf32> to vector<4x6xf32>
    %683 = vector.extract_strided_slice %661 {offsets = [0, 4], sizes = [6, 192], strides = [1, 1]} : vector<6x199xf32> to vector<6x192xf32>
    %cst_205 = arith.constant dense<0.000000e+00> : vector<4x192xf32>
    %684 = tpu.matmul %682, %683, %cst_205 {dimension_numbers = #tpu.dot_dimension_numbers<[1], [0], [0], [1], [0, 0, 1, 1], [], []>} : vector<4x6xf32>, vector<6x192xf32>, vector<4x192xf32> -> vector<4x192xf32>
    %685 = arith.addf %680, %684 : vector<4x192xf32>
    %686 = vector.extract_strided_slice %651 {offsets = [5, 0, 0], sizes = [1, 4, 6], strides = [1, 1, 1]} : vector<8x4x6xf32> to vector<1x4x6xf32>
    %687 = vector.shape_cast %686 : vector<1x4x6xf32> to vector<4x6xf32>
    %688 = vector.extract_strided_slice %661 {offsets = [0, 5], sizes = [6, 192], strides = [1, 1]} : vector<6x199xf32> to vector<6x192xf32>
    %cst_206 = arith.constant dense<0.000000e+00> : vector<4x192xf32>
    %689 = tpu.matmul %687, %688, %cst_206 {dimension_numbers = #tpu.dot_dimension_numbers<[1], [0], [0], [1], [0, 0, 1, 1], [], []>} : vector<4x6xf32>, vector<6x192xf32>, vector<4x192xf32> -> vector<4x192xf32>
    %690 = arith.addf %685, %689 : vector<4x192xf32>
    %691 = vector.extract_strided_slice %651 {offsets = [6, 0, 0], sizes = [1, 4, 6], strides = [1, 1, 1]} : vector<8x4x6xf32> to vector<1x4x6xf32>
    %692 = vector.shape_cast %691 : vector<1x4x6xf32> to vector<4x6xf32>
    %693 = vector.extract_strided_slice %661 {offsets = [0, 6], sizes = [6, 192], strides = [1, 1]} : vector<6x199xf32> to vector<6x192xf32>
    %cst_207 = arith.constant dense<0.000000e+00> : vector<4x192xf32>
    %694 = tpu.matmul %692, %693, %cst_207 {dimension_numbers = #tpu.dot_dimension_numbers<[1], [0], [0], [1], [0, 0, 1, 1], [], []>} : vector<4x6xf32>, vector<6x192xf32>, vector<4x192xf32> -> vector<4x192xf32>
    %695 = arith.addf %690, %694 : vector<4x192xf32>
    %696 = vector.extract_strided_slice %651 {offsets = [7, 0, 0], sizes = [1, 4, 6], strides = [1, 1, 1]} : vector<8x4x6xf32> to vector<1x4x6xf32>
    %697 = vector.shape_cast %696 : vector<1x4x6xf32> to vector<4x6xf32>
    %698 = vector.extract_strided_slice %661 {offsets = [0, 7], sizes = [6, 192], strides = [1, 1]} : vector<6x199xf32> to vector<6x192xf32>
    %cst_208 = arith.constant dense<0.000000e+00> : vector<4x192xf32>
    %699 = tpu.matmul %697, %698, %cst_208 {dimension_numbers = #tpu.dot_dimension_numbers<[1], [0], [0], [1], [0, 0, 1, 1], [], []>} : vector<4x6xf32>, vector<6x192xf32>, vector<4x192xf32> -> vector<4x192xf32>
    %700 = arith.addf %695, %699 : vector<4x192xf32>
    %c0_209 = arith.constant 0 : index
    %c0_210 = arith.constant 0 : index
    %701 = vector.load %arg14[%c0_209, %c0_210] : memref<4x1xf32, #tpu.memory_space<vmem>>, vector<4x1xf32>
    %702 = vector.broadcast %701 : vector<4x1xf32> to vector<4x192xf32>
    %703 = arith.addf %700, %702 : vector<4x192xf32>
    %c0_211 = arith.constant 0 : index
    %c0_212 = arith.constant 0 : index
    %c0_213 = arith.constant 0 : index
    %704 = vector.load %arg23[%c0_211, %c0_212, %c0_213] : memref<9x4x4xf32, #tpu.memory_space<vmem>>, vector<9x4x4xf32>
    %cst_214 = arith.constant 0.000000e+00 : f32
    %705 = vector.broadcast %cst_214 : f32 to vector<4x4xf32>
    %706 = tpu.concatenate %705, %703, %705 in 1 : vector<4x4xf32>, vector<4x192xf32>, vector<4x4xf32> -> vector<4x200xf32>
    %707 = vector.extract_strided_slice %704 {offsets = [0, 0, 0], sizes = [1, 4, 4], strides = [1, 1, 1]} : vector<9x4x4xf32> to vector<1x4x4xf32>
    %708 = vector.shape_cast %707 : vector<1x4x4xf32> to vector<4x4xf32>
    %709 = vector.extract_strided_slice %706 {offsets = [0, 0], sizes = [4, 192], strides = [1, 1]} : vector<4x200xf32> to vector<4x192xf32>
    %cst_215 = arith.constant dense<0.000000e+00> : vector<4x192xf32>
    %710 = tpu.matmul %708, %709, %cst_215 {dimension_numbers = #tpu.dot_dimension_numbers<[1], [0], [0], [1], [0, 0, 1, 1], [], []>} : vector<4x4xf32>, vector<4x192xf32>, vector<4x192xf32> -> vector<4x192xf32>
    %711 = vector.extract_strided_slice %704 {offsets = [1, 0, 0], sizes = [1, 4, 4], strides = [1, 1, 1]} : vector<9x4x4xf32> to vector<1x4x4xf32>
    %712 = vector.shape_cast %711 : vector<1x4x4xf32> to vector<4x4xf32>
    %713 = vector.extract_strided_slice %706 {offsets = [0, 1], sizes = [4, 192], strides = [1, 1]} : vector<4x200xf32> to vector<4x192xf32>
    %cst_216 = arith.constant dense<0.000000e+00> : vector<4x192xf32>
    %714 = tpu.matmul %712, %713, %cst_216 {dimension_numbers = #tpu.dot_dimension_numbers<[1], [0], [0], [1], [0, 0, 1, 1], [], []>} : vector<4x4xf32>, vector<4x192xf32>, vector<4x192xf32> -> vector<4x192xf32>
    %715 = arith.addf %710, %714 : vector<4x192xf32>
    %716 = vector.extract_strided_slice %704 {offsets = [2, 0, 0], sizes = [1, 4, 4], strides = [1, 1, 1]} : vector<9x4x4xf32> to vector<1x4x4xf32>
    %717 = vector.shape_cast %716 : vector<1x4x4xf32> to vector<4x4xf32>
    %718 = vector.extract_strided_slice %706 {offsets = [0, 2], sizes = [4, 192], strides = [1, 1]} : vector<4x200xf32> to vector<4x192xf32>
    %cst_217 = arith.constant dense<0.000000e+00> : vector<4x192xf32>
    %719 = tpu.matmul %717, %718, %cst_217 {dimension_numbers = #tpu.dot_dimension_numbers<[1], [0], [0], [1], [0, 0, 1, 1], [], []>} : vector<4x4xf32>, vector<4x192xf32>, vector<4x192xf32> -> vector<4x192xf32>
    %720 = arith.addf %715, %719 : vector<4x192xf32>
    %721 = vector.extract_strided_slice %704 {offsets = [3, 0, 0], sizes = [1, 4, 4], strides = [1, 1, 1]} : vector<9x4x4xf32> to vector<1x4x4xf32>
    %722 = vector.shape_cast %721 : vector<1x4x4xf32> to vector<4x4xf32>
    %723 = vector.extract_strided_slice %706 {offsets = [0, 3], sizes = [4, 192], strides = [1, 1]} : vector<4x200xf32> to vector<4x192xf32>
    %cst_218 = arith.constant dense<0.000000e+00> : vector<4x192xf32>
    %724 = tpu.matmul %722, %723, %cst_218 {dimension_numbers = #tpu.dot_dimension_numbers<[1], [0], [0], [1], [0, 0, 1, 1], [], []>} : vector<4x4xf32>, vector<4x192xf32>, vector<4x192xf32> -> vector<4x192xf32>
    %725 = arith.addf %720, %724 : vector<4x192xf32>
    %726 = vector.extract_strided_slice %704 {offsets = [4, 0, 0], sizes = [1, 4, 4], strides = [1, 1, 1]} : vector<9x4x4xf32> to vector<1x4x4xf32>
    %727 = vector.shape_cast %726 : vector<1x4x4xf32> to vector<4x4xf32>
    %728 = vector.extract_strided_slice %706 {offsets = [0, 4], sizes = [4, 192], strides = [1, 1]} : vector<4x200xf32> to vector<4x192xf32>
    %cst_219 = arith.constant dense<0.000000e+00> : vector<4x192xf32>
    %729 = tpu.matmul %727, %728, %cst_219 {dimension_numbers = #tpu.dot_dimension_numbers<[1], [0], [0], [1], [0, 0, 1, 1], [], []>} : vector<4x4xf32>, vector<4x192xf32>, vector<4x192xf32> -> vector<4x192xf32>
    %730 = arith.addf %725, %729 : vector<4x192xf32>
    %731 = vector.extract_strided_slice %704 {offsets = [5, 0, 0], sizes = [1, 4, 4], strides = [1, 1, 1]} : vector<9x4x4xf32> to vector<1x4x4xf32>
    %732 = vector.shape_cast %731 : vector<1x4x4xf32> to vector<4x4xf32>
    %733 = vector.extract_strided_slice %706 {offsets = [0, 5], sizes = [4, 192], strides = [1, 1]} : vector<4x200xf32> to vector<4x192xf32>
    %cst_220 = arith.constant dense<0.000000e+00> : vector<4x192xf32>
    %734 = tpu.matmul %732, %733, %cst_220 {dimension_numbers = #tpu.dot_dimension_numbers<[1], [0], [0], [1], [0, 0, 1, 1], [], []>} : vector<4x4xf32>, vector<4x192xf32>, vector<4x192xf32> -> vector<4x192xf32>
    %735 = arith.addf %730, %734 : vector<4x192xf32>
    %736 = vector.extract_strided_slice %704 {offsets = [6, 0, 0], sizes = [1, 4, 4], strides = [1, 1, 1]} : vector<9x4x4xf32> to vector<1x4x4xf32>
    %737 = vector.shape_cast %736 : vector<1x4x4xf32> to vector<4x4xf32>
    %738 = vector.extract_strided_slice %706 {offsets = [0, 6], sizes = [4, 192], strides = [1, 1]} : vector<4x200xf32> to vector<4x192xf32>
    %cst_221 = arith.constant dense<0.000000e+00> : vector<4x192xf32>
    %739 = tpu.matmul %737, %738, %cst_221 {dimension_numbers = #tpu.dot_dimension_numbers<[1], [0], [0], [1], [0, 0, 1, 1], [], []>} : vector<4x4xf32>, vector<4x192xf32>, vector<4x192xf32> -> vector<4x192xf32>
    %740 = arith.addf %735, %739 : vector<4x192xf32>
    %741 = vector.extract_strided_slice %704 {offsets = [7, 0, 0], sizes = [1, 4, 4], strides = [1, 1, 1]} : vector<9x4x4xf32> to vector<1x4x4xf32>
    %742 = vector.shape_cast %741 : vector<1x4x4xf32> to vector<4x4xf32>
    %743 = vector.extract_strided_slice %706 {offsets = [0, 7], sizes = [4, 192], strides = [1, 1]} : vector<4x200xf32> to vector<4x192xf32>
    %cst_222 = arith.constant dense<0.000000e+00> : vector<4x192xf32>
    %744 = tpu.matmul %742, %743, %cst_222 {dimension_numbers = #tpu.dot_dimension_numbers<[1], [0], [0], [1], [0, 0, 1, 1], [], []>} : vector<4x4xf32>, vector<4x192xf32>, vector<4x192xf32> -> vector<4x192xf32>
    %745 = arith.addf %740, %744 : vector<4x192xf32>
    %746 = vector.extract_strided_slice %704 {offsets = [8, 0, 0], sizes = [1, 4, 4], strides = [1, 1, 1]} : vector<9x4x4xf32> to vector<1x4x4xf32>
    %747 = vector.shape_cast %746 : vector<1x4x4xf32> to vector<4x4xf32>
    %748 = vector.extract_strided_slice %706 {offsets = [0, 8], sizes = [4, 192], strides = [1, 1]} : vector<4x200xf32> to vector<4x192xf32>
    %cst_223 = arith.constant dense<0.000000e+00> : vector<4x192xf32>
    %749 = tpu.matmul %747, %748, %cst_223 {dimension_numbers = #tpu.dot_dimension_numbers<[1], [0], [0], [1], [0, 0, 1, 1], [], []>} : vector<4x4xf32>, vector<4x192xf32>, vector<4x192xf32> -> vector<4x192xf32>
    %750 = arith.addf %745, %749 : vector<4x192xf32>
    %c0_224 = arith.constant 0 : index
    %c0_225 = arith.constant 0 : index
    %c0_226 = arith.constant 0 : index
    %751 = vector.load %arg24[%c0_224, %c0_225, %c0_226] : memref<9x4x4xf32, #tpu.memory_space<vmem>>, vector<9x4x4xf32>
    %cst_227 = arith.constant 0.000000e+00 : f32
    %752 = vector.broadcast %cst_227 : f32 to vector<4x4xf32>
    %753 = tpu.concatenate %752, %539, %752 in 1 : vector<4x4xf32>, vector<4x192xf32>, vector<4x4xf32> -> vector<4x200xf32>
    %754 = vector.extract_strided_slice %751 {offsets = [0, 0, 0], sizes = [1, 4, 4], strides = [1, 1, 1]} : vector<9x4x4xf32> to vector<1x4x4xf32>
    %755 = vector.shape_cast %754 : vector<1x4x4xf32> to vector<4x4xf32>
    %756 = vector.extract_strided_slice %753 {offsets = [0, 0], sizes = [4, 192], strides = [1, 1]} : vector<4x200xf32> to vector<4x192xf32>
    %cst_228 = arith.constant dense<0.000000e+00> : vector<4x192xf32>
    %757 = tpu.matmul %755, %756, %cst_228 {dimension_numbers = #tpu.dot_dimension_numbers<[1], [0], [0], [1], [0, 0, 1, 1], [], []>} : vector<4x4xf32>, vector<4x192xf32>, vector<4x192xf32> -> vector<4x192xf32>
    %758 = vector.extract_strided_slice %751 {offsets = [1, 0, 0], sizes = [1, 4, 4], strides = [1, 1, 1]} : vector<9x4x4xf32> to vector<1x4x4xf32>
    %759 = vector.shape_cast %758 : vector<1x4x4xf32> to vector<4x4xf32>
    %760 = vector.extract_strided_slice %753 {offsets = [0, 1], sizes = [4, 192], strides = [1, 1]} : vector<4x200xf32> to vector<4x192xf32>
    %cst_229 = arith.constant dense<0.000000e+00> : vector<4x192xf32>
    %761 = tpu.matmul %759, %760, %cst_229 {dimension_numbers = #tpu.dot_dimension_numbers<[1], [0], [0], [1], [0, 0, 1, 1], [], []>} : vector<4x4xf32>, vector<4x192xf32>, vector<4x192xf32> -> vector<4x192xf32>
    %762 = arith.addf %757, %761 : vector<4x192xf32>
    %763 = vector.extract_strided_slice %751 {offsets = [2, 0, 0], sizes = [1, 4, 4], strides = [1, 1, 1]} : vector<9x4x4xf32> to vector<1x4x4xf32>
    %764 = vector.shape_cast %763 : vector<1x4x4xf32> to vector<4x4xf32>
    %765 = vector.extract_strided_slice %753 {offsets = [0, 2], sizes = [4, 192], strides = [1, 1]} : vector<4x200xf32> to vector<4x192xf32>
    %cst_230 = arith.constant dense<0.000000e+00> : vector<4x192xf32>
    %766 = tpu.matmul %764, %765, %cst_230 {dimension_numbers = #tpu.dot_dimension_numbers<[1], [0], [0], [1], [0, 0, 1, 1], [], []>} : vector<4x4xf32>, vector<4x192xf32>, vector<4x192xf32> -> vector<4x192xf32>
    %767 = arith.addf %762, %766 : vector<4x192xf32>
    %768 = vector.extract_strided_slice %751 {offsets = [3, 0, 0], sizes = [1, 4, 4], strides = [1, 1, 1]} : vector<9x4x4xf32> to vector<1x4x4xf32>
    %769 = vector.shape_cast %768 : vector<1x4x4xf32> to vector<4x4xf32>
    %770 = vector.extract_strided_slice %753 {offsets = [0, 3], sizes = [4, 192], strides = [1, 1]} : vector<4x200xf32> to vector<4x192xf32>
    %cst_231 = arith.constant dense<0.000000e+00> : vector<4x192xf32>
    %771 = tpu.matmul %769, %770, %cst_231 {dimension_numbers = #tpu.dot_dimension_numbers<[1], [0], [0], [1], [0, 0, 1, 1], [], []>} : vector<4x4xf32>, vector<4x192xf32>, vector<4x192xf32> -> vector<4x192xf32>
    %772 = arith.addf %767, %771 : vector<4x192xf32>
    %773 = vector.extract_strided_slice %751 {offsets = [4, 0, 0], sizes = [1, 4, 4], strides = [1, 1, 1]} : vector<9x4x4xf32> to vector<1x4x4xf32>
    %774 = vector.shape_cast %773 : vector<1x4x4xf32> to vector<4x4xf32>
    %775 = vector.extract_strided_slice %753 {offsets = [0, 4], sizes = [4, 192], strides = [1, 1]} : vector<4x200xf32> to vector<4x192xf32>
    %cst_232 = arith.constant dense<0.000000e+00> : vector<4x192xf32>
    %776 = tpu.matmul %774, %775, %cst_232 {dimension_numbers = #tpu.dot_dimension_numbers<[1], [0], [0], [1], [0, 0, 1, 1], [], []>} : vector<4x4xf32>, vector<4x192xf32>, vector<4x192xf32> -> vector<4x192xf32>
    %777 = arith.addf %772, %776 : vector<4x192xf32>
    %778 = vector.extract_strided_slice %751 {offsets = [5, 0, 0], sizes = [1, 4, 4], strides = [1, 1, 1]} : vector<9x4x4xf32> to vector<1x4x4xf32>
    %779 = vector.shape_cast %778 : vector<1x4x4xf32> to vector<4x4xf32>
    %780 = vector.extract_strided_slice %753 {offsets = [0, 5], sizes = [4, 192], strides = [1, 1]} : vector<4x200xf32> to vector<4x192xf32>
    %cst_233 = arith.constant dense<0.000000e+00> : vector<4x192xf32>
    %781 = tpu.matmul %779, %780, %cst_233 {dimension_numbers = #tpu.dot_dimension_numbers<[1], [0], [0], [1], [0, 0, 1, 1], [], []>} : vector<4x4xf32>, vector<4x192xf32>, vector<4x192xf32> -> vector<4x192xf32>
    %782 = arith.addf %777, %781 : vector<4x192xf32>
    %783 = vector.extract_strided_slice %751 {offsets = [6, 0, 0], sizes = [1, 4, 4], strides = [1, 1, 1]} : vector<9x4x4xf32> to vector<1x4x4xf32>
    %784 = vector.shape_cast %783 : vector<1x4x4xf32> to vector<4x4xf32>
    %785 = vector.extract_strided_slice %753 {offsets = [0, 6], sizes = [4, 192], strides = [1, 1]} : vector<4x200xf32> to vector<4x192xf32>
    %cst_234 = arith.constant dense<0.000000e+00> : vector<4x192xf32>
    %786 = tpu.matmul %784, %785, %cst_234 {dimension_numbers = #tpu.dot_dimension_numbers<[1], [0], [0], [1], [0, 0, 1, 1], [], []>} : vector<4x4xf32>, vector<4x192xf32>, vector<4x192xf32> -> vector<4x192xf32>
    %787 = arith.addf %782, %786 : vector<4x192xf32>
    %788 = vector.extract_strided_slice %751 {offsets = [7, 0, 0], sizes = [1, 4, 4], strides = [1, 1, 1]} : vector<9x4x4xf32> to vector<1x4x4xf32>
    %789 = vector.shape_cast %788 : vector<1x4x4xf32> to vector<4x4xf32>
    %790 = vector.extract_strided_slice %753 {offsets = [0, 7], sizes = [4, 192], strides = [1, 1]} : vector<4x200xf32> to vector<4x192xf32>
    %cst_235 = arith.constant dense<0.000000e+00> : vector<4x192xf32>
    %791 = tpu.matmul %789, %790, %cst_235 {dimension_numbers = #tpu.dot_dimension_numbers<[1], [0], [0], [1], [0, 0, 1, 1], [], []>} : vector<4x4xf32>, vector<4x192xf32>, vector<4x192xf32> -> vector<4x192xf32>
    %792 = arith.addf %787, %791 : vector<4x192xf32>
    %793 = vector.extract_strided_slice %751 {offsets = [8, 0, 0], sizes = [1, 4, 4], strides = [1, 1, 1]} : vector<9x4x4xf32> to vector<1x4x4xf32>
    %794 = vector.shape_cast %793 : vector<1x4x4xf32> to vector<4x4xf32>
    %795 = vector.extract_strided_slice %753 {offsets = [0, 8], sizes = [4, 192], strides = [1, 1]} : vector<4x200xf32> to vector<4x192xf32>
    %cst_236 = arith.constant dense<0.000000e+00> : vector<4x192xf32>
    %796 = tpu.matmul %794, %795, %cst_236 {dimension_numbers = #tpu.dot_dimension_numbers<[1], [0], [0], [1], [0, 0, 1, 1], [], []>} : vector<4x4xf32>, vector<4x192xf32>, vector<4x192xf32> -> vector<4x192xf32>
    %797 = arith.addf %792, %796 : vector<4x192xf32>
    %798 = arith.addf %750, %797 : vector<4x192xf32>
    %c0_237 = arith.constant 0 : index
    %c0_238 = arith.constant 0 : index
    %799 = vector.load %arg25[%c0_237, %c0_238] : memref<4x1xf32, #tpu.memory_space<vmem>>, vector<4x1xf32>
    %800 = vector.broadcast %799 : vector<4x1xf32> to vector<4x192xf32>
    %801 = arith.addf %798, %800 : vector<4x192xf32>
    %cst_239 = arith.constant 0.000000e+00 : f32
    %802 = vector.broadcast %cst_239 : f32 to vector<4x192xf32>
    %803 = arith.maximumf %801, %802 : vector<4x192xf32>
    %c0_240 = arith.constant 0 : index
    %c0_241 = arith.constant 0 : index
    %c0_242 = arith.constant 0 : index
    %804 = vector.load %arg26[%c0_240, %c0_241, %c0_242] : memref<9x4x4xf32, #tpu.memory_space<vmem>>, vector<9x4x4xf32>
    %cst_243 = arith.constant 0.000000e+00 : f32
    %805 = vector.broadcast %cst_243 : f32 to vector<4x4xf32>
    %806 = tpu.concatenate %805, %803, %805 in 1 : vector<4x4xf32>, vector<4x192xf32>, vector<4x4xf32> -> vector<4x200xf32>
    %807 = vector.extract_strided_slice %804 {offsets = [0, 0, 0], sizes = [1, 4, 4], strides = [1, 1, 1]} : vector<9x4x4xf32> to vector<1x4x4xf32>
    %808 = vector.shape_cast %807 : vector<1x4x4xf32> to vector<4x4xf32>
    %809 = vector.extract_strided_slice %806 {offsets = [0, 0], sizes = [4, 192], strides = [1, 1]} : vector<4x200xf32> to vector<4x192xf32>
    %cst_244 = arith.constant dense<0.000000e+00> : vector<4x192xf32>
    %810 = tpu.matmul %808, %809, %cst_244 {dimension_numbers = #tpu.dot_dimension_numbers<[1], [0], [0], [1], [0, 0, 1, 1], [], []>} : vector<4x4xf32>, vector<4x192xf32>, vector<4x192xf32> -> vector<4x192xf32>
    %811 = vector.extract_strided_slice %804 {offsets = [1, 0, 0], sizes = [1, 4, 4], strides = [1, 1, 1]} : vector<9x4x4xf32> to vector<1x4x4xf32>
    %812 = vector.shape_cast %811 : vector<1x4x4xf32> to vector<4x4xf32>
    %813 = vector.extract_strided_slice %806 {offsets = [0, 1], sizes = [4, 192], strides = [1, 1]} : vector<4x200xf32> to vector<4x192xf32>
    %cst_245 = arith.constant dense<0.000000e+00> : vector<4x192xf32>
    %814 = tpu.matmul %812, %813, %cst_245 {dimension_numbers = #tpu.dot_dimension_numbers<[1], [0], [0], [1], [0, 0, 1, 1], [], []>} : vector<4x4xf32>, vector<4x192xf32>, vector<4x192xf32> -> vector<4x192xf32>
    %815 = arith.addf %810, %814 : vector<4x192xf32>
    %816 = vector.extract_strided_slice %804 {offsets = [2, 0, 0], sizes = [1, 4, 4], strides = [1, 1, 1]} : vector<9x4x4xf32> to vector<1x4x4xf32>
    %817 = vector.shape_cast %816 : vector<1x4x4xf32> to vector<4x4xf32>
    %818 = vector.extract_strided_slice %806 {offsets = [0, 2], sizes = [4, 192], strides = [1, 1]} : vector<4x200xf32> to vector<4x192xf32>
    %cst_246 = arith.constant dense<0.000000e+00> : vector<4x192xf32>
    %819 = tpu.matmul %817, %818, %cst_246 {dimension_numbers = #tpu.dot_dimension_numbers<[1], [0], [0], [1], [0, 0, 1, 1], [], []>} : vector<4x4xf32>, vector<4x192xf32>, vector<4x192xf32> -> vector<4x192xf32>
    %820 = arith.addf %815, %819 : vector<4x192xf32>
    %821 = vector.extract_strided_slice %804 {offsets = [3, 0, 0], sizes = [1, 4, 4], strides = [1, 1, 1]} : vector<9x4x4xf32> to vector<1x4x4xf32>
    %822 = vector.shape_cast %821 : vector<1x4x4xf32> to vector<4x4xf32>
    %823 = vector.extract_strided_slice %806 {offsets = [0, 3], sizes = [4, 192], strides = [1, 1]} : vector<4x200xf32> to vector<4x192xf32>
    %cst_247 = arith.constant dense<0.000000e+00> : vector<4x192xf32>
    %824 = tpu.matmul %822, %823, %cst_247 {dimension_numbers = #tpu.dot_dimension_numbers<[1], [0], [0], [1], [0, 0, 1, 1], [], []>} : vector<4x4xf32>, vector<4x192xf32>, vector<4x192xf32> -> vector<4x192xf32>
    %825 = arith.addf %820, %824 : vector<4x192xf32>
    %826 = vector.extract_strided_slice %804 {offsets = [4, 0, 0], sizes = [1, 4, 4], strides = [1, 1, 1]} : vector<9x4x4xf32> to vector<1x4x4xf32>
    %827 = vector.shape_cast %826 : vector<1x4x4xf32> to vector<4x4xf32>
    %828 = vector.extract_strided_slice %806 {offsets = [0, 4], sizes = [4, 192], strides = [1, 1]} : vector<4x200xf32> to vector<4x192xf32>
    %cst_248 = arith.constant dense<0.000000e+00> : vector<4x192xf32>
    %829 = tpu.matmul %827, %828, %cst_248 {dimension_numbers = #tpu.dot_dimension_numbers<[1], [0], [0], [1], [0, 0, 1, 1], [], []>} : vector<4x4xf32>, vector<4x192xf32>, vector<4x192xf32> -> vector<4x192xf32>
    %830 = arith.addf %825, %829 : vector<4x192xf32>
    %831 = vector.extract_strided_slice %804 {offsets = [5, 0, 0], sizes = [1, 4, 4], strides = [1, 1, 1]} : vector<9x4x4xf32> to vector<1x4x4xf32>
    %832 = vector.shape_cast %831 : vector<1x4x4xf32> to vector<4x4xf32>
    %833 = vector.extract_strided_slice %806 {offsets = [0, 5], sizes = [4, 192], strides = [1, 1]} : vector<4x200xf32> to vector<4x192xf32>
    %cst_249 = arith.constant dense<0.000000e+00> : vector<4x192xf32>
    %834 = tpu.matmul %832, %833, %cst_249 {dimension_numbers = #tpu.dot_dimension_numbers<[1], [0], [0], [1], [0, 0, 1, 1], [], []>} : vector<4x4xf32>, vector<4x192xf32>, vector<4x192xf32> -> vector<4x192xf32>
    %835 = arith.addf %830, %834 : vector<4x192xf32>
    %836 = vector.extract_strided_slice %804 {offsets = [6, 0, 0], sizes = [1, 4, 4], strides = [1, 1, 1]} : vector<9x4x4xf32> to vector<1x4x4xf32>
    %837 = vector.shape_cast %836 : vector<1x4x4xf32> to vector<4x4xf32>
    %838 = vector.extract_strided_slice %806 {offsets = [0, 6], sizes = [4, 192], strides = [1, 1]} : vector<4x200xf32> to vector<4x192xf32>
    %cst_250 = arith.constant dense<0.000000e+00> : vector<4x192xf32>
    %839 = tpu.matmul %837, %838, %cst_250 {dimension_numbers = #tpu.dot_dimension_numbers<[1], [0], [0], [1], [0, 0, 1, 1], [], []>} : vector<4x4xf32>, vector<4x192xf32>, vector<4x192xf32> -> vector<4x192xf32>
    %840 = arith.addf %835, %839 : vector<4x192xf32>
    %841 = vector.extract_strided_slice %804 {offsets = [7, 0, 0], sizes = [1, 4, 4], strides = [1, 1, 1]} : vector<9x4x4xf32> to vector<1x4x4xf32>
    %842 = vector.shape_cast %841 : vector<1x4x4xf32> to vector<4x4xf32>
    %843 = vector.extract_strided_slice %806 {offsets = [0, 7], sizes = [4, 192], strides = [1, 1]} : vector<4x200xf32> to vector<4x192xf32>
    %cst_251 = arith.constant dense<0.000000e+00> : vector<4x192xf32>
    %844 = tpu.matmul %842, %843, %cst_251 {dimension_numbers = #tpu.dot_dimension_numbers<[1], [0], [0], [1], [0, 0, 1, 1], [], []>} : vector<4x4xf32>, vector<4x192xf32>, vector<4x192xf32> -> vector<4x192xf32>
    %845 = arith.addf %840, %844 : vector<4x192xf32>
    %846 = vector.extract_strided_slice %804 {offsets = [8, 0, 0], sizes = [1, 4, 4], strides = [1, 1, 1]} : vector<9x4x4xf32> to vector<1x4x4xf32>
    %847 = vector.shape_cast %846 : vector<1x4x4xf32> to vector<4x4xf32>
    %848 = vector.extract_strided_slice %806 {offsets = [0, 8], sizes = [4, 192], strides = [1, 1]} : vector<4x200xf32> to vector<4x192xf32>
    %cst_252 = arith.constant dense<0.000000e+00> : vector<4x192xf32>
    %849 = tpu.matmul %847, %848, %cst_252 {dimension_numbers = #tpu.dot_dimension_numbers<[1], [0], [0], [1], [0, 0, 1, 1], [], []>} : vector<4x4xf32>, vector<4x192xf32>, vector<4x192xf32> -> vector<4x192xf32>
    %850 = arith.addf %845, %849 : vector<4x192xf32>
    %c0_253 = arith.constant 0 : index
    %c0_254 = arith.constant 0 : index
    %851 = vector.load %arg27[%c0_253, %c0_254] : memref<4x1xf32, #tpu.memory_space<vmem>>, vector<4x1xf32>
    %852 = vector.broadcast %851 : vector<4x1xf32> to vector<4x192xf32>
    %853 = arith.addf %850, %852 : vector<4x192xf32>
    %cst_255 = arith.constant 0.000000e+00 : f32
    %854 = vector.broadcast %cst_255 : f32 to vector<4x192xf32>
    %855 = arith.maximumf %853, %854 : vector<4x192xf32>
    %c0_256 = arith.constant 0 : index
    %c0_257 = arith.constant 0 : index
    %c0_258 = arith.constant 0 : index
    %856 = vector.load %arg28[%c0_256, %c0_257, %c0_258] : memref<1x4x192xf32, #tpu.memory_space<vmem>>, vector<1x4x192xf32>
    %857 = vector.shape_cast %856 : vector<1x4x192xf32> to vector<4x192xf32>
    %858 = vector.shape_cast %855 : vector<4x192xf32> to vector<1x4x192xf32>
    tpu.vector_store %arg28[%c0_256, %c0_257, %c0_258], %858 {strides = array<i32>} : memref<1x4x192xf32, #tpu.memory_space<vmem>>, vector<1x4x192xf32>,
    return
  }
  func.func @transform_0(%arg0: i32) -> (i32, i32, i32) {
    %c0_i32 = arith.constant 0 : i32
    %c0_i32_0 = arith.constant 0 : i32
    %c0_i32_1 = arith.constant 0 : i32
    return %arg0, %c0_i32, %c0_i32_0 : i32, i32, i32
  }
  func.func @transform_1(%arg0: i32) -> (i32, i32, i32) {
    %c0_i32 = arith.constant 0 : i32
    %c0_i32_0 = arith.constant 0 : i32
    %c0_i32_1 = arith.constant 0 : i32
    return %arg0, %c0_i32, %c0_i32_0 : i32, i32, i32
  }
  func.func @transform_2(%arg0: i32) -> (i32, i32, i32) {
    %c0_i32 = arith.constant 0 : i32
    %c0_i32_0 = arith.constant 0 : i32
    %c0_i32_1 = arith.constant 0 : i32
    return %arg0, %c0_i32, %c0_i32_0 : i32, i32, i32
  }
  func.func @transform_3(%arg0: i32) -> (i32, i32, i32) {
    %c0_i32 = arith.constant 0 : i32
    %c0_i32_0 = arith.constant 0 : i32
    %c0_i32_1 = arith.constant 0 : i32
    return %arg0, %c0_i32, %c0_i32_0 : i32, i32, i32
  }
  func.func @transform_4(%arg0: i32) -> (i32, i32, i32) {
    %c0_i32 = arith.constant 0 : i32
    %c0_i32_0 = arith.constant 0 : i32
    %c0_i32_1 = arith.constant 0 : i32
    %c0_i32_2 = arith.constant 0 : i32
    return %c0_i32, %c0_i32_0, %c0_i32_1 : i32, i32, i32
  }
  func.func @transform_5(%arg0: i32) -> (i32, i32) {
    %c0_i32 = arith.constant 0 : i32
    %c0_i32_0 = arith.constant 0 : i32
    %c0_i32_1 = arith.constant 0 : i32
    return %c0_i32, %c0_i32_0 : i32, i32
  }
  func.func @transform_6(%arg0: i32) -> (i32, i32, i32) {
    %c0_i32 = arith.constant 0 : i32
    %c0_i32_0 = arith.constant 0 : i32
    %c0_i32_1 = arith.constant 0 : i32
    %c0_i32_2 = arith.constant 0 : i32
    return %c0_i32, %c0_i32_0, %c0_i32_1 : i32, i32, i32
  }
  func.func @transform_7(%arg0: i32) -> (i32, i32) {
    %c0_i32 = arith.constant 0 : i32
    %c0_i32_0 = arith.constant 0 : i32
    %c0_i32_1 = arith.constant 0 : i32
    return %c0_i32, %c0_i32_0 : i32, i32
  }
  func.func @transform_8(%arg0: i32) -> (i32, i32, i32) {
    %c0_i32 = arith.constant 0 : i32
    %c0_i32_0 = arith.constant 0 : i32
    %c0_i32_1 = arith.constant 0 : i32
    %c0_i32_2 = arith.constant 0 : i32
    return %c0_i32, %c0_i32_0, %c0_i32_1 : i32, i32, i32
  }
  func.func @transform_9(%arg0: i32) -> (i32, i32) {
    %c0_i32 = arith.constant 0 : i32
    %c0_i32_0 = arith.constant 0 : i32
    %c0_i32_1 = arith.constant 0 : i32
    return %c0_i32, %c0_i32_0 : i32, i32
  }
  func.func @transform_10(%arg0: i32) -> (i32, i32, i32) {
    %c0_i32 = arith.constant 0 : i32
    %c0_i32_0 = arith.constant 0 : i32
    %c0_i32_1 = arith.constant 0 : i32
    %c0_i32_2 = arith.constant 0 : i32
    return %c0_i32, %c0_i32_0, %c0_i32_1 : i32, i32, i32
  }
  func.func @transform_11(%arg0: i32) -> (i32, i32) {
    %c0_i32 = arith.constant 0 : i32
    %c0_i32_0 = arith.constant 0 : i32
    %c0_i32_1 = arith.constant 0 : i32
    return %c0_i32, %c0_i32_0 : i32, i32
  }
  func.func @transform_12(%arg0: i32) -> (i32, i32, i32) {
    %c0_i32 = arith.constant 0 : i32
    %c0_i32_0 = arith.constant 0 : i32
    %c0_i32_1 = arith.constant 0 : i32
    %c0_i32_2 = arith.constant 0 : i32
    return %c0_i32, %c0_i32_0, %c0_i32_1 : i32, i32, i32
  }
  func.func @transform_13(%arg0: i32) -> (i32, i32) {
    %c0_i32 = arith.constant 0 : i32
    %c0_i32_0 = arith.constant 0 : i32
    %c0_i32_1 = arith.constant 0 : i32
    return %c0_i32, %c0_i32_0 : i32, i32
  }
  func.func @transform_14(%arg0: i32) -> (i32, i32, i32) {
    %c0_i32 = arith.constant 0 : i32
    %c0_i32_0 = arith.constant 0 : i32
    %c0_i32_1 = arith.constant 0 : i32
    %c0_i32_2 = arith.constant 0 : i32
    return %c0_i32, %c0_i32_0, %c0_i32_1 : i32, i32, i32
  }
  func.func @transform_15(%arg0: i32) -> (i32, i32) {
    %c0_i32 = arith.constant 0 : i32
    %c0_i32_0 = arith.constant 0 : i32
    %c0_i32_1 = arith.constant 0 : i32
    return %c0_i32, %c0_i32_0 : i32, i32
  }
  func.func @transform_16(%arg0: i32) -> (i32, i32, i32) {
    %c0_i32 = arith.constant 0 : i32
    %c0_i32_0 = arith.constant 0 : i32
    %c0_i32_1 = arith.constant 0 : i32
    %c0_i32_2 = arith.constant 0 : i32
    return %c0_i32, %c0_i32_0, %c0_i32_1 : i32, i32, i32
  }
  func.func @transform_17(%arg0: i32) -> (i32, i32, i32) {
    %c0_i32 = arith.constant 0 : i32
    %c0_i32_0 = arith.constant 0 : i32
    %c0_i32_1 = arith.constant 0 : i32
    %c0_i32_2 = arith.constant 0 : i32
    return %c0_i32, %c0_i32_0, %c0_i32_1 : i32, i32, i32
  }
  func.func @transform_18(%arg0: i32) -> (i32, i32) {
    %c0_i32 = arith.constant 0 : i32
    %c0_i32_0 = arith.constant 0 : i32
    %c0_i32_1 = arith.constant 0 : i32
    return %c0_i32, %c0_i32_0 : i32, i32
  }
  func.func @transform_19(%arg0: i32) -> (i32, i32, i32) {
    %c0_i32 = arith.constant 0 : i32
    %c0_i32_0 = arith.constant 0 : i32
    %c0_i32_1 = arith.constant 0 : i32
    %c0_i32_2 = arith.constant 0 : i32
    return %c0_i32, %c0_i32_0, %c0_i32_1 : i32, i32, i32
  }
  func.func @transform_20(%arg0: i32) -> (i32, i32, i32) {
    %c0_i32 = arith.constant 0 : i32
    %c0_i32_0 = arith.constant 0 : i32
    %c0_i32_1 = arith.constant 0 : i32
    %c0_i32_2 = arith.constant 0 : i32
    return %c0_i32, %c0_i32_0, %c0_i32_1 : i32, i32, i32
  }
  func.func @transform_21(%arg0: i32) -> (i32, i32) {
    %c0_i32 = arith.constant 0 : i32
    %c0_i32_0 = arith.constant 0 : i32
    %c0_i32_1 = arith.constant 0 : i32
    return %c0_i32, %c0_i32_0 : i32, i32
  }
  func.func @transform_22(%arg0: i32) -> (i32, i32, i32) {
    %c0_i32 = arith.constant 0 : i32
    %c0_i32_0 = arith.constant 0 : i32
    %c0_i32_1 = arith.constant 0 : i32
    %c0_i32_2 = arith.constant 0 : i32
    return %c0_i32, %c0_i32_0, %c0_i32_1 : i32, i32, i32
  }
  func.func @transform_23(%arg0: i32) -> (i32, i32, i32) {
    %c0_i32 = arith.constant 0 : i32
    %c0_i32_0 = arith.constant 0 : i32
    %c0_i32_1 = arith.constant 0 : i32
    %c0_i32_2 = arith.constant 0 : i32
    return %c0_i32, %c0_i32_0, %c0_i32_1 : i32, i32, i32
  }
  func.func @transform_24(%arg0: i32) -> (i32, i32) {
    %c0_i32 = arith.constant 0 : i32
    %c0_i32_0 = arith.constant 0 : i32
    %c0_i32_1 = arith.constant 0 : i32
    return %c0_i32, %c0_i32_0 : i32, i32
  }
  func.func @transform_25(%arg0: i32) -> (i32, i32, i32) {
    %c0_i32 = arith.constant 0 : i32
    %c0_i32_0 = arith.constant 0 : i32
    %c0_i32_1 = arith.constant 0 : i32
    %c0_i32_2 = arith.constant 0 : i32
    return %c0_i32, %c0_i32_0, %c0_i32_1 : i32, i32, i32
  }
  func.func @transform_26(%arg0: i32) -> (i32, i32) {
    %c0_i32 = arith.constant 0 : i32
    %c0_i32_0 = arith.constant 0 : i32
    %c0_i32_1 = arith.constant 0 : i32
    return %c0_i32, %c0_i32_0 : i32, i32
  }
  func.func @transform_27(%arg0: i32) -> (i32, i32, i32) {
    %c0_i32 = arith.constant 0 : i32
    %c0_i32_0 = arith.constant 0 : i32
    %c0_i32_1 = arith.constant 0 : i32
    return %arg0, %c0_i32, %c0_i32_0 : i32, i32, i32
  }
}

</mosaic_0001>

<bundles_post_ra>
// kernel: tpu_custom_call.1
= control target key start
LH: loop header
LB: loop body
LE: loop exit
PB: predicated region body
PF: predicated region fallthrough
CT: control target
= control target key end

     0   :  { %s16292_s0 = inlined_call_operand.vmem [shape: f32[2,16,8], index: 0, kind: input, shape index: {}]   ;;  %s16293_s1 = inlined_call_operand.vmem [shape: f32[2,16,8], index: 1, kind: input, shape index: {}]   ;;  %s16294_s2 = inlined_call_operand.vmem [shape: f32[2,16,8], index: 2, kind: input, shape index: {}]   ;;  %s16295_s3 = inlined_call_operand.vmem [shape: f32[2,16,8], index: 3, kind: input, shape index: {}]   ;;  %s16296_s4 = inlined_call_operand.vmem [shape: f32[8,8,8], index: 4, kind: input, shape index: {}]   ;;  %s16297_s5 = inlined_call_operand.vmem [shape: f32[8,1], index: 5, kind: input, shape index: {}]   ;;  %s16298_s6 = inlined_call_operand.vmem [shape: f32[8,8,8], index: 6, kind: input, shape index: {}]   ;;  %s16299_s7 = inlined_call_operand.vmem [shape: f32[8,1], index: 7, kind: input, shape index: {}]   ;;  %s16300_s8 = inlined_call_operand.vmem [shape: f32[9,6,8], index: 8, kind: input, shape index: {}]   ;;  %s16301_s9 = inlined_call_operand.vmem [shape: f32[6,1], index: 9, kind: input, shape index: {}]   ;;  %s16302_s10 = inlined_call_operand.vmem [shape: f32[9,6,8], index: 10, kind: input, shape index: {}]   ;;  %s16303_s11 = inlined_call_operand.vmem [shape: f32[6,1], index: 11, kind: input, shape index: {}]   ;;  %s16304_s12 = inlined_call_operand.vmem [shape: f32[8,4,6], index: 12, kind: input, shape index: {}]   ;;  %s16305_s13 = inlined_call_operand.vmem [shape: f32[4,1], index: 13, kind: input, shape index: {}]   ;;  %s16306_s14 = inlined_call_operand.vmem [shape: f32[8,4,6], index: 14, kind: input, shape index: {}]   ;;  %s16307_s15 = inlined_call_operand.vmem [shape: f32[4,1], index: 15, kind: input, shape index: {}]   ;;  %s16308_s16 = inlined_call_operand.vmem [shape: f32[9,8,8], index: 16, kind: input, shape index: {}]   ;;  %s16309_s17 = inlined_call_operand.vmem [shape: f32[9,8,8], index: 17, kind: input, shape index: {}]   ;;  %s16310_s18 = inlined_call_operand.vmem [shape: f32[8,1], index: 18, kind: input, shape index: {}]   ;;  %s16311_s19 = inlined_call_operand.vmem [shape: f32[9,6,6], index: 19, kind: input, shape index: {}]   ;;  %s16312_s20 = inlined_call_operand.vmem [shape: f32[9,6,6], index: 20, kind: input, shape index: {}]   ;;  %s16313_s21 = inlined_call_operand.vmem [shape: f32[6,1], index: 21, kind: input, shape index: {}]   ;;  %s16314_s22 = inlined_call_operand.vmem [shape: f32[9,4,4], index: 22, kind: input, shape index: {}]   ;;  %s16315_s23 = inlined_call_operand.vmem [shape: f32[9,4,4], index: 23, kind: input, shape index: {}]   ;;  %s16316_s24 = inlined_call_operand.vmem [shape: f32[4,1], index: 24, kind: input, shape index: {}]   ;;  %s16317_s25 = inlined_call_operand.vmem [shape: f32[9,4,4], index: 25, kind: input, shape index: {}]   ;;  %s16318_s26 = inlined_call_operand.vmem [shape: f32[4,1], index: 26, kind: input, shape index: {}]   ;;  %s16319_s27 = inlined_call_operand.hbm [shape: f32[2,4,192], index: 27, kind: output, shape index: {}]  }
   0x1   :  { %16375 = sst [smem:[#allocation14_spill]] %s16292_s0 }
   0x2   :  { %16376 = sst [smem:[#allocation15_spill]] %s16293_s1 }
   0x3   :  { %16377 = sst [smem:[#allocation16_spill]] %s16294_s2 }
   0x4   :  { %16378 = sst [smem:[#allocation17_spill]] %s16295_s3 }
   0x5   :  { %16379 = sst [smem:[#allocation18_spill]] %s16296_s4 }
   0x6   :  { %16380 = sst [smem:[#allocation19_spill]] %s16297_s5 }
   0x7   :  { %16381 = sst [smem:[#allocation20_spill]] %s16298_s6 }
   0x8   :  { %16382 = sst [smem:[#allocation21_spill]] %s16299_s7 }
   0x9   :  { %16383 = sst [smem:[#allocation22_spill]] %s16300_s8 }
   0xa   :  { %16384 = sst [smem:[#allocation23_spill]] %s16301_s9 }
   0xb   :  { %16385 = sst [smem:[#allocation24_spill]] %s16302_s10 }
   0xc   :  { %16386 = sst [smem:[#allocation25_spill]] %s16303_s11 }
   0xd   :  { %16387 = sst [smem:[#allocation26_spill]] %s16308_s16 }
   0xe   :  { %16388 = sst [smem:[#allocation27_spill]] %s16309_s17 }
   0xf   :  { %16389 = sst [smem:[#allocation28_spill]] %s16310_s18 }
  0x10   :  { %16390 = sst [smem:[#allocation29_spill]] %s16317_s25 }
  0x11   :  { %16391 = sst [smem:[#allocation30_spill]] %s16319_s27 }
  0x12   :  { %32 = vsyncpa [#allocation3], 0 }
  0x13   :  { %34 = vsyncpa [#allocation3 + $0x1], 0  ;;  %s14606_s7 = smov 0   ;;  %s14608_s4 = smov 0  }
  0x14   :  { %s14610_s8 = smov 0   ;;  %s14612_s30 = smov 0  }
  0x15 LB: > { %16392 = sst [smem:[#allocation5_spill]] %s14437_s7  ;;  %s14627_s9 = sadd.s32 4294967295, %s14449_s30   ;;  %s14449_s30 = sphi %s14612_s30, %s16579_s30   ;;  %s14445_s8 = sphi %s14610_s8, %s16582_s8   ;;  %s14441_s4 = sphi %s14608_s4, %s16581_s4   ;;  %s14437_s7 = sphi %s14606_s7, %s16580_s7  }
  0x16   : > { %16393 = sst [smem:[#allocation6_spill]] %s14441_s4  ;;  %s13033_s5 = sadd.s32 4294967294, %s14449_s30  }
  0x17   : > { %16394 = sst [smem:[#allocation7_spill]] %s14445_s8  ;;  %s14631_s28 = sadd.s32 1, %s14449_s30  }
  0x18   : > { %16395 = sst [smem:[#allocation8_spill]] %s14449_s30  ;;  %s634_s0 = sadd.s32 1, %s14445_s8 }
  0x19   : > { %16396 = sst [smem:[#allocation9_spill]] %s14627_s9  ;;  %s631_s10 = ssub.s32 %s14449_s30, %s14631_s28 }
  0x1a   : > { %16397 = sst [smem:[#allocation10_spill]] %s14631_s28  ;;  %p644_p0 = scmp.ne.s32.totalorder %s14445_s8, %s14441_s4 }
  0x1b   : > { %p632_p1 = scmp.eq.s32.totalorder %s631_s10, 0  ;;  %p645_p2 = scmp.eq.s32.totalorder %s14627_s9, 1 }
  0x1c   : > { %p650_p3 = scmp.ne.s32.totalorder %s14441_s4, %s14437_s7  ;;  %p651_p4 = scmp.eq.s32.totalorder %s13033_s5, 1 }
  0x1d   : > { %s14642_s29 = scalar_select %p632_p1, %s14445_s8, %s634_s0  }
  0x1e   : > { %p14644_p5 = por %p645_p2, %p644_p0  ;;  %p14648_p6 = por %p651_p4, %p650_p3 }
  0x1f   : > { %16398 = sst [smem:[#allocation11_spill]] %s14642_s29  ;;  %p13036_p7 = scmp.ge.s32.totalorder %s14449_s30, 1 }
  0x20   : > { %s16399_s1 = scalar_select %p14644_p5, 1, 0 }
  0x21   : > { %s16401_s6 = scalar_select %p14648_p6, 1, 0 }
  0x22   : > { %16400 = sst [smem:[#allocation12_spill]] %s16399_s1  ;;  %p770_p8 = scmp.lt.s32.totalorder %s14449_s30, 3 }
  0x23   : > { %16402 = sst [smem:[#allocation13_spill]] %s16401_s6 }
  0x24   : > { %p771_p9 = pnand %p13036_p7, %p770_p8 }
  0x25   : > { %p857_p10 = scmp.lt.s32.totalorder (!%p771_p9), %s14627_s9, 1  ;;  %v1021_v0 = vlaneseq (!%p771_p9)  ;;  %v14451_v1 = vmov (!%p771_p9), 0.0|0.0   ;;  %v14452_v2 = vmov (!%p771_p9), 0.0   ;;  %vm16362_vm0 = vmmov (!%p771_p9), 0   ;;  %s16403_s0 = sld [smem:[#allocation16_spill]] (!%p771_p9) }
  0x26   : > { %774 = sbr.rel (%p771_p9) target bundleno = 6551 (0x1997), region = 128  ;;  %14158 = vmatprep.subr.bf16.mxu1 (!%p771_p9), %v14451_v1  ;;  %13659 = vmatprep.subr.mxu0 (!%p771_p9), %v14452_v2  ;;  %v14454_v13 = vmov (!%p771_p9), 1.0|1.0   ;;  %vm16361_vm4 = vcmask (!%p771_p9), 130048   ;;  %s16330_s3 = smov (!%p771_p9), 122   ;;  %vm16358_vm5 = vcmask (!%p771_p9), 64512  }
  0x27   : > { %v14658_v3 = vshrl.u32 (!%p771_p9), %v1021_v0, 7  ;;  %13626 = vmatprep.mubr.msk.f32.mxu1 (!%p771_p9), %vm16362_vm0, %v14452_v2  ;;  %13661 = vmatprep.mubr.msk.f32.mxu0 (!%p771_p9), %vm16362_vm0, %v14452_v2  ;;  %v14669_v5 = vand.u32 (!%p771_p9), 127, %v1021_v0  ;;  %s16332_s5 = smov (!%p771_p9), 126   ;;  %s16337_s29 = smov (!%p771_p9), 121   ;;  %v14462_v35 = vmov (!%p771_p9), 0   ;;  %vm16356_vm6 = vcmask (!%p771_p9), 31744  }
  0x28   : > { %s16406_s6 = sld [smem:[#allocation17_spill]] (!%p771_p9)  ;;  %s16408_s7 = sld [smem:[#allocation20_spill]] (!%p771_p9)  ;;  %vm2445_vm7 = vcmask (!%p771_p9), 293888   ;;  %vm16357_vm14 = vcmask (!%p771_p9), 261120   ;;  %vm6104_vm15 = vcmask (!%p771_p9), 818176  }
  0x29   : > { %v14667_v4 = vadd.s32 (!%p771_p9), 8, %v14658_v3  ;;  %v1026_v6 = vmul.u32 (!%p771_p9), 2, %v14658_v3  ;;  %s16413_s8 = sld [smem:[#allocation21_spill]] (!%p771_p9)  ;;  %s16416_s30 = smov (!%p771_p9), 122  }
  0x2a   : > { %s16348_s27 = smov (!%p771_p9), 4   ;;  %s16418_s16 = sld [smem:[#allocation26_spill]] (!%p771_p9) }
  0x2b   : > { %v1027_v8 = vmul.u32 (!%p771_p9), 2, %v14667_v4  ;;  %v14677_v9 = vadd.s32 (!%p771_p9), 4, %v1026_v6  ;;  %s16420_s18 = sld [smem:[#allocation28_spill]] (!%p771_p9)  ;;  %s16421_s17 = sld [smem:[#allocation27_spill]] (!%p771_p9) }
  0x2c   : > { %s16574_s4 = sld [smem:[#allocation30_spill]] (!%p771_p9) }
  0x2d   : > { %s858_s11 = scalar_select %p857_p10, %s14627_s9, 1  ;;  %v14679_v11 = vadd.s32 4, %v1027_v8  ;;  %vm1030_vm1 = vcmp.eq.s32.totalorder %v14669_v5, %v14677_v9 }
  0x2e   : > { %s16409_s28 = smov %s16408_s7  ;;  %v1730_v47 = vld [vmem:[%s16408_s7] sm:$0xff]  ;;  %s16414_s7 = smov 125  }
  0x2f   : > { %s14664_s2 = sshll.u32 %s858_s11, 4  ;;  %vm1031_vm2 = vcmp.eq.s32.totalorder %v14669_v5, %v14679_v11  ;;  %s16328_s11 = smov 127   ;;  %v2423_v49 = vld [vmem:[%s16413_s8] sm:$0xff]  ;;  %v1731_v0 = vld [vmem:[%s16409_s28 + $0x8] sm:$0xff] }
  0x30   : > { %s871_s10 = scalar_lea.vmem %s16403_s0, %s14664_s2  ;;  %vm14685_vm3 = vmpackc.low %vm1031_vm2, %vm1030_vm1  ;;  %s16335_s0 = smov 124   ;;  %vm16360_vm1 = vcmask 1045504   ;;  %vm16359_vm2 = vcmask 48128  }
  0x31   : > { %v945_v7 = vld [vmem:[%s871_s10] sm:$0xff]  ;;  %v946_v10 = vld [vmem:[%s871_s10 + $0x8] sm:$0xff]  ;;  %14160 = vmatpush3.bf16.msk.msra.mxu1 %vm14685_vm3, %v14454_v13  ;;  %s16341_s10 = smov 123   ;;  %s16417_s9 = sld [smem:[#allocation19_spill]] }
  0x32   : > { %947 = vxpose.xlu0.b32.start [1/2] (short) (narrow) %v945_v7, 8  ;;  %13629 = vmatprep.subr.mxu1 %v14452_v2  ;;  %v1732_v7 = vld [vmem:[%s16409_s28 + $0x10] sm:$0xff]  ;;  %s16419_s8 = smov 123   ;;  %s16575_s25 = smov %s16574_s4 }
  0x36   : > { %948 = vxpose.xlu0.b32.end [2/2] (short) (narrow) %v946_v10, 8  ;;  %v1733_v10 = vld [vmem:[%s16409_s28 + $0x18] sm:$0xff] }
  0x37   : > { %v1723_v50 = vld [vmem:[%s16417_s9] sm:$0xff] }
  0x5f   : > { %14367 = vset.pattern.permute.xlu0 %v14462_v35 }
  0xb2   : > { %v963_v14 = vpop.trf.xlu0 }
  0xb3   : > { %13627 = vmatmul.mubr.msk.f32.vlgmr.msra.gmra.mrb[0].mxu1 %vm16361_vm4, %v963_v14 }
  0xb4   : > { %13631 = vmatprep.mubr.msk.f32.mxu1 %vm16362_vm0, %v14452_v2 }
 0x186   : > { %v1106_v15 = vpop.f32.mrb[0].mxu1 }
 0x187   : > { %1111 = vrot.lane.b32.xlu0 %v1106_v15, %s16328_s11  ;;  %1569 = vrot.lane.b32.xlu1 %v1106_v15, %s16330_s3  ;;  %v13628_v16 = vpop.f32.mrb[1].mxu1  ;;  %s876_s11 = scalar_lea.vmem %s16406_s6, %s14664_s2  ;;  %s16339_s3 = smov 125  }
 0x188   : > { %v979_v17 = vld [vmem:[%s876_s11] sm:$0xff]  ;;  %v980_v18 = vld [vmem:[%s876_s11 + $0x8] sm:$0xff]  ;;  %s16411_s6 = smov 121   ;;  %s16412_s11 = smov 126  }
 0x189   : > { %v1734_v16 = vld [vmem:[%s16409_s28 + $0x20] sm:$0xff] }
 0x18b   : > { %1261 = vrot.lane.b32.xlu0 %v1106_v15, %s16332_s5  ;;  %s16427_s5 = sld [smem:[#allocation15_spill]] }
 0x18f   : > { %1415 = vrot.lane.b32.xlu0 %v1106_v15, %s16335_s0  ;;  %s16407_s0 = sld [smem:[#allocation18_spill]] }
 0x193   : > { %1492 = vrot.lane.b32.xlu0 %v1106_v15, %s16341_s10 }
 0x195   : > { %v14710_v19 = vld [vmem:[%s16407_s0 + $0x8] sm:$0xff]  ;;  %v1019_v22 = vld [vmem:[%s16407_s0 + $0x30] sm:$0xff]  ;;  %v14723_v23 = vld [vmem:[%s16407_s0] sm:$0xff] }
 0x196   : > { %v14740_v25 = vld [vmem:[%s16407_s0 + $0x10] sm:$0xff]  ;;  %v14754_v28 = vld [vmem:[%s16407_s0 + $0x18] sm:$0xff]  ;;  %v14764_v30 = vld [vmem:[%s16407_s0 + $0x20] sm:$0xff] }
 0x197   : > { %1646 = vrot.lane.b32.xlu0 %v1106_v15, %s16337_s29  ;;  %v14774_v32 = vld [vmem:[%s16407_s0 + $0x28] sm:$0xff]  ;;  %v14784_v34 = vld [vmem:[%s16407_s0 + $0x38] sm:$0xff]  ;;  %s16410_s29 = smov 127  }
 0x1b0   : > { %981 = vxpose.xlu1.b32.start [1/2] (short) (narrow) %v979_v17, 8  ;;  %v1735_v17 = vld [vmem:[%s16409_s28 + $0x28] sm:$0xff] }
 0x1b4   : > { %982 = vxpose.xlu1.b32.end [2/2] (short) (narrow) %v980_v18, 8 }
 0x1d2   : > { %1338 = vrot.lane.b32.xlu1 %v1106_v15, %s16339_s3  ;;  %s16350_s3 = smov 120  }
 0x1d3   : > { %14368 = vset.pattern.permute.xlu1 %v14462_v35 }
 0x1f9   : > { %v1112_v20 = vpop.permute.xlu0 %1111  ;;  %v1570_v21 = vpop.permute.xlu1 %1569 }
 0x1fa   : > { %13630 = vmatpush3.msra.mxu1 %v1112_v20  ;;  %13660 = vmatpush3.msra.mxu0 %v1570_v21  ;;  %v1736_v21 = vld [vmem:[%s16409_s28 + $0x30] sm:$0xff] }
 0x1fb   : > { %13632 = vmatmul.mubr.msk.f32.vlgmr.msra.gmra.mrb[2].mxu1 %vm16358_vm5, %v14710_v19  ;;  %13634 = vmatprep.subr.mxu1 %v14452_v2 }
 0x1fc   : > { %13635 = vmatpush3.msra.mxu1 %v1106_v15  ;;  %13636 = vmatprep.mubr.msk.f32.mxu1 %vm16362_vm0, %v14452_v2 }
 0x1fd   : > { %v1262_v24 = vpop.permute.xlu0 %1261  ;;  %13639 = vmatprep.subr.mxu1 %v14452_v2  ;;  %13662 = vmatmul.mubr.msk.f32.vlgmr.msra.gmra.mrb[0].mxu0 %vm16358_vm5, %v1019_v22  ;;  %v1737_v22 = vld [vmem:[%s16409_s28 + $0x38] sm:$0xff] }
 0x1fe   : > { %14161 = vmatprep.subr.bf16.mxu0 %v14451_v1  ;;  %13673 = vmatprep.mubr.msk.f32.mxu0 %vm16362_vm0, %v14452_v2 }
 0x1ff   : > { %13637 = vmatmul.mubr.msk.f32.vlgmr.msra.gmra.mrb[4].mxu1 %vm16358_vm5, %v14723_v23  ;;  %14163 = vmatpush3.bf16.msk.msra.mxu0 %vm14685_vm3, %v14454_v13 }
 0x200   : > { %13640 = vmatpush3.msra.mxu1 %v1262_v24  ;;  %13641 = vmatprep.mubr.msk.f32.mxu1 %vm16362_vm0, %v14452_v2 }
 0x201   : > { %13644 = vmatprep.subr.mxu1 %v14452_v2  ;;  %13681 = vmatprep.subr.mxu0 %v14452_v2  ;;  %v1416_v27 = vpop.permute.xlu0 %1415 }
 0x203   : > { %13642 = vmatmul.mubr.msk.f32.vlgmr.msra.gmra.mrb[6].mxu1 %vm16358_vm5, %v14740_v25 }
 0x204   : > { %13646 = vmatprep.mubr.msk.f32.mxu1 %vm16362_vm0, %v14452_v2 }
 0x205   : > { %v1493_v31 = vpop.permute.xlu0 %1492 }
 0x209   : > { %v1647_v33 = vpop.permute.xlu0 %1646 }
 0x230   : > { %v997_v26 = vpop.trf.xlu1 }
 0x231   : > { %13674 = vmatmul.mubr.msk.f32.vlgmr.msra.gmra.mrb[2].mxu0 %vm16361_vm4, %v997_v26 }
 0x232   : > { %13683 = vmatprep.mubr.msk.f32.mxu0 %vm16362_vm0, %v14452_v2 }
 0x244   : > { %v1339_v29 = vpop.permute.xlu1 %1338 }
 0x245   : > { %13645 = vmatpush3.msra.mxu1 %v1339_v29 }
 0x246   : > { %13647 = vmatmul.mubr.msk.f32.vlgmr.msra.gmra.mrb[8].mxu1 %vm16358_vm5, %v14754_v28  ;;  %13649 = vmatprep.subr.mxu1 %v14452_v2 }
 0x247   : > { %13650 = vmatpush3.msra.mxu1 %v1416_v27  ;;  %13651 = vmatprep.mubr.msk.f32.mxu1 %vm16362_vm0, %v14452_v2 }
 0x248   : > { %13654 = vmatprep.subr.mxu1 %v14452_v2 }
 0x24a   : > { %13652 = vmatmul.mubr.msk.f32.vlgmr.msra.gmra.mrb[10].mxu1 %vm16358_vm5, %v14764_v30 }
 0x24b   : > { %13655 = vmatpush3.msra.mxu1 %v1493_v31  ;;  %13656 = vmatprep.mubr.msk.f32.mxu1 %vm16362_vm0, %v14452_v2 }
 0x24c   : > { %13664 = vmatprep.subr.mxu1 %v14452_v2 }
 0x24e   : > { %13657 = vmatmul.mubr.msk.f32.vlgmr.msra.gmra.mrb[12].mxu1 %vm16358_vm5, %v14774_v32 }
 0x24f   : > { %13665 = vmatpush3.msra.mxu1 %v1647_v33  ;;  %13666 = vmatprep.mubr.msk.f32.mxu1 %vm16362_vm0, %v14452_v2 }
 0x250   : > { %13676 = vmatprep.subr.mxu1 %v14452_v2 }
 0x252   : > { %13667 = vmatmul.mubr.msk.f32.vlgmr.msra.gmra.mrb[14].mxu1 %vm16358_vm5, %v14784_v34 }
 0x253   : > { %13678 = vmatprep.mubr.msk.f32.mxu1 %vm16362_vm0, %v14452_v2 }
 0x2ce   : > { %v1184_v36 = vpop.f32.mrb[2].mxu1 }
 0x2cf   : > { %v13633_v37 = vpop.f32.mrb[3].mxu1 }
 0x2d0   : > { %v1641_v38 = vpop.f32.mrb[0].mxu0  ;;  %v2430_v37 = vld [vmem:[%s16418_s16] sm:$0xff] }
 0x2d1   : > { %v13663_v39 = vpop.f32.mrb[1].mxu0 }
 0x2d2   : > { %v1257_v40 = vpop.f32.mrb[4].mxu1 }
 0x2d3   : > { %v1258_v41 = vadd.f32 %v1257_v40, %v1184_v36  ;;  %v13638_v42 = vpop.f32.mrb[5].mxu1 }
 0x2d6   : > { %v1333_v43 = vpop.f32.mrb[6].mxu1 }
 0x2d7   : > { %v1337_v44 = vadd.f32 %v1333_v43, %v1258_v41  ;;  %v13643_v45 = vpop.f32.mrb[7].mxu1 }
 0x304   : > { %v1807_v46 = vpop.f32.mrb[2].mxu0 }
 0x305   : > { %2192 = vrot.lane.b32.xlu1 %v1807_v46, %s16341_s10  ;;  %1812 = vrot.lane.b32.xlu0 %v1807_v46, %s16410_s29  ;;  %v13675_v48 = vpop.f32.mrb[3].mxu0  ;;  %s16415_s10 = smov 124  }
 0x306   : > { %13682 = vmatpush3.msra.mxu0 %v1807_v46 }
 0x307   : > { %13684 = vmatmul.mubr.msk.f32.vlgmr.msra.gmra.mrb[4].mxu0 %vm16358_vm5, %v1730_v47  ;;  %13691 = vmatprep.subr.mxu0 %v14452_v2 }
 0x308   : > { %13693 = vmatprep.mubr.msk.f32.mxu0 %vm16362_vm0, %v14452_v2 }
 0x309   : > { %2346 = vrot.lane.b32.xlu1 %v1807_v46, %s16411_s6  ;;  %1961 = vrot.lane.b32.xlu0 %v1807_v46, %s16412_s11 }
 0x30d   : > { %2038 = vrot.lane.b32.xlu0 %v1807_v46, %s16414_s7  ;;  %2426 = vperm.xlu1 %14368, %v2423_v49  }
 0x311   : > { %2115 = vrot.lane.b32.xlu0 %v1807_v46, %s16415_s10 }
 0x315   : > { %2269 = vrot.lane.b32.xlu0 %v1807_v46, %s16416_s30 }
 0x319   : > { %1726 = vperm.xlu0 %14367, %v1723_v50   ;;  %v1410_v51 = vpop.f32.mrb[8].mxu1 }
 0x31a   : > { %v1414_v52 = vadd.f32 %v1410_v51, %v1337_v44  ;;  %v13648_v53 = vpop.f32.mrb[9].mxu1 }
 0x31d   : > { %v1487_v54 = vpop.f32.mrb[10].mxu1 }
 0x31e   : > { %v1491_v55 = vadd.f32 %v1487_v54, %v1414_v52  ;;  %v13653_v56 = vpop.f32.mrb[11].mxu1 }
 0x321   : > { %v1564_v57 = vpop.f32.mrb[12].mxu1 }
 0x322   : > { %v1568_v58 = vadd.f32 %v1564_v57, %v1491_v55  ;;  %v13658_v59 = vpop.f32.mrb[13].mxu1 }
 0x324   : > { %v1645_v60 = vadd.f32 %v1641_v38, %v1568_v58 }
 0x325   : > { %v1718_v61 = vpop.f32.mrb[14].mxu1 }
 0x326   : > { %v1722_v62 = vadd.f32 %v1718_v61, %v1645_v60  ;;  %v13668_v63 = vpop.f32.mrb[15].mxu1  ;;  %v2431_v61 = vld [vmem:[%s16418_s16 + $0x8] sm:$0xff] }
 0x327   : > { %v2433_v63 = vld [vmem:[%s16418_s16 + $0x18] sm:$0xff] }
 0x377   : > { %v1813_v6 = vpop.permute.xlu0 %1812  ;;  %v2193_v14 = vpop.permute.xlu1 %2192 }
 0x378   : > { %13677 = vmatpush3.msra.mxu1 %v1813_v6  ;;  %v2435_v6 = vld [vmem:[%s16418_s16 + $0x28] sm:$0xff] }
 0x379   : > { %13679 = vmatmul.mubr.msk.f32.vlgmr.msra.gmra.mrb[16].mxu1 %vm16358_vm5, %v1731_v0  ;;  %13686 = vmatprep.subr.mxu1 %v14452_v2 }
 0x37a   : > { %13688 = vmatprep.mubr.msk.f32.mxu1 %vm16362_vm0, %v14452_v2 }
 0x37b   : > { %v1962_v8 = vpop.permute.xlu0 %1961  ;;  %v2347_v20 = vpop.permute.xlu1 %2346 }
 0x37c   : > { %13687 = vmatpush3.msra.mxu1 %v1962_v8  ;;  %v2437_v8 = vld [vmem:[%s16418_s16 + $0x38] sm:$0xff] }
 0x37d   : > { %13689 = vmatmul.mubr.msk.f32.vlgmr.msra.gmra.mrb[18].mxu1 %vm16358_vm5, %v1732_v7  ;;  %13696 = vmatprep.subr.mxu1 %v14452_v2 }
 0x37e   : > { %13698 = vmatprep.mubr.msk.f32.mxu1 %vm16362_vm0, %v14452_v2 }
 0x37f   : > { %v2039_v15 = vpop.permute.xlu0 %2038 }
 0x380   : > { %13692 = vmatpush3.msra.mxu0 %v2039_v15 }
 0x381   : > { %13694 = vmatmul.mubr.msk.f32.vlgmr.msra.gmra.mrb[6].mxu0 %vm16358_vm5, %v1733_v10  ;;  %13701 = vmatprep.subr.mxu0 %v14452_v2 }
 0x382   : > { %13702 = vmatpush3.msra.mxu0 %v2193_v14  ;;  %13703 = vmatprep.mubr.msk.f32.mxu0 %vm16362_vm0, %v14452_v2 }
 0x383   : > { %v2116_v18 = vpop.permute.xlu0 %2115  ;;  %13711 = vmatprep.subr.mxu0 %v14452_v2 }
 0x384   : > { %13697 = vmatpush3.msra.mxu1 %v2116_v18 }
 0x385   : > { %13699 = vmatmul.mubr.msk.f32.vlgmr.msra.gmra.mrb[20].mxu1 %vm16358_vm5, %v1734_v16  ;;  %13704 = vmatmul.mubr.msk.f32.vlgmr.msra.gmra.mrb[8].mxu0 %vm16358_vm5, %v1735_v17  ;;  %v2432_v17 = vld [vmem:[%s16418_s16 + $0x10] sm:$0xff] }
 0x386   : > { %13712 = vmatpush3.msra.mxu0 %v2347_v20  ;;  %13706 = vmatprep.subr.mxu1 %v14452_v2  ;;  %v2434_v20 = vld [vmem:[%s16418_s16 + $0x20] sm:$0xff] }
 0x387   : > { %v2270_v24 = vpop.permute.xlu0 %2269  ;;  %13708 = vmatprep.mubr.msk.f32.mxu1 %vm16362_vm0, %v14452_v2  ;;  %13713 = vmatprep.mubr.msk.f32.mxu0 %vm16362_vm0, %v14452_v2 }
 0x388   : > { %13707 = vmatpush3.msra.mxu1 %v2270_v24  ;;  %13721 = vmatprep.subr.mxu0 %v14452_v2 }
 0x389   : > { %13709 = vmatmul.mubr.msk.f32.vlgmr.msra.gmra.mrb[22].mxu1 %vm16358_vm5, %v1736_v21  ;;  %13714 = vmatmul.mubr.msk.f32.vlgmr.msra.gmra.mrb[10].mxu0 %vm16358_vm5, %v1737_v22  ;;  %v2436_v22 = vld [vmem:[%s16418_s16 + $0x30] sm:$0xff] }
 0x38a   : > { %13716 = vmatprep.subr.mxu1 %v14452_v2  ;;  %13723 = vmatprep.mubr.msk.f32.mxu0 %vm16362_vm0, %v14452_v2 }
 0x38b   : > { %13718 = vmatprep.mubr.msk.f32.mxu1 %vm16362_vm0, %v14452_v2 }
 0x38c   : > { %v2427_v33 = vpop.permute.xlu1 %2426 }
 0x398   : > { %v14860_v26 = vpop.permute.xlu0 %1726 }
 0x399   : > { %v1729_v27 = vadd.f32 %v14860_v26, %v1722_v62 }
 0x39b   : > { %2440 = vrot.lane.b32.xlu1 %v1729_v27, %s16348_s27  ;;  %v2438_v27 = vld [vmem:[%s16418_s16 + $0x40] sm:$0xff]  ;;  %s16426_s16 = smov 120  }
 0x3da   : > { %v1957_v29 = vpop.f32.mrb[4].mxu0 }
 0x3db   : > { %v13685_v31 = vpop.f32.mrb[5].mxu0 }
 0x3dc   : > { %v3841_v31 = vld [vmem:[%s16420_s18] sm:$0xff]  ;;  %s16428_s18 = sld [smem:[#allocation24_spill]] }
 0x40d   : > { %v2441_v35 = vpop.permute.xlu1 %2440 }
 0x40e   : > { %v2444_v36 = vsel %vm16356_vm6, 0.0, %v2441_v35  ;;  %v3136_v35 = vld [vmem:[%s16421_s17] sm:$0xff] }
 0x40f   : > { %v2446_v38 = vsel %vm2445_vm7, %v2444_v36, 0.0  ;;  %13722 = vmatpush3.msk.msra.mxu0 %vm2445_vm7, %v2444_v36 }
 0x410   : > { %2448 = vrot.lane.b32.xlu1 %v2446_v38, %s16410_s29  ;;  %13731 = vmatprep.subr.mxu0 %v14452_v2 }
 0x411   : > { %13724 = vmatmul.mubr.msk.f32.vlgmr.msra.gmra.mrb[12].mxu0 %vm16358_vm5, %v2430_v37  ;;  %v3137_v37 = vld [vmem:[%s16421_s17 + $0x8] sm:$0xff] }
 0x412   : > { %13733 = vmatprep.mubr.msk.f32.mxu0 %vm16362_vm0, %v14452_v2 }
 0x414   : > { %2674 = vrot.lane.b32.xlu1 %v2446_v38, %s16414_s7 }
 0x418   : > { %2828 = vrot.lane.b32.xlu1 %v2446_v38, %s16419_s8 }
 0x41c   : > { %2982 = vrot.lane.b32.xlu1 %v2446_v38, %s16411_s6 }
 0x44c   : > { %v1884_v39 = vpop.f32.mrb[16].mxu1 }
 0x44d   : > { %v13680_v40 = vpop.f32.mrb[17].mxu1  ;;  %v1958_v41 = vadd.f32 %v1957_v29, %v1884_v39 }
 0x44e   : > { %v3138_v40 = vld [vmem:[%s16421_s17 + $0x10] sm:$0xff] }
 0x450   : > { %v2033_v42 = vpop.f32.mrb[18].mxu1 }
 0x451   : > { %v2037_v43 = vadd.f32 %v2033_v42, %v1958_v41  ;;  %v13690_v44 = vpop.f32.mrb[19].mxu1  ;;  %v3139_v41 = vld [vmem:[%s16421_s17 + $0x18] sm:$0xff] }
 0x452   : > { %v3140_v44 = vld [vmem:[%s16421_s17 + $0x20] sm:$0xff] }
 0x454   : > { %v2110_v45 = vpop.f32.mrb[6].mxu0 }
 0x455   : > { %v2114_v46 = vadd.f32 %v2110_v45, %v2037_v43  ;;  %v13695_v47 = vpop.f32.mrb[7].mxu0  ;;  %v3141_v45 = vld [vmem:[%s16421_s17 + $0x28] sm:$0xff] }
 0x458   : > { %v2187_v48 = vpop.f32.mrb[20].mxu1  ;;  %v2264_v49 = vpop.f32.mrb[8].mxu0 }
 0x459   : > { %v2191_v50 = vadd.f32 %v2187_v48, %v2114_v46  ;;  %v13700_v51 = vpop.f32.mrb[21].mxu1  ;;  %v13705_v52 = vpop.f32.mrb[9].mxu0  ;;  %v3142_v48 = vld [vmem:[%s16421_s17 + $0x30] sm:$0xff] }
 0x45b   : > { %v2268_v53 = vadd.f32 %v2264_v49, %v2191_v50  ;;  %v3143_v49 = vld [vmem:[%s16421_s17 + $0x38] sm:$0xff] }
 0x45c   : > { %v2341_v54 = vpop.f32.mrb[22].mxu1  ;;  %v2418_v55 = vpop.f32.mrb[10].mxu0 }
 0x45d   : > { %v2345_v56 = vadd.f32 %v2341_v54, %v2268_v53  ;;  %v13710_v57 = vpop.f32.mrb[23].mxu1  ;;  %v13715_v58 = vpop.f32.mrb[11].mxu0 }
 0x45f   : > { %v2422_v59 = vadd.f32 %v2418_v55, %v2345_v56  ;;  %v3144_v55 = vld [vmem:[%s16421_s17 + $0x40] sm:$0xff]  ;;  %s16433_s17 = sld [smem:[#allocation14_spill]] }
 0x461   : > { %v2429_v60 = vadd.f32 %v2427_v33, %v2422_v59 }
 0x463   : > { %3146 = vrot.lane.b32.xlu0 %v2429_v60, %s16348_s27  ;;  %s16429_s27 = sld [smem:[#allocation25_spill]] }
 0x467   : > { %2597 = vrot.lane.b32.xlu0 %v2446_v38, %s16412_s11 }
 0x46b   : > { %2751 = vrot.lane.b32.xlu0 %v2446_v38, %s16415_s10 }
 0x46f   : > { %2905 = vrot.lane.b32.xlu0 %v2446_v38, %s16416_s30 }
 0x473   : > { %3059 = vrot.lane.b32.xlu0 %v2446_v38, %s16350_s3 }
 0x482   : > { %v2449_v62 = vpop.permute.xlu1 %2448 }
 0x483   : > { %13717 = vmatpush3.msra.mxu1 %v2449_v62  ;;  %v3860_v62 = vmul.u32 3, %v14658_v3 }
 0x484   : > { %13719 = vmatmul.mubr.msk.f32.vlgmr.msra.gmra.mrb[24].mxu1 %vm16358_vm5, %v2431_v61  ;;  %13726 = vmatprep.subr.mxu1 %v14452_v2 }
 0x485   : > { %13728 = vmatprep.mubr.msk.f32.mxu1 %vm16362_vm0, %v14452_v2 }
 0x486   : > { %v2675_v0 = vpop.permute.xlu1 %2674 }
 0x487   : > { %13732 = vmatpush3.msra.mxu0 %v2675_v0 }
 0x488   : > { %13741 = vmatprep.subr.mxu0 %v14452_v2  ;;  %13734 = vmatmul.mubr.msk.f32.vlgmr.msra.gmra.mrb[14].mxu0 %vm16358_vm5, %v2433_v63  ;;  %v3861_v63 = vmul.u32 3, %v14667_v4 }
 0x489   : > { %13743 = vmatprep.mubr.msk.f32.mxu0 %vm16362_vm0, %v14452_v2 }
 0x48a   : > { %v2829_v7 = vpop.permute.xlu1 %2828 }
 0x48b   : > { %13742 = vmatpush3.msra.mxu0 %v2829_v7  ;;  %v3865_v7 = vadd.s32 5, %v3861_v63 }
 0x48c   : > { %13751 = vmatprep.subr.mxu0 %v14452_v2  ;;  %13744 = vmatmul.mubr.msk.f32.vlgmr.msra.gmra.mrb[16].mxu0 %vm16358_vm5, %v2435_v6  ;;  %v3864_v6 = vadd.s32 5, %v3860_v62 }
 0x48d   : > { %13753 = vmatprep.mubr.msk.f32.mxu0 %vm16362_vm0, %v14452_v2  ;;  %vm3869_vm9 = vcmp.eq.s32.totalorder %v14669_v5, %v3865_v7 }
 0x48e   : > { %v2983_v10 = vpop.permute.xlu1 %2982  ;;  %vm3868_vm8 = vcmp.eq.s32.totalorder %v14669_v5, %v3864_v6 }
 0x48f   : > { %13752 = vmatpush3.msra.mxu0 %v2983_v10  ;;  %v15022_v10 = vadd.s32 24, %v14658_v3  ;;  %vm15028_vm10 = vmpackc.low %vm3869_vm9, %vm3868_vm8 }
 0x490   : > { %13754 = vmatmul.mubr.msk.f32.vlgmr.msra.gmra.mrb[18].mxu0 %vm16358_vm5, %v2437_v8  ;;  %13761 = vmatprep.subr.mxu0 %v14452_v2  ;;  %v15019_v8 = vadd.s32 16, %v14658_v3 }
 0x491   : > { %13763 = vmatprep.mubr.msk.f32.mxu0 %vm16362_vm0, %v14452_v2 }
 0x4d5   : > { %v3147_v14 = vpop.permute.xlu0 %3146 }
 0x4d6   : > { %v3149_v15 = vsel %vm16356_vm6, 0.0, %v3147_v14 }
 0x4d7   : > { %v3150_v16 = vsel %vm2445_vm7, %v3149_v15, 0.0 }
 0x4d8   : > { %3301 = vrot.lane.b32.xlu0 %v3150_v16, %s16412_s11  ;;  %3152 = vrot.lane.b32.xlu1 %v3150_v16, %s16410_s29 }
 0x4d9   : > { %v2598_v18 = vpop.permute.xlu0 %2597 }
 0x4da   : > { %13727 = vmatpush3.msra.mxu1 %v2598_v18 }
 0x4db   : > { %13729 = vmatmul.mubr.msk.f32.vlgmr.msra.gmra.mrb[26].mxu1 %vm16358_vm5, %v2432_v17  ;;  %13736 = vmatprep.subr.mxu1 %v14452_v2  ;;  %v3863_v17 = vmul.u32 3, %v15022_v10 }
 0x4dc   : > { %3455 = vrot.lane.b32.xlu0 %v3150_v16, %s16415_s10  ;;  %3378 = vrot.lane.b32.xlu1 %v3150_v16, %s16414_s7 }
 0x4dd   : > { %v2752_v21 = vpop.permute.xlu0 %2751  ;;  %13738 = vmatprep.mubr.msk.f32.mxu1 %vm16362_vm0, %v14452_v2 }
 0x4de   : > { %13737 = vmatpush3.msra.mxu1 %v2752_v21 }
 0x4df   : > { %13739 = vmatmul.mubr.msk.f32.vlgmr.msra.gmra.mrb[28].mxu1 %vm16358_vm5, %v2434_v20  ;;  %13746 = vmatprep.subr.mxu1 %v14452_v2 }
 0x4e0   : > { %3609 = vrot.lane.b32.xlu0 %v3150_v16, %s16416_s30  ;;  %3532 = vrot.lane.b32.xlu1 %v3150_v16, %s16419_s8 }
 0x4e1   : > { %v2906_v24 = vpop.permute.xlu0 %2905  ;;  %13748 = vmatprep.mubr.msk.f32.mxu1 %vm16362_vm0, %v14452_v2 }
 0x4e2   : > { %13747 = vmatpush3.msra.mxu1 %v2906_v24 }
 0x4e3   : > { %13749 = vmatmul.mubr.msk.f32.vlgmr.msra.gmra.mrb[30].mxu1 %vm16358_vm5, %v2436_v22  ;;  %13756 = vmatprep.subr.mxu1 %v14452_v2  ;;  %v3867_v22 = vadd.s32 5, %v3863_v17 }
 0x4e4   : > { %3763 = vrot.lane.b32.xlu0 %v3150_v16, %s16350_s3  ;;  %3686 = vrot.lane.b32.xlu1 %v3150_v16, %s16411_s6  ;;  %v2593_v33 = vpop.f32.mrb[12].mxu0  ;;  %v3862_v16 = vmul.u32 3, %v15019_v8  ;;  %s866_s3 = scalar_lea.vmem %s16427_s5, %s14664_s2  ;;  %s16430_s5 = smov 4  }
 0x4e5   : > { %v3060_v29 = vpop.permute.xlu0 %3059  ;;  %13758 = vmatprep.mubr.msk.f32.mxu1 %vm16362_vm0, %v14452_v2  ;;  %v13725_v36 = vpop.f32.mrb[13].mxu0  ;;  %vm3871_vm12 = vcmp.eq.s32.totalorder %v14669_v5, %v3867_v22  ;;  %v912_v22 = vld [vmem:[%s866_s3 + $0x8] sm:$0xff] }
 0x4e6   : > { %13757 = vmatpush3.msra.mxu1 %v3060_v29  ;;  %v3866_v21 = vadd.s32 5, %v3862_v16 }
 0x4e7   : > { %13766 = vmatprep.subr.mxu1 %v14452_v2  ;;  %13759 = vmatmul.mubr.msk.f32.vlgmr.msra.gmra.mrb[32].mxu1 %vm16358_vm5, %v2438_v27 }
 0x4e8   : > { %3844 = vperm.xlu1 %14368, %v3841_v31   ;;  %13767 = vmatpush3.msk.msra.mxu1 %vm2445_vm7, %v3149_v15  ;;  %vm3870_vm11 = vcmp.eq.s32.totalorder %v14669_v5, %v3866_v21  ;;  %v911_v21 = vld [vmem:[%s866_s3] sm:$0xff]  ;;  %s861_s3 = scalar_lea.vmem %s16433_s17, %s14664_s2 }
 0x4e9   : > { %13768 = vmatprep.mubr.msk.f32.mxu1 %vm16362_vm0, %v14452_v2  ;;  %13776 = vmatprep.subr.mxu1 %v14452_v2  ;;  %vm15038_vm13 = vmpackc.low %vm3871_vm12, %vm3870_vm11 }
 0x4eb   : > { %13769 = vmatmul.mubr.msk.f32.vlgmr.msra.gmra.mrb[34].mxu1 %vm16358_vm5, %v3136_v35 }
 0x4ec   : > { %13778 = vmatprep.mubr.msk.f32.mxu1 %vm16362_vm0, %v14452_v2 }
 0x54a   : > { %v3153_v38 = vpop.permute.xlu1 %3152  ;;  %v3302_v39 = vpop.permute.xlu0 %3301 }
 0x54b   : > { %13762 = vmatpush3.msra.mxu0 %v3153_v38 }
 0x54c   : > { %13764 = vmatmul.mubr.msk.f32.vlgmr.msra.gmra.mrb[20].mxu0 %vm16358_vm5, %v3137_v37  ;;  %13771 = vmatprep.subr.mxu0 %v14452_v2 }
 0x54d   : > { %13772 = vmatpush3.msra.mxu0 %v3302_v39  ;;  %13773 = vmatprep.mubr.msk.f32.mxu0 %vm16362_vm0, %v14452_v2 }
 0x54e   : > { %v3379_v42 = vpop.permute.xlu1 %3378  ;;  %v3456_v43 = vpop.permute.xlu0 %3455  ;;  %13781 = vmatprep.subr.mxu0 %v14452_v2 }
 0x54f   : > { %13777 = vmatpush3.msra.mxu1 %v3379_v42 }
 0x550   : > { %13774 = vmatmul.mubr.msk.f32.vlgmr.msra.gmra.mrb[22].mxu0 %vm16358_vm5, %v3138_v40  ;;  %13779 = vmatmul.mubr.msk.f32.vlgmr.msra.gmra.mrb[36].mxu1 %vm16358_vm5, %v3139_v41 }
 0x551   : > { %13782 = vmatpush3.msra.mxu0 %v3456_v43  ;;  %13786 = vmatprep.subr.mxu1 %v14452_v2 }
 0x552   : > { %v3533_v46 = vpop.permute.xlu1 %3532  ;;  %v3610_v47 = vpop.permute.xlu0 %3609  ;;  %13783 = vmatprep.mubr.msk.f32.mxu0 %vm16362_vm0, %v14452_v2  ;;  %13791 = vmatprep.subr.mxu0 %v14452_v2 }
 0x553   : > { %13787 = vmatpush3.msra.mxu1 %v3533_v46  ;;  %13788 = vmatprep.mubr.msk.f32.mxu1 %vm16362_vm0, %v14452_v2 }
 0x554   : > { %13784 = vmatmul.mubr.msk.f32.vlgmr.msra.gmra.mrb[24].mxu0 %vm16358_vm5, %v3140_v44  ;;  %13789 = vmatmul.mubr.msk.f32.vlgmr.msra.gmra.mrb[38].mxu1 %vm16358_vm5, %v3141_v45 }
 0x555   : > { %13792 = vmatpush3.msra.mxu0 %v3610_v47  ;;  %13796 = vmatprep.subr.mxu1 %v14452_v2 }
 0x556   : > { %v3687_v50 = vpop.permute.xlu1 %3686  ;;  %v3764_v51 = vpop.permute.xlu0 %3763  ;;  %13793 = vmatprep.mubr.msk.f32.mxu0 %vm16362_vm0, %v14452_v2  ;;  %13801 = vmatprep.subr.mxu0 %v14452_v2 }
 0x557   : > { %13797 = vmatpush3.msra.mxu1 %v3687_v50  ;;  %13798 = vmatprep.mubr.msk.f32.mxu1 %vm16362_vm0, %v14452_v2  ;;  %v2520_v52 = vpop.f32.mrb[24].mxu1 }
 0x558   : > { %13794 = vmatmul.mubr.msk.f32.vlgmr.msra.gmra.mrb[26].mxu0 %vm16358_vm5, %v3142_v48  ;;  %13799 = vmatmul.mubr.msk.f32.vlgmr.msra.gmra.mrb[40].mxu1 %vm16358_vm5, %v3143_v49  ;;  %v13720_v53 = vpop.f32.mrb[25].mxu1  ;;  %v2594_v54 = vadd.f32 %v2593_v33, %v2520_v52 }
 0x559   : > { %13802 = vmatpush3.msra.mxu0 %v3764_v51  ;;  %13803 = vmatprep.mubr.msk.f32.mxu0 %vm16362_vm0, %v14452_v2 }
 0x55a   : > { %14164 = vmatprep.subr.bf16.mxu1 %v14451_v1  ;;  %13814 = vmatprep.mubr.msk.f32.mxu1 %vm16362_vm0, %v14452_v2 }
 0x55b   : > { %v2746_v56 = vpop.f32.mrb[14].mxu0  ;;  %13817 = vmatprep.subr.mxu0 %v14452_v2  ;;  %14166 = vmatpush3.bf16.msk.msra.mxu1 %vm15028_vm10, %v14454_v13 }
 0x55c   : > { %13804 = vmatmul.mubr.msk.f32.vlgmr.msra.gmra.mrb[28].mxu0 %vm16358_vm5, %v3144_v55  ;;  %v13735_v57 = vpop.f32.mrb[15].mxu0  ;;  %14167 = vmatprep.subr.bf16.mxu1 %v14451_v1 }
 0x55d   : > { %13819 = vmatprep.mubr.msk.f32.mxu0 %vm16362_vm0, %v14452_v2 }
 0x55f   : > { %v2900_v58 = vpop.f32.mrb[16].mxu0  ;;  %14169 = vmatpush3.bf16.msk.msra.mxu1 %vm15038_vm13, %v14454_v13 }
 0x560   : > { %v13745_v59 = vpop.f32.mrb[17].mxu0  ;;  %13827 = vmatprep.subr.mxu1 %v14452_v2 }
 0x563   : > { %v3054_v60 = vpop.f32.mrb[18].mxu0 }
 0x564   : > { %v13755_v61 = vpop.f32.mrb[19].mxu0 }
 0x5ae   : > { %v2669_v0 = vpop.f32.mrb[26].mxu1 }
 0x5af   : > { %v2673_v14 = vadd.f32 %v2669_v0, %v2594_v54  ;;  %v13730_v15 = vpop.f32.mrb[27].mxu1 }
 0x5b0   : > { %v3845_v15 = vpop.permute.xlu1 %3844 }
 0x5b1   : > { %v2750_v4 = vadd.f32 %v2746_v56, %v2673_v14 }
 0x5b2   : > { %v2823_v20 = vpop.f32.mrb[28].mxu1 }
 0x5b3   : > { %v2827_v24 = vadd.f32 %v2823_v20, %v2750_v4  ;;  %v13740_v27 = vpop.f32.mrb[29].mxu1 }
 0x5b5   : > { %v2904_v29 = vadd.f32 %v2900_v58, %v2827_v24  ;;  %v3850_v24 = vld [vmem:[%s16428_s18 + $0x8] sm:$0x3f] }
 0x5b6   : > { %v2977_v33 = vpop.f32.mrb[30].mxu1 }
 0x5b7   : > { %v2981_v35 = vadd.f32 %v2977_v33, %v2904_v29  ;;  %v13750_v36 = vpop.f32.mrb[31].mxu1  ;;  %v3849_v33 = vld [vmem:[%s16428_s18] sm:$0x3f] }
 0x5b8   : > { %v3852_v36 = vld [vmem:[%s16428_s18 + $0x18] sm:$0x3f] }
 0x5b9   : > { %v3058_v37 = vadd.f32 %v3054_v60, %v2981_v35 }
 0x5ba   : > { %v3131_v38 = vpop.f32.mrb[32].mxu1 }
 0x5bb   : > { %v3135_v39 = vadd.f32 %v3131_v38, %v3058_v37  ;;  %v13760_v40 = vpop.f32.mrb[33].mxu1  ;;  %v3851_v38 = vld [vmem:[%s16428_s18 + $0x10] sm:$0x3f] }
 0x5bc   : > { %v3854_v40 = vld [vmem:[%s16428_s18 + $0x28] sm:$0x3f] }
 0x5be   : > { %v3297_v41 = vpop.f32.mrb[34].mxu1 }
 0x5bf   : > { %v13770_v42 = vpop.f32.mrb[35].mxu1 }
 0x5c0   : > { %v3853_v42 = vld [vmem:[%s16428_s18 + $0x20] sm:$0x3f] }
 0x61f   : > { %v3224_v43 = vpop.f32.mrb[20].mxu0 }
 0x620   : > { %v3298_v44 = vadd.f32 %v3297_v41, %v3224_v43  ;;  %v13765_v45 = vpop.f32.mrb[21].mxu0  ;;  %v3856_v43 = vld [vmem:[%s16428_s18 + $0x38] sm:$0x3f] }
 0x621   : > { %v3855_v45 = vld [vmem:[%s16428_s18 + $0x30] sm:$0x3f] }
 0x623   : > { %v3373_v46 = vpop.f32.mrb[22].mxu0  ;;  %v3450_v47 = vpop.f32.mrb[36].mxu1 }
 0x624   : > { %v3377_v48 = vadd.f32 %v3373_v46, %v3298_v44  ;;  %v13775_v49 = vpop.f32.mrb[23].mxu0  ;;  %v13780_v50 = vpop.f32.mrb[37].mxu1 }
 0x626   : > { %v3454_v51 = vadd.f32 %v3450_v47, %v3377_v48  ;;  %v3857_v47 = vld [vmem:[%s16428_s18 + $0x40] sm:$0x3f]  ;;  %s16432_s18 = sld [smem:[#allocation22_spill]] }
 0x627   : > { %v3527_v52 = vpop.f32.mrb[24].mxu0  ;;  %v3604_v53 = vpop.f32.mrb[38].mxu1 }
 0x628   : > { %v3531_v54 = vadd.f32 %v3527_v52, %v3454_v51  ;;  %v13785_v55 = vpop.f32.mrb[25].mxu0  ;;  %v13790_v56 = vpop.f32.mrb[39].mxu1 }
 0x62a   : > { %v3608_v57 = vadd.f32 %v3604_v53, %v3531_v54 }
 0x62b   : > { %v3681_v58 = vpop.f32.mrb[26].mxu0  ;;  %v3758_v59 = vpop.f32.mrb[40].mxu1 }
 0x62c   : > { %v3685_v60 = vadd.f32 %v3681_v58, %v3608_v57  ;;  %v13795_v61 = vpop.f32.mrb[27].mxu0  ;;  %v13800_v62 = vpop.f32.mrb[41].mxu1 }
 0x62e   : > { %v3762_v63 = vadd.f32 %v3758_v59, %v3685_v60 }
 0x62f   : > { %v3835_v0 = vpop.f32.mrb[28].mxu0 }
 0x630   : > { %v3839_v6 = vadd.f32 %v3835_v0, %v3762_v63  ;;  %v13805_v7 = vpop.f32.mrb[29].mxu0 }
 0x632   : > { %v3840_v14 = vadd.f32 %v3839_v6, %v3135_v39 }
 0x634   : > { %v3847_v16 = vadd.f32 %v3845_v15, %v3840_v14 }
 0x636   : > { %v3848_v17 = vmax.f32 %v3847_v16, 0.0 }
 0x638   : > { %13815 = vmatmul.mubr.msk.f32.vlgmr.msra.gmra.mrb[42].mxu1 %vm16357_vm14, %v3848_v17 }
 0x639   : > { %13829 = vmatprep.mubr.msk.f32.mxu1 %vm16362_vm0, %v14452_v2 }
 0x70b   : > { %v3950_v4 = vpop.f32.mrb[42].mxu1 }
 0x70c   : > { %4181 = vrot.lane.b32.xlu1 %v3950_v4, %s16414_s7  ;;  %3955 = vrot.lane.b32.xlu0 %v3950_v4, %s16410_s29  ;;  %v13816_v20 = vpop.f32.mrb[43].mxu1 }
 0x710   : > { %4489 = vrot.lane.b32.xlu1 %v3950_v4, %s16411_s6  ;;  %4335 = vrot.lane.b32.xlu0 %v3950_v4, %s16419_s8 }
 0x714   : > { %4104 = vrot.lane.b32.xlu1 %v3950_v4, %s16412_s11 }
 0x718   : > { %4258 = vrot.lane.b32.xlu1 %v3950_v4, %s16415_s10 }
 0x71c   : > { %4412 = vrot.lane.b32.xlu1 %v3950_v4, %s16416_s30 }
 0x720   : > { %4566 = vrot.lane.b32.xlu1 %v3950_v4, %s16426_s16 }
 0x72e   : > { %913 = vxpose.xlu0.b32.start [1/2] (short) (narrow) %v911_v21, 8 }
 0x732   : > { %914 = vxpose.xlu0.b32.end [2/2] (short) (narrow) %v912_v22, 8 }
 0x77e   : > { %v4182_v27 = vpop.permute.xlu1 %4181  ;;  %v3956_v29 = vpop.permute.xlu0 %3955 }
 0x77f   : > { %13818 = vmatpush3.msra.mxu0 %v3956_v29  ;;  %v4643_v29 = vld [vmem:[%s16429_s27] sm:$0x3f]  ;;  %s16431_s27 = sld [smem:[#allocation23_spill]] }
 0x780   : > { %13820 = vmatmul.mubr.msk.f32.vlgmr.msra.gmra.mrb[30].mxu0 %vm16358_vm5, %v3850_v24  ;;  %13822 = vmatprep.subr.mxu0 %v14452_v2 }
 0x781   : > { %13823 = vmatpush3.msra.mxu0 %v3950_v4  ;;  %13824 = vmatprep.mubr.msk.f32.mxu0 %vm16362_vm0, %v14452_v2 }
 0x782   : > { %v4490_v35 = vpop.permute.xlu1 %4489  ;;  %13832 = vmatprep.subr.mxu0 %v14452_v2  ;;  %v4336_v39 = vpop.permute.xlu0 %4335 }
 0x784   : > { %13825 = vmatmul.mubr.msk.f32.vlgmr.msra.gmra.mrb[32].mxu0 %vm16358_vm5, %v3849_v33 }
 0x785   : > { %13833 = vmatpush3.msra.mxu0 %v4182_v27  ;;  %13834 = vmatprep.mubr.msk.f32.mxu0 %vm16362_vm0, %v14452_v2 }
 0x786   : > { %v4105_v37 = vpop.permute.xlu1 %4104  ;;  %13842 = vmatprep.subr.mxu0 %v14452_v2 }
 0x787   : > { %13828 = vmatpush3.msra.mxu1 %v4105_v37 }
 0x788   : > { %13835 = vmatmul.mubr.msk.f32.vlgmr.msra.gmra.mrb[34].mxu0 %vm16358_vm5, %v3852_v36  ;;  %13837 = vmatprep.subr.mxu1 %v14452_v2 }
 0x789   : > { %13843 = vmatpush3.msra.mxu0 %v4336_v39  ;;  %13830 = vmatmul.mubr.msk.f32.vlgmr.msra.gmra.mrb[44].mxu1 %vm16358_vm5, %v3851_v38  ;;  %v14369_v38 = vld [vmem:[%s16407_s0 + $0x30] sm:$0xff] }
 0x78a   : > { %v4259_v41 = vpop.permute.xlu1 %4258  ;;  %13844 = vmatprep.mubr.msk.f32.mxu0 %vm16362_vm0, %v14452_v2  ;;  %13852 = vmatprep.subr.mxu0 %v14452_v2 }
 0x78b   : > { %13838 = vmatpush3.msra.mxu1 %v4259_v41  ;;  %13839 = vmatprep.mubr.msk.f32.mxu1 %vm16362_vm0, %v14452_v2 }
 0x78c   : > { %13845 = vmatmul.mubr.msk.f32.vlgmr.msra.gmra.mrb[36].mxu0 %vm16358_vm5, %v3854_v40  ;;  %13847 = vmatprep.subr.mxu1 %v14452_v2 }
 0x78d   : > { %13853 = vmatpush3.msra.mxu0 %v4490_v35  ;;  %13840 = vmatmul.mubr.msk.f32.vlgmr.msra.gmra.mrb[46].mxu1 %vm16358_vm5, %v3853_v42 }
 0x78e   : > { %v4413_v44 = vpop.permute.xlu1 %4412  ;;  %13849 = vmatprep.mubr.msk.f32.mxu1 %vm16362_vm0, %v14452_v2  ;;  %13854 = vmatprep.mubr.msk.f32.mxu0 %vm16362_vm0, %v14452_v2 }
 0x78f   : > { %13848 = vmatpush3.msra.mxu1 %v4413_v44  ;;  %14170 = vmatprep.subr.bf16.mxu0 %v14451_v1 }
 0x790   : > { %13857 = vmatprep.subr.mxu1 %v14452_v2  ;;  %13855 = vmatmul.mubr.msk.f32.vlgmr.msra.gmra.mrb[38].mxu0 %vm16358_vm5, %v3856_v43 }
 0x791   : > { %13850 = vmatmul.mubr.msk.f32.vlgmr.msra.gmra.mrb[48].mxu1 %vm16358_vm5, %v3855_v45  ;;  %14172 = vmatpush3.bf16.msk.msra.mxu0 %vm14685_vm3, %v14454_v13 }
 0x792   : > { %v4567_v46 = vpop.permute.xlu1 %4566  ;;  %13859 = vmatprep.mubr.msk.f32.mxu1 %vm16362_vm0, %v14452_v2  ;;  %13866 = vmatprep.mubr.msk.f32.mxu0 %vm16362_vm0, %v14452_v2 }
 0x793   : > { %13858 = vmatpush3.msra.mxu1 %v4567_v46  ;;  %13874 = vmatprep.subr.mxu0 %v14452_v2 }
 0x794   : > { %13869 = vmatprep.subr.mxu1 %v14452_v2 }
 0x795   : > { %13860 = vmatmul.mubr.msk.f32.vlgmr.msra.gmra.mrb[50].mxu1 %vm16358_vm5, %v3857_v47 }
 0x796   : > { %13871 = vmatprep.mubr.msk.f32.mxu1 %vm16362_vm0, %v14452_v2 }
 0x7ae   : > { %v929_v48 = vpop.trf.xlu0 }
 0x7af   : > { %13867 = vmatmul.mubr.msk.f32.vlgmr.msra.gmra.mrb[40].mxu0 %vm16361_vm4, %v929_v48 }
 0x7b0   : > { %13876 = vmatprep.mubr.msk.f32.mxu0 %vm16362_vm0, %v14452_v2 }
 0x853   : > { %v4027_v49 = vpop.f32.mrb[30].mxu0 }
 0x854   : > { %v13821_v50 = vpop.f32.mrb[31].mxu0 }
 0x857   : > { %v4100_v51 = vpop.f32.mrb[32].mxu0 }
 0x858   : > { %v4101_v52 = vadd.f32 %v4100_v51, %v4027_v49  ;;  %v13826_v53 = vpop.f32.mrb[33].mxu0 }
 0x85b   : > { %v4253_v54 = vpop.f32.mrb[34].mxu0 }
 0x85c   : > { %v4176_v55 = vpop.f32.mrb[44].mxu1  ;;  %v13836_v56 = vpop.f32.mrb[35].mxu0 }
 0x85d   : > { %v4180_v57 = vadd.f32 %v4176_v55, %v4101_v52  ;;  %v13831_v58 = vpop.f32.mrb[45].mxu1 }
 0x85f   : > { %v4257_v59 = vadd.f32 %v4253_v54, %v4180_v57  ;;  %v4407_v60 = vpop.f32.mrb[36].mxu0 }
 0x860   : > { %v4330_v61 = vpop.f32.mrb[46].mxu1  ;;  %v13846_v62 = vpop.f32.mrb[37].mxu0 }
 0x861   : > { %v4334_v63 = vadd.f32 %v4330_v61, %v4257_v59  ;;  %v13841_v0 = vpop.f32.mrb[47].mxu1 }
 0x862   : > { %v5313_v0 = vld [vmem:[%s16432_s18 + $0x8] sm:$0x3f] }
 0x863   : > { %v4411_v6 = vadd.f32 %v4407_v60, %v4334_v63  ;;  %v4561_v7 = vpop.f32.mrb[38].mxu0  ;;  %v6083_v63 = vld [vmem:[%s16431_s27] sm:$0x3f] }
 0x864   : > { %v4484_v14 = vpop.f32.mrb[48].mxu1  ;;  %v13856_v15 = vpop.f32.mrb[39].mxu0 }
 0x865   : > { %v4488_v16 = vadd.f32 %v4484_v14, %v4411_v6  ;;  %v13851_v17 = vpop.f32.mrb[49].mxu1  ;;  %v5314_v15 = vld [vmem:[%s16432_s18 + $0x10] sm:$0x3f] }
 0x867   : > { %v4565_v4 = vadd.f32 %v4561_v7, %v4488_v16  ;;  %v5312_v7 = vld [vmem:[%s16432_s18] sm:$0x3f]  ;;  %v5315_v16 = vld [vmem:[%s16432_s18 + $0x18] sm:$0x3f] }
 0x868   : > { %v4638_v20 = vpop.f32.mrb[50].mxu1 }
 0x869   : > { %v4642_v21 = vadd.f32 %v4638_v20, %v4565_v4  ;;  %v13861_v22 = vpop.f32.mrb[51].mxu1  ;;  %v5316_v4 = vld [vmem:[%s16432_s18 + $0x20] sm:$0x3f] }
 0x882   : > { %v4719_v24 = vpop.f32.mrb[40].mxu0 }
 0x883   : > { %5089 = vrot.lane.b32.xlu0 %v4719_v24, %s16419_s8  ;;  %4724 = vrot.lane.b32.xlu1 %v4719_v24, %s16410_s29  ;;  %v13868_v27 = vpop.f32.mrb[41].mxu0 }
 0x884   : > { %13875 = vmatpush3.msra.mxu0 %v4719_v24 }
 0x885   : > { %13877 = vmatmul.mubr.msk.f32.vlgmr.msra.gmra.mrb[42].mxu0 %vm16358_vm5, %v14723_v23  ;;  %13884 = vmatprep.subr.mxu0 %v14452_v2 }
 0x886   : > { %13886 = vmatprep.mubr.msk.f32.mxu0 %vm16362_vm0, %v14452_v2 }
 0x887   : > { %4646 = vperm.xlu0 %14367, %v4643_v29   ;;  %4867 = vrot.lane.b32.xlu1 %v4719_v24, %s16412_s11  ;;  %v5319_v29 = vld [vmem:[%s16432_s18 + $0x38] sm:$0x3f] }
 0x88b   : > { %4941 = vrot.lane.b32.xlu1 %v4719_v24, %s16414_s7 }
 0x88f   : > { %5015 = vrot.lane.b32.xlu1 %v4719_v24, %s16415_s10 }
 0x893   : > { %5163 = vrot.lane.b32.xlu1 %v4719_v24, %s16416_s30 }
 0x897   : > { %5237 = vrot.lane.b32.xlu1 %v4719_v24, %s16411_s6  ;;  %v5318_v24 = vld [vmem:[%s16432_s18 + $0x30] sm:$0x3f] }
 0x8f5   : > { %v4725_v33 = vpop.permute.xlu1 %4724  ;;  %v5090_v36 = vpop.permute.xlu0 %5089 }
 0x8f6   : > { %13870 = vmatpush3.msra.mxu1 %v4725_v33 }
 0x8f7   : > { %13879 = vmatprep.subr.mxu1 %v14452_v2  ;;  %13872 = vmatmul.mubr.msk.f32.vlgmr.msra.gmra.mrb[52].mxu1 %vm16358_vm5, %v14710_v19 }
 0x8f8   : > { %13881 = vmatprep.mubr.msk.f32.mxu1 %vm16362_vm0, %v14452_v2 }
 0x8f9   : > { %v4868_v23 = vpop.permute.xlu1 %4867 }
 0x8fa   : > { %13880 = vmatpush3.msra.mxu1 %v4868_v23  ;;  %v5320_v23 = vld [vmem:[%s16432_s18 + $0x40] sm:$0x3f] }
 0x8fb   : > { %13882 = vmatmul.mubr.msk.f32.vlgmr.msra.gmra.mrb[54].mxu1 %vm16358_vm5, %v14740_v25  ;;  %13889 = vmatprep.subr.mxu1 %v14452_v2 }
 0x8fc   : > { %13891 = vmatprep.mubr.msk.f32.mxu1 %vm16362_vm0, %v14452_v2 }
 0x8fd   : > { %v4942_v35 = vpop.permute.xlu1 %4941 }
 0x8fe   : > { %13885 = vmatpush3.msra.mxu0 %v4942_v35 }
 0x8ff   : > { %13894 = vmatprep.subr.mxu0 %v14452_v2  ;;  %13887 = vmatmul.mubr.msk.f32.vlgmr.msra.gmra.mrb[44].mxu0 %vm16358_vm5, %v14754_v28 }
 0x900   : > { %13895 = vmatpush3.msra.mxu0 %v5090_v36  ;;  %13896 = vmatprep.mubr.msk.f32.mxu0 %vm16362_vm0, %v14452_v2 }
 0x901   : > { %v5016_v19 = vpop.permute.xlu1 %5015  ;;  %13904 = vmatprep.subr.mxu0 %v14452_v2 }
 0x902   : > { %13890 = vmatpush3.msra.mxu1 %v5016_v19 }
 0x903   : > { %13892 = vmatmul.mubr.msk.f32.vlgmr.msra.gmra.mrb[56].mxu1 %vm16358_vm5, %v14764_v30  ;;  %13899 = vmatprep.subr.mxu1 %v14452_v2 }
 0x904   : > { %13897 = vmatmul.mubr.msk.f32.vlgmr.msra.gmra.mrb[46].mxu0 %vm16358_vm5, %v14774_v32  ;;  %13901 = vmatprep.mubr.msk.f32.mxu1 %vm16362_vm0, %v14452_v2 }
 0x905   : > { %v5164_v25 = vpop.permute.xlu1 %5163  ;;  %13906 = vmatprep.mubr.msk.f32.mxu0 %vm16362_vm0, %v14452_v2 }
 0x906   : > { %v4647_v28 = vpop.permute.xlu0 %4646  ;;  %13900 = vmatpush3.msra.mxu1 %v5164_v25 }
 0x907   : > { %v4649_v37 = vadd.f32 %v4647_v28, %v4642_v21  ;;  %13902 = vmatmul.mubr.msk.f32.vlgmr.msra.gmra.mrb[58].mxu1 %vm16358_vm5, %v14369_v38  ;;  %14173 = vmatprep.subr.bf16.mxu1 %v14451_v1  ;;  %v5317_v21 = vld [vmem:[%s16432_s18 + $0x28] sm:$0x3f] }
 0x908   : > { %14175 = vmatpush3.bf16.msk.msra.mxu1 %vm15028_vm10, %v14454_v13  ;;  %13917 = vmatprep.mubr.msk.f32.mxu1 %vm16362_vm0, %v14452_v2 }
 0x909   : > { %6817 = vrot.lane.b32.xlu0 %v4649_v37, %s16430_s5  ;;  %v5238_v30 = vpop.permute.xlu1 %5237  ;;  %14176 = vmatprep.subr.bf16.mxu1 %v14451_v1 }
 0x90a   : > { %13905 = vmatpush3.msra.mxu0 %v5238_v30 }
 0x90b   : > { %13907 = vmatmul.mubr.msk.f32.vlgmr.msra.gmra.mrb[48].mxu0 %vm16358_vm5, %v14784_v34  ;;  %13920 = vmatprep.subr.mxu0 %v14452_v2 }
 0x90c   : > { %14178 = vmatpush3.bf16.msk.msra.mxu1 %vm15038_vm13, %v14454_v13  ;;  %13922 = vmatprep.mubr.msk.f32.mxu0 %vm16362_vm0, %v14452_v2 }
 0x90d   : > { %13930 = vmatprep.subr.mxu1 %v14452_v2 }
 0x958   : > { %v4863_v32 = vpop.f32.mrb[42].mxu0 }
 0x959   : > { %v13878_v39 = vpop.f32.mrb[43].mxu0 }
 0x9ca   : > { %v4793_v40 = vpop.f32.mrb[52].mxu1 }
 0x9cb   : > { %v13873_v41 = vpop.f32.mrb[53].mxu1  ;;  %v4864_v42 = vadd.f32 %v4863_v32, %v4793_v40 }
 0x9ce   : > { %v4936_v43 = vpop.f32.mrb[54].mxu1 }
 0x9cf   : > { %v4940_v44 = vadd.f32 %v4936_v43, %v4864_v42  ;;  %v13883_v45 = vpop.f32.mrb[55].mxu1 }
 0x9d2   : > { %v5010_v34 = vpop.f32.mrb[44].mxu0 }
 0x9d3   : > { %v5014_v46 = vadd.f32 %v5010_v34, %v4940_v44  ;;  %v13888_v47 = vpop.f32.mrb[45].mxu0 }
 0x9d6   : > { %v5084_v48 = vpop.f32.mrb[56].mxu1 }
 0x9d7   : > { %v5088_v49 = vadd.f32 %v5084_v48, %v5014_v46  ;;  %v13893_v50 = vpop.f32.mrb[57].mxu1  ;;  %v5158_v51 = vpop.f32.mrb[46].mxu0 }
 0x9d8   : > { %v13898_v52 = vpop.f32.mrb[47].mxu0 }
 0x9d9   : > { %v5162_v53 = vadd.f32 %v5158_v51, %v5088_v49 }
 0x9da   : > { %v5232_v54 = vpop.f32.mrb[58].mxu1 }
 0x9db   : > { %v5236_v55 = vadd.f32 %v5232_v54, %v5162_v53  ;;  %v13903_v56 = vpop.f32.mrb[59].mxu1 }
 0x9de   : > { %v5306_v57 = vpop.f32.mrb[48].mxu0 }
 0x9df   : > { %v5310_v58 = vadd.f32 %v5306_v57, %v5236_v55  ;;  %v13908_v59 = vpop.f32.mrb[49].mxu0 }
 0x9e1   : > { %v5311_v60 = vadd.f32 %v5310_v58, %v14860_v26 }
 0x9e3   : > { %13918 = vmatmul.mubr.msk.f32.vlgmr.msra.gmra.mrb[60].mxu1 %vm16357_vm14, %v5311_v60 }
 0x9e4   : > { %13932 = vmatprep.mubr.msk.f32.mxu1 %vm16362_vm0, %v14452_v2 }
 0xab6   : > { %v5390_v61 = vpop.f32.mrb[60].mxu1 }
 0xab7   : > { %5395 = vrot.lane.b32.xlu1 %v5390_v61, %s16410_s29  ;;  %v13919_v62 = vpop.f32.mrb[61].mxu1 }
 0xab8   : > { %v6818_v62 = vpop.permute.xlu0 %6817 }
 0xabb   : > { %5544 = vrot.lane.b32.xlu1 %v5390_v61, %s16412_s11 }
 0xabf   : > { %5621 = vrot.lane.b32.xlu1 %v5390_v61, %s16414_s7 }
 0xac3   : > { %5698 = vrot.lane.b32.xlu1 %v5390_v61, %s16415_s10 }
 0xac7   : > { %5775 = vrot.lane.b32.xlu1 %v5390_v61, %s16419_s8 }
 0xacb   : > { %5852 = vrot.lane.b32.xlu1 %v5390_v61, %s16416_s30 }
 0xacf   : > { %5929 = vrot.lane.b32.xlu1 %v5390_v61, %s16411_s6 }
 0xad3   : > { %6006 = vrot.lane.b32.xlu1 %v5390_v61, %s16426_s16 }
 0xad7   : > { %6086 = vperm.xlu1 %14368, %v6083_v63   ;;  %v6820_v63 = vsel %vm16356_vm6, 0.0, %v6818_v62 }
 0xb29   : > { %v5396_v6 = vpop.permute.xlu1 %5395 }
 0xb2a   : > { %13921 = vmatpush3.msra.mxu0 %v5396_v6  ;;  %v7522_v6 = vld [vmem:[%s16313_s21] sm:$0x3f] }
 0xb2b   : > { %13925 = vmatprep.subr.mxu0 %v14452_v2  ;;  %13923 = vmatmul.mubr.msk.f32.vlgmr.msra.gmra.mrb[50].mxu0 %vm16358_vm5, %v5313_v0  ;;  %v15294_v0 = vsel %vm6104_vm15, %v6820_v63, 0.0  ;;  %v7540_v63 = vadd.s32 48, %v14658_v3 }
 0xb2c   : > { %13926 = vmatpush3.msra.mxu0 %v5390_v61  ;;  %13927 = vmatprep.mubr.msk.f32.mxu0 %vm16362_vm0, %v14452_v2  ;;  %v6090_v61 = vld [vmem:[%s16311_s19] sm:$0x3f] }
 0xb2d   : > { %v5545_v14 = vpop.permute.xlu1 %5544  ;;  %13935 = vmatprep.subr.mxu0 %v14452_v2 }
 0xb2e   : > { %13931 = vmatpush3.msra.mxu1 %v5545_v14  ;;  %v878_v14 = vld [vmem:[%s861_s3 + $0x8] sm:$0xff] }
 0xb2f   : > { %13928 = vmatmul.mubr.msk.f32.vlgmr.msra.gmra.mrb[52].mxu0 %vm16358_vm5, %v5312_v7  ;;  %13940 = vmatprep.subr.mxu1 %v14452_v2  ;;  %v877_v7 = vld [vmem:[%s861_s3] sm:$0xff] }
 0xb30   : > { %13933 = vmatmul.mubr.msk.f32.vlgmr.msra.gmra.mrb[62].mxu1 %vm16358_vm5, %v5314_v15  ;;  %13937 = vmatprep.mubr.msk.f32.mxu0 %vm16362_vm0, %v14452_v2  ;;  %v6091_v15 = vld [vmem:[%s16311_s19 + $0x8] sm:$0x3f] }
 0xb31   : > { %v5622_v17 = vpop.permute.xlu1 %5621  ;;  %13942 = vmatprep.mubr.msk.f32.mxu1 %vm16362_vm0, %v14452_v2 }
 0xb32   : > { %13936 = vmatpush3.msra.mxu0 %v5622_v17 }
 0xb33   : > { %13938 = vmatmul.mubr.msk.f32.vlgmr.msra.gmra.mrb[54].mxu0 %vm16358_vm5, %v5315_v16  ;;  %13945 = vmatprep.subr.mxu0 %v14452_v2 }
 0xb34   : > { %13947 = vmatprep.mubr.msk.f32.mxu0 %vm16362_vm0, %v14452_v2 }
 0xb35   : > { %v5699_v20 = vpop.permute.xlu1 %5698 }
 0xb36   : > { %13941 = vmatpush3.msra.mxu1 %v5699_v20  ;;  %v6093_v20 = vld [vmem:[%s16311_s19 + $0x18] sm:$0x3f] }
 0xb37   : > { %13943 = vmatmul.mubr.msk.f32.vlgmr.msra.gmra.mrb[64].mxu1 %vm16358_vm5, %v5316_v4  ;;  %13950 = vmatprep.subr.mxu1 %v14452_v2  ;;  %v6092_v4 = vld [vmem:[%s16311_s19 + $0x10] sm:$0x3f] }
 0xb38   : > { %13952 = vmatprep.mubr.msk.f32.mxu1 %vm16362_vm0, %v14452_v2 }
 0xb39   : > { %v5776_v22 = vpop.permute.xlu1 %5775 }
 0xb3a   : > { %13946 = vmatpush3.msra.mxu0 %v5776_v22 }
 0xb3b   : > { %13948 = vmatmul.mubr.msk.f32.vlgmr.msra.gmra.mrb[56].mxu0 %vm16358_vm5, %v5317_v21  ;;  %13955 = vmatprep.subr.mxu0 %v14452_v2 }
 0xb3c   : > { %13957 = vmatprep.mubr.msk.f32.mxu0 %vm16362_vm0, %v14452_v2 }
 0xb3d   : > { %v5853_v27 = vpop.permute.xlu1 %5852 }
 0xb3e   : > { %13951 = vmatpush3.msra.mxu1 %v5853_v27  ;;  %v6095_v27 = vld [vmem:[%s16311_s19 + $0x28] sm:$0x3f] }
 0xb3f   : > { %13953 = vmatmul.mubr.msk.f32.vlgmr.msra.gmra.mrb[66].mxu1 %vm16358_vm5, %v5318_v24  ;;  %13960 = vmatprep.subr.mxu1 %v14452_v2  ;;  %v6094_v24 = vld [vmem:[%s16311_s19 + $0x20] sm:$0x3f] }
 0xb40   : > { %13962 = vmatprep.mubr.msk.f32.mxu1 %vm16362_vm0, %v14452_v2 }
 0xb41   : > { %v5930_v33 = vpop.permute.xlu1 %5929 }
 0xb42   : > { %13956 = vmatpush3.msra.mxu0 %v5930_v33 }
 0xb43   : > { %13958 = vmatmul.mubr.msk.f32.vlgmr.msra.gmra.mrb[58].mxu0 %vm16358_vm5, %v5319_v29  ;;  %13965 = vmatprep.subr.mxu0 %v14452_v2 }
 0xb44   : > { %13967 = vmatprep.mubr.msk.f32.mxu0 %vm16362_vm0, %v14452_v2 }
 0xb45   : > { %v6007_v35 = vpop.permute.xlu1 %6006 }
 0xb46   : > { %13961 = vmatpush3.msra.mxu1 %v6007_v35  ;;  %v6097_v35 = vld [vmem:[%s16311_s19 + $0x38] sm:$0x3f] }
 0xb47   : > { %13963 = vmatmul.mubr.msk.f32.vlgmr.msra.gmra.mrb[68].mxu1 %vm16358_vm5, %v5320_v23  ;;  %13970 = vmatprep.subr.mxu1 %v14452_v2  ;;  %v6096_v23 = vld [vmem:[%s16311_s19 + $0x30] sm:$0x3f] }
 0xb48   : > { %13972 = vmatprep.mubr.msk.f32.mxu1 %vm16362_vm0, %v14452_v2 }
 0xb56   : > { %v15270_v56 = vpop.permute.xlu1 %6086 }
 0xbfe   : > { %v5467_v36 = vpop.f32.mrb[50].mxu0 }
 0xbff   : > { %v13924_v19 = vpop.f32.mrb[51].mxu0 }
 0xc02   : > { %v5540_v25 = vpop.f32.mrb[52].mxu0 }
 0xc03   : > { %v5541_v28 = vadd.f32 %v5540_v25, %v5467_v36  ;;  %v5616_v37 = vpop.f32.mrb[62].mxu1  ;;  %v13929_v38 = vpop.f32.mrb[53].mxu0  ;;  %v6098_v25 = vld [vmem:[%s16311_s19 + $0x40] sm:$0x3f] }
 0xc04   : > { %v13934_v30 = vpop.f32.mrb[63].mxu1 }
 0xc05   : > { %v5620_v32 = vadd.f32 %v5616_v37, %v5541_v28  ;;  %v6808_v28 = vld [vmem:[%s16312_s20 + $0x8] sm:$0x3f]  ;;  %v6807_v30 = vld [vmem:[%s16312_s20] sm:$0x3f] }
 0xc06   : > { %v5693_v39 = vpop.f32.mrb[54].mxu0 }
 0xc07   : > { %v5697_v40 = vadd.f32 %v5693_v39, %v5620_v32  ;;  %v13939_v41 = vpop.f32.mrb[55].mxu0 }
 0xc08   : > { %v6810_v41 = vld [vmem:[%s16312_s20 + $0x18] sm:$0x3f] }
 0xc0a   : > { %v5770_v42 = vpop.f32.mrb[64].mxu1 }
 0xc0b   : > { %v5774_v43 = vadd.f32 %v5770_v42, %v5697_v40  ;;  %v13944_v44 = vpop.f32.mrb[65].mxu1  ;;  %v6809_v40 = vld [vmem:[%s16312_s20 + $0x10] sm:$0x3f] }
 0xc0c   : > { %v6811_v44 = vld [vmem:[%s16312_s20 + $0x20] sm:$0x3f] }
 0xc0e   : > { %v5847_v45 = vpop.f32.mrb[56].mxu0 }
 0xc0f   : > { %v5851_v34 = vadd.f32 %v5847_v45, %v5774_v43  ;;  %v13949_v46 = vpop.f32.mrb[57].mxu0  ;;  %v6812_v45 = vld [vmem:[%s16312_s20 + $0x28] sm:$0x3f] }
 0xc10   : > { %v6813_v46 = vld [vmem:[%s16312_s20 + $0x30] sm:$0x3f] }
 0xc12   : > { %v5924_v47 = vpop.f32.mrb[66].mxu1 }
 0xc13   : > { %v5928_v48 = vadd.f32 %v5924_v47, %v5851_v34  ;;  %v13954_v49 = vpop.f32.mrb[67].mxu1 }
 0xc14   : > { %v6815_v49 = vld [vmem:[%s16312_s20 + $0x40] sm:$0x3f] }
 0xc16   : > { %v6001_v50 = vpop.f32.mrb[58].mxu0 }
 0xc17   : > { %v6005_v51 = vadd.f32 %v6001_v50, %v5928_v48  ;;  %v13959_v52 = vpop.f32.mrb[59].mxu0  ;;  %v6814_v48 = vld [vmem:[%s16312_s20 + $0x38] sm:$0x3f] }
 0xc18   : > { %v15455_v52 = vadd.s32 128, %v14669_v5 }
 0xc1a   : > { %v6078_v53 = vpop.f32.mrb[68].mxu1  ;;  %vm7567_vm7 = vcmp.eq.s32.totalorder %v15455_v52, %v14677_v9  ;;  %vm7568_vm8 = vcmp.eq.s32.totalorder %v15455_v52, %v14679_v11  ;;  %v7539_v9 = vadd.s32 40, %v14658_v3 }
 0xc1b   : > { %v6082_v54 = vadd.f32 %v6078_v53, %v6005_v51  ;;  %v13964_v55 = vpop.f32.mrb[69].mxu1  ;;  %v7547_v53 = vmul.u32 2, %v15019_v8  ;;  %vm15463_vm9 = vmpackc.low %vm7568_vm8, %vm7567_vm7 }
 0xc1c   : > { %v7550_v8 = vmul.u32 2, %v7539_v9 }
 0xc1d   : > { %v6089_v57 = vadd.f32 %v15270_v56, %v6082_v54  ;;  %v7548_v54 = vmul.u32 2, %v15022_v10 }
 0xc1e   : > { %v7560_v62 = vadd.s32 4, %v7550_v8 }
 0xc1f   : > { %6100 = vrot.lane.b32.xlu1 %v6089_v57, %s16430_s5  ;;  %v7557_v57 = vadd.s32 4, %v7547_v53 }
 0xc20   : > { %vm7575_vm14 = vcmp.eq.s32.totalorder %v14669_v5, %v7560_v62 }
 0xc21   : > { %vm7570_vm11 = vcmp.eq.s32.totalorder %v15455_v52, %v7557_v57  ;;  %vm7569_vm7 = vcmp.eq.s32.totalorder %v14669_v5, %v7557_v57 }
 0xc91   : > { %v6101_v58 = vpop.permute.xlu1 %6100 }
 0xc92   : > { %v6103_v59 = vsel %vm16356_vm6, 0.0, %v6101_v58  ;;  %v7558_v58 = vadd.s32 4, %v7548_v54 }
 0xc93   : > { %v6105_v60 = vsel %vm6104_vm15, %v6103_v59, 0.0  ;;  %v7538_v59 = vadd.s32 32, %v14658_v3 }
 0xc94   : > { %6261 = vrot.lane.b32.xlu0 %v6105_v60, %s16412_s11  ;;  %6107 = vrot.lane.b32.xlu1 %v6105_v60, %s16410_s29  ;;  %vm7572_vm12 = vcmp.eq.s32.totalorder %v15455_v52, %v7558_v58  ;;  %vm7571_vm8 = vcmp.eq.s32.totalorder %v14669_v5, %v7558_v58 }
 0xc95   : > { %13971 = vmatpush3.msk.msra.mxu1 %vm16360_vm1, %v6105_v60  ;;  %v7549_v11 = vmul.u32 2, %v7538_v59  ;;  %vm15477_vm15 = vmpackc.low %vm7572_vm12, %vm7570_vm11  ;;  %vm7576_vm12 = vcmp.eq.s32.totalorder %v15455_v52, %v7560_v62 }
 0xc96   : > { %13973 = vmatmul.mubr.msk.f32.vlgmr.msra.gmra.mrb[70].mxu1 %vm16359_vm2, %v6090_v61  ;;  %13980 = vmatprep.subr.mxu1 %v14452_v2  ;;  %vm15486_vm6 = vmpackc.low %vm7571_vm8, %vm7569_vm7 }
 0xc97   : > { %13982 = vmatprep.mubr.msk.f32.mxu1 %vm16362_vm0, %v14452_v2  ;;  %v7559_v61 = vadd.s32 4, %v7549_v11 }
 0xc98   : > { %6417 = vrot.lane.b32.xlu0 %v6105_v60, %s16415_s10  ;;  %6339 = vrot.lane.b32.xlu1 %v6105_v60, %s16414_s7 }
 0xc99   : > { %vm7574_vm11 = vcmp.eq.s32.totalorder %v15455_v52, %v7559_v61  ;;  %vm7573_vm8 = vcmp.eq.s32.totalorder %v14669_v5, %v7559_v61 }
 0xc9a   : > { %vm15497_vm7 = vmpackc.low %vm7576_vm12, %vm7574_vm11 }
 0xc9b   : > { %vm15506_vm5 = vmpackc.low %vm7575_vm14, %vm7573_vm8 }
 0xc9c   : > { %6573 = vrot.lane.b32.xlu0 %v6105_v60, %s16416_s30  ;;  %6495 = vrot.lane.b32.xlu1 %v6105_v60, %s16419_s8 }
 0xca0   : > { %6729 = vrot.lane.b32.xlu0 %v6105_v60, %s16426_s16  ;;  %6651 = vrot.lane.b32.xlu1 %v6105_v60, %s16411_s6 }
 0xca4   : > { %6975 = vrot.lane.b32.xlu0 %v15294_v0, %s16412_s11  ;;  %6823 = vrot.lane.b32.xlu1 %v15294_v0, %s16410_s29 }
 0xca8   : > { %7131 = vrot.lane.b32.xlu0 %v15294_v0, %s16415_s10  ;;  %7053 = vrot.lane.b32.xlu1 %v15294_v0, %s16414_s7 }
 0xcac   : > { %7287 = vrot.lane.b32.xlu0 %v15294_v0, %s16416_s30  ;;  %7209 = vrot.lane.b32.xlu1 %v15294_v0, %s16419_s8 }
 0xcb0   : > { %7443 = vrot.lane.b32.xlu0 %v15294_v0, %s16426_s16  ;;  %7365 = vrot.lane.b32.xlu1 %v15294_v0, %s16411_s6 }
 0xcb4   : > { %7525 = vperm.xlu1 %14368, %v7522_v6   ;;  %v7551_v6 = vmul.u32 2, %v7540_v63 }
 0xcce   : > { %879 = vxpose.xlu0.b32.start [1/2] (short) (narrow) %v877_v7, 8 }
 0xcd2   : > { %880 = vxpose.xlu0.b32.end [2/2] (short) (narrow) %v878_v14, 8 }
 0xd06   : > { %v6262_v16 = vpop.permute.xlu0 %6261  ;;  %v6108_v17 = vpop.permute.xlu1 %6107 }
 0xd07   : > { %13966 = vmatpush3.msk.msra.mxu0 %vm16360_vm1, %v6108_v17 }
 0xd08   : > { %13968 = vmatmul.mubr.msk.f32.vlgmr.msra.gmra.mrb[60].mxu0 %vm16359_vm2, %v6091_v15  ;;  %13975 = vmatprep.subr.mxu0 %v14452_v2 }
 0xd09   : > { %13976 = vmatpush3.msk.msra.mxu0 %vm16360_vm1, %v6262_v16  ;;  %13977 = vmatprep.mubr.msk.f32.mxu0 %vm16362_vm0, %v14452_v2  ;;  %v7561_v16 = vadd.s32 4, %v7551_v6 }
 0xd0a   : > { %v6418_v21 = vpop.permute.xlu0 %6417  ;;  %v6340_v22 = vpop.permute.xlu1 %6339  ;;  %13985 = vmatprep.subr.mxu0 %v14452_v2 }
 0xd0b   : > { %13981 = vmatpush3.msk.msra.mxu1 %vm16360_vm1, %v6340_v22  ;;  %vm7578_vm11 = vcmp.eq.s32.totalorder %v15455_v52, %v7561_v16  ;;  %vm7577_vm8 = vcmp.eq.s32.totalorder %v14669_v5, %v7561_v16 }
 0xd0c   : > { %13978 = vmatmul.mubr.msk.f32.vlgmr.msra.gmra.mrb[62].mxu0 %vm16359_vm2, %v6092_v4  ;;  %13983 = vmatmul.mubr.msk.f32.vlgmr.msra.gmra.mrb[72].mxu1 %vm16359_vm2, %v6093_v20  ;;  %v7542_v4 = vadd.s32 64, %v14658_v3  ;;  %v7543_v20 = vadd.s32 72, %v14658_v3 }
 0xd0d   : > { %13986 = vmatpush3.msk.msra.mxu0 %vm16360_vm1, %v6418_v21  ;;  %13990 = vmatprep.subr.mxu1 %v14452_v2 }
 0xd0e   : > { %v6574_v29 = vpop.permute.xlu0 %6573  ;;  %v6496_v33 = vpop.permute.xlu1 %6495  ;;  %13987 = vmatprep.mubr.msk.f32.mxu0 %vm16362_vm0, %v14452_v2  ;;  %13992 = vmatprep.mubr.msk.f32.mxu1 %vm16362_vm0, %v14452_v2  ;;  %v7553_v21 = vmul.u32 2, %v7542_v4  ;;  %v7554_v22 = vmul.u32 2, %v7543_v20 }
 0xd0f   : > { %13991 = vmatpush3.msk.msra.mxu1 %vm16360_vm1, %v6496_v33  ;;  %13995 = vmatprep.subr.mxu0 %v14452_v2 }
 0xd10   : > { %13988 = vmatmul.mubr.msk.f32.vlgmr.msra.gmra.mrb[64].mxu0 %vm16359_vm2, %v6094_v24  ;;  %13993 = vmatmul.mubr.msk.f32.vlgmr.msra.gmra.mrb[74].mxu1 %vm16359_vm2, %v6095_v27  ;;  %v16444_v24 = vmov 0  ;;  %v16446_v27 = vmov 0  ;;  %v7564_v33 = vadd.s32 4, %v7554_v22 }
 0xd11   : > { %13996 = vmatpush3.msk.msra.mxu0 %vm16360_vm1, %v6574_v29  ;;  %14000 = vmatprep.subr.mxu1 %v14452_v2  ;;  %v7563_v29 = vadd.s32 4, %v7553_v21 }
 0xd12   : > { %v6730_v36 = vpop.permute.xlu0 %6729  ;;  %v6652_v19 = vpop.permute.xlu1 %6651  ;;  %13997 = vmatprep.mubr.msk.f32.mxu0 %vm16362_vm0, %v14452_v2  ;;  %14002 = vmatprep.mubr.msk.f32.mxu1 %vm16362_vm0, %v14452_v2  ;;  %vm7583_vm4 = vcmp.eq.s32.totalorder %v14669_v5, %v7564_v33 }
 0xd13   : > { %14001 = vmatpush3.msk.msra.mxu1 %vm16360_vm1, %v6652_v19  ;;  %14005 = vmatprep.subr.mxu0 %v14452_v2 }
 0xd14   : > { %13998 = vmatmul.mubr.msk.f32.vlgmr.msra.gmra.mrb[66].mxu0 %vm16359_vm2, %v6096_v23  ;;  %14003 = vmatmul.mubr.msk.f32.vlgmr.msra.gmra.mrb[76].mxu1 %vm16359_vm2, %v6097_v35  ;;  %v7544_v23 = vadd.s32 80, %v14658_v3  ;;  %v7545_v35 = vadd.s32 88, %v14658_v3 }
 0xd15   : > { %14006 = vmatpush3.msk.msra.mxu0 %vm16360_vm1, %v6730_v36  ;;  %14010 = vmatprep.subr.mxu1 %v14452_v2 }
 0xd16   : > { %v6976_v37 = vpop.permute.xlu0 %6975  ;;  %v6824_v38 = vpop.permute.xlu1 %6823  ;;  %14007 = vmatprep.mubr.msk.f32.mxu0 %vm16362_vm0, %v14452_v2  ;;  %14012 = vmatprep.mubr.msk.f32.mxu1 %vm16362_vm0, %v14452_v2  ;;  %v7555_v36 = vmul.u32 2, %v7544_v23  ;;  %v7556_v19 = vmul.u32 2, %v7545_v35 }
 0xd17   : > { %14011 = vmatpush3.msk.msra.mxu1 %vm16360_vm1, %v6824_v38  ;;  %14015 = vmatprep.subr.mxu0 %v14452_v2  ;;  %v16452_v38 = vmov 0 }
 0xd18   : > { %14008 = vmatmul.mubr.msk.f32.vlgmr.msra.gmra.mrb[68].mxu0 %vm16359_vm2, %v6098_v25  ;;  %14013 = vmatmul.mubr.msk.f32.vlgmr.msra.gmra.mrb[78].mxu1 %vm16359_vm2, %v6808_v28  ;;  %v16448_v25 = vmov 0  ;;  %v7565_v28 = vadd.s32 4, %v7555_v36 }
 0xd19   : > { %14016 = vmatpush3.msk.msra.mxu0 %vm16360_vm1, %v15294_v0  ;;  %14020 = vmatprep.subr.mxu1 %v14452_v2  ;;  %v7541_v0 = vadd.s32 56, %v14658_v3  ;;  %v16450_v3 = vmov 0 }
 0xd1a   : > { %14021 = vmatpush3.msk.msra.mxu1 %vm16360_vm1, %v6976_v37  ;;  %v7132_v32 = vpop.permute.xlu0 %7131  ;;  %v7054_v39 = vpop.permute.xlu1 %7053  ;;  %14017 = vmatprep.mubr.msk.f32.mxu0 %vm16362_vm0, %v14452_v2  ;;  %v7566_v37 = vadd.s32 4, %v7556_v19 }
 0xd1b   : > { %14022 = vmatprep.mubr.msk.f32.mxu1 %vm16362_vm0, %v14452_v2  ;;  %14025 = vmatprep.subr.mxu0 %v14452_v2  ;;  %v7552_v7 = vmul.u32 2, %v7541_v0 }
 0xd1c   : > { %14030 = vmatprep.subr.mxu1 %v14452_v2  ;;  %14018 = vmatmul.mubr.msk.f32.vlgmr.msra.gmra.mrb[70].mxu0 %vm16359_vm2, %v6807_v30  ;;  %v16454_v30 = vmov 0 }
 0xd1d   : > { %14023 = vmatmul.mubr.msk.f32.vlgmr.msra.gmra.mrb[80].mxu1 %vm16359_vm2, %v6809_v40  ;;  %14026 = vmatpush3.msk.msra.mxu0 %vm16360_vm1, %v7054_v39  ;;  %v7562_v17 = vadd.s32 4, %v7552_v7 }
 0xd1e   : > { %14031 = vmatpush3.msk.msra.mxu1 %vm16360_vm1, %v7132_v32  ;;  %v7288_v42 = vpop.permute.xlu0 %7287  ;;  %v7210_v43 = vpop.permute.xlu1 %7209  ;;  %14027 = vmatprep.mubr.msk.f32.mxu0 %vm16362_vm0, %v14452_v2 }
 0xd1f   : > { %14032 = vmatprep.mubr.msk.f32.mxu1 %vm16362_vm0, %v14452_v2  ;;  %14035 = vmatprep.subr.mxu0 %v14452_v2  ;;  %vm7580_vm12 = vcmp.eq.s32.totalorder %v15455_v52, %v7562_v17 }
 0xd20   : > { %14040 = vmatprep.subr.mxu1 %v14452_v2  ;;  %14028 = vmatmul.mubr.msk.f32.vlgmr.msra.gmra.mrb[72].mxu0 %vm16359_vm2, %v6810_v41  ;;  %vm15517_vm14 = vmpackc.low %vm7580_vm12, %vm7578_vm11  ;;  %vm7582_vm11 = vcmp.eq.s32.totalorder %v15455_v52, %v7563_v29  ;;  %vm7584_vm12 = vcmp.eq.s32.totalorder %v15455_v52, %v7564_v33 }
 0xd21   : > { %14033 = vmatmul.mubr.msk.f32.vlgmr.msra.gmra.mrb[82].mxu1 %vm16359_vm2, %v6811_v44  ;;  %14036 = vmatpush3.msk.msra.mxu0 %vm16360_vm1, %v7210_v43  ;;  %v16445_v24 = vsel %vm15517_vm14, 4294967295, %v16444_v24 }
 0xd22   : > { %14041 = vmatpush3.msk.msra.mxu1 %vm16360_vm1, %v7288_v42  ;;  %v7366_v34 = vpop.permute.xlu1 %7365  ;;  %14037 = vmatprep.mubr.msk.f32.mxu0 %vm16362_vm0, %v14452_v2  ;;  %v7444_v47 = vpop.permute.xlu0 %7443 }
 0xd23   : > { %14042 = vmatprep.mubr.msk.f32.mxu1 %vm16362_vm0, %v14452_v2  ;;  %14045 = vmatprep.subr.mxu0 %v14452_v2 }
 0xd24   : > { %14050 = vmatprep.subr.mxu1 %v14452_v2  ;;  %14038 = vmatmul.mubr.msk.f32.vlgmr.msra.gmra.mrb[74].mxu0 %vm16359_vm2, %v6812_v45 }
 0xd25   : > { %14043 = vmatmul.mubr.msk.f32.vlgmr.msra.gmra.mrb[84].mxu1 %vm16359_vm2, %v6813_v46  ;;  %14046 = vmatpush3.msk.msra.mxu0 %vm16360_vm1, %v7366_v34 }
 0xd26   : > { %14051 = vmatpush3.msk.msra.mxu1 %vm16360_vm1, %v7444_v47  ;;  %14047 = vmatprep.mubr.msk.f32.mxu0 %vm16362_vm0, %v14452_v2 }
 0xd27   : > { %14052 = vmatprep.mubr.msk.f32.mxu1 %vm16362_vm0, %v14452_v2  ;;  %14180 = vmatprep.subr.msk.bf16.mxu0 %vm15463_vm9, %v14454_v13 }
 0xd28   : > { %14048 = vmatmul.mubr.msk.f32.vlgmr.msra.gmra.mrb[76].mxu0 %vm16359_vm2, %v6814_v48 }
 0xd29   : > { %14053 = vmatmul.mubr.msk.f32.vlgmr.msra.gmra.mrb[86].mxu1 %vm16359_vm2, %v6815_v49  ;;  %7701 = vmatprep.mubr.f32.mxu0 %v14452_v2  ;;  %vm7579_vm2 = vcmp.eq.s32.totalorder %v14669_v5, %v7562_v17 }
 0xd2a   : > { %7787 = vmatprep.mubr.f32.mxu1 %v14452_v2  ;;  %14182 = vmatpush1.bf16.msk.msra.mxu0 %vm14685_vm3, %v14454_v13  ;;  %vm15526_vm1 = vmpackc.low %vm7579_vm2, %vm7577_vm8  ;;  %vm7581_vm8 = vcmp.eq.s32.totalorder %v14669_v5, %v7563_v29 }
 0xd2b   : > { %14184 = vmatprep.subr.msk.bf16.mxu0 %vm15477_vm15, %v14454_v13  ;;  %v16447_v27 = vsel %vm15526_vm1, 4294967295, %v16446_v27  ;;  %vm15537_vm2 = vmpackc.low %vm7584_vm12, %vm7582_vm11  ;;  %vm7586_vm11 = vcmp.eq.s32.totalorder %v15455_v52, %v7565_v28  ;;  %vm7588_vm12 = vcmp.eq.s32.totalorder %v15455_v52, %v7566_v37 }
 0xd2c   : > { %v16449_v25 = vsel %vm15537_vm2, 4294967295, %v16448_v25  ;;  %vm15546_vm0 = vmpackc.low %vm7583_vm4, %vm7581_vm8  ;;  %vm7587_vm4 = vcmp.eq.s32.totalorder %v14669_v5, %v7566_v37 }
 0xd2d   : > { %v16451_v3 = vsel %vm15546_vm0, 4294967295, %v16450_v3 }
 0xd2e   : > { %14186 = vmatpush1.bf16.msk.msra.mxu0 %vm15486_vm6, %v14454_v13 }
 0xd2f   : > { %14188 = vmatprep.subr.msk.bf16.mxu0 %vm15497_vm7, %v14454_v13 }
 0xd32   : > { %14190 = vmatpush1.bf16.msk.msra.mxu0 %vm15506_vm5, %v14454_v13 }
 0xd33   : > { %14192 = vmatprep.subr.msk.bf16.mxu0 %vm15517_vm14, %v14454_v13  ;;  %vm16374_vm14 = vcmask 1031168  }
 0xd36   : > { %14194 = vmatpush1.bf16.msk.msra.mxu0 %vm15526_vm1, %v14454_v13  ;;  %vm15555_vm1 = vmpackc.low %vm7588_vm12, %vm7586_vm11  ;;  %vm16456_vm11 = vmmov 0   ;;  %vm16457_vm12 = vcmask 130048  }
 0xd37   : > { %14196 = vmatprep.subr.msk.bf16.mxu0 %vm15537_vm2, %v14454_v13  ;;  %v16453_v38 = vsel %vm15555_vm1, 4294967295, %v16452_v38  ;;  %vm7585_vm2 = vcmp.eq.s32.totalorder %v14669_v5, %v7565_v28 }
 0xd38   : > { %vm15564_vm8 = vmpackc.low %vm7587_vm4, %vm7585_vm2  ;;  %vm16366_vm2 = vcmask 785408   ;;  %vm16371_vm4 = vcmask 1039360  }
 0xd39   : > { %v16455_v30 = vsel %vm15564_vm8, 4294967295, %v16454_v30 }
 0xd3a   : > { %14198 = vmatpush1.bf16.msk.msra.mxu0 %vm15546_vm0, %v14454_v13 }
 0xd3b   : > { %14200 = vmatprep.subr.msk.bf16.mxu0 %vm15555_vm1, %v14454_v13 }
 0xd3e   : > { %14202 = vmatpush1.bf16.msk.msra.mxu0 %vm15564_vm8, %v14454_v13  ;;  %vm16460_vm8 = vcmask 48128  }
 0xd3f   : > { %14203 = vmatprep.subr.bf16.mxu0 %v14451_v1 }
 0xd69   : > { %v15452_v50 = vpop.f32.mrb[70].mxu1 }
 0xd6a   : > { %v13974_v51 = vpop.f32.mrb[71].mxu1 }
 0xddb   : > { %v6182_v32 = vpop.f32.mrb[60].mxu0 }
 0xddc   : > { %v6258_v39 = vadd.f32 %v15452_v50, %v6182_v32  ;;  %v13969_v40 = vpop.f32.mrb[61].mxu0 }
 0xddf   : > { %v6334_v41 = vpop.f32.mrb[62].mxu0  ;;  %v6412_v5 = vpop.f32.mrb[72].mxu1 }
 0xde0   : > { %v6338_v42 = vadd.f32 %v6334_v41, %v6258_v39  ;;  %v13979_v43 = vpop.f32.mrb[63].mxu0  ;;  %v13984_v44 = vpop.f32.mrb[73].mxu1 }
 0xde1   : > { %v7526_v43 = vpop.permute.xlu1 %7525 }
 0xde2   : > { %v6416_v45 = vadd.f32 %v6412_v5, %v6338_v42 }
 0xde3   : > { %v6490_v34 = vpop.f32.mrb[64].mxu0  ;;  %v6568_v46 = vpop.f32.mrb[74].mxu1 }
 0xde4   : > { %v6494_v47 = vadd.f32 %v6490_v34, %v6416_v45  ;;  %v13989_v48 = vpop.f32.mrb[65].mxu0  ;;  %v13994_v49 = vpop.f32.mrb[75].mxu1 }
 0xde5   : > { %v895_v34 = vpop.trf.xlu0 }
 0xde6   : > { %v6572_v51 = vadd.f32 %v6568_v46, %v6494_v47 }
 0xde7   : > { %v6646_v52 = vpop.f32.mrb[66].mxu0  ;;  %v6724_v53 = vpop.f32.mrb[76].mxu1 }
 0xde8   : > { %v6650_v54 = vadd.f32 %v6646_v52, %v6572_v51  ;;  %v13999_v57 = vpop.f32.mrb[67].mxu0  ;;  %v14004_v58 = vpop.f32.mrb[77].mxu1 }
 0xdea   : > { %v6728_v59 = vadd.f32 %v6724_v53, %v6650_v54  ;;  %v7531_v53 = vld [vmem:[%s16306_s14 + $0x4] sm:$0xf] }
 0xdeb   : > { %v6802_v50 = vpop.f32.mrb[68].mxu0  ;;  %v6896_v9 = vpop.f32.mrb[78].mxu1 }
 0xdec   : > { %v6806_v11 = vadd.f32 %v6802_v50, %v6728_v59  ;;  %v14009_v8 = vpop.f32.mrb[69].mxu0  ;;  %v14014_v61 = vpop.f32.mrb[79].mxu1  ;;  %v7530_v59 = vld [vmem:[%s16306_s14] sm:$0xf] }
 0xded   : > { %v7532_v8 = vld [vmem:[%s16306_s14 + $0x8] sm:$0xf] }
 0xdef   : > { %v6971_v62 = vpop.f32.mrb[70].mxu0 }
 0xdf0   : > { %v6972_v63 = vadd.f32 %v6971_v62, %v6896_v9  ;;  %v14019_v0 = vpop.f32.mrb[71].mxu0  ;;  %v7048_v6 = vpop.f32.mrb[80].mxu1 }
 0xdf1   : > { %v14024_v7 = vpop.f32.mrb[81].mxu1  ;;  %v7533_v0 = vld [vmem:[%s16306_s14 + $0xc] sm:$0xf] }
 0xdf2   : > { %v7052_v16 = vadd.f32 %v7048_v6, %v6972_v63 }
 0xdf3   : > { %v7126_v17 = vpop.f32.mrb[72].mxu0 }
 0xdf4   : > { %v7130_v4 = vadd.f32 %v7126_v17, %v7052_v16  ;;  %v14029_v20 = vpop.f32.mrb[73].mxu0  ;;  %v7204_v21 = vpop.f32.mrb[82].mxu1  ;;  %v7534_v17 = vld [vmem:[%s16306_s14 + $0x10] sm:$0xf] }
 0xdf5   : > { %v14034_v22 = vpop.f32.mrb[83].mxu1 }
 0xdf6   : > { %v7208_v29 = vadd.f32 %v7204_v21, %v7130_v4 }
 0xdf7   : > { %v7282_v33 = vpop.f32.mrb[74].mxu0 }
 0xdf8   : > { %v7286_v23 = vadd.f32 %v7282_v33, %v7208_v29  ;;  %v14039_v35 = vpop.f32.mrb[75].mxu0  ;;  %v7360_v36 = vpop.f32.mrb[84].mxu1  ;;  %v7535_v29 = vld [vmem:[%s16306_s14 + $0x14] sm:$0xf] }
 0xdf9   : > { %v14044_v19 = vpop.f32.mrb[85].mxu1 }
 0xdfa   : > { %v7364_v28 = vadd.f32 %v7360_v36, %v7286_v23  ;;  %v7536_v36 = vld [vmem:[%s16306_s14 + $0x18] sm:$0xf]  ;;  %v14370_v19 = vld [vmem:[%s16407_s0 + $0x8] sm:$0xff] }
 0xdfb   : > { %v7438_v37 = vpop.f32.mrb[76].mxu0 }
 0xdfc   : > { %v7442_v32 = vadd.f32 %v7438_v37, %v7364_v28  ;;  %v14049_v39 = vpop.f32.mrb[77].mxu0  ;;  %v7516_v40 = vpop.f32.mrb[86].mxu1 }
 0xdfd   : > { %v14054_v41 = vpop.f32.mrb[87].mxu1 }
 0xdfe   : > { %v7520_v5 = vadd.f32 %v7516_v40, %v7442_v32  ;;  %v14371_v32 = vld [vmem:[%s16407_s0] sm:$0xff]  ;;  %v7537_v40 = vld [vmem:[%s16306_s14 + $0x1c] sm:$0xf] }
 0xdff   : > { %v14372_v41 = vld [vmem:[%s16407_s0 + $0x18] sm:$0xff] }
 0xe00   : > { %v7521_v42 = vadd.f32 %v7520_v5, %v6806_v11 }
 0xe02   : > { %v7528_v44 = vadd.f32 %v7526_v43, %v7521_v42  ;;  %v14373_v42 = vld [vmem:[%s16407_s0 + $0x10] sm:$0xff] }
 0xe04   : > { %v7529_v45 = vmax.f32 %v7528_v44, 0.0  ;;  %v14374_v44 = vld [vmem:[%s16407_s0 + $0x28] sm:$0xff] }
 0xe06   : > { %13215 = vmatmul.mubr.msk.f32.vlgmr.msra.gmra.mrb[78].mxu0 %vm16366_vm2, %v7529_v45 }
 0xe07   : > { %14205 = vmatpush3.bf16.msk.msra.mxu0 %vm14685_vm3, %v14454_v13  ;;  %14059 = vmatprep.mubr.msk.f32.mxu0 %vm16456_vm11, %v14452_v2 }
 0xe08   : > { %14062 = vmatprep.subr.mxu0 %v14452_v2 }
 0xe0a   : > { %14060 = vmatmul.mubr.msk.f32.vlgmr.msra.gmra.mrb[80].mxu0 %vm16457_vm12, %v895_v34  ;;  %vm16458_vm12 = vcmask 1045504   ;;  %v14375_v34 = vld [vmem:[%s16407_s0 + $0x20] sm:$0xff] }
 0xe0b   : > { %14064 = vmatprep.mubr.msk.f32.mxu0 %vm16456_vm11, %v14452_v2  ;;  %vm16459_vm2 = vmmov %vm16458_vm12 }
 0xe0c   : > { %vm16461_vm1 = vmmov %vm16459_vm2 }
 0xe0d   : > { %vm16462_vm0 = vmmov %vm16461_vm1 }
 0xed9   : > { %v7703_v46 = vpop.f32.mrb[78].mxu0 }
 0xeda   : > { %7710 = vrot.lane.b32.xlu1 %v7703_v46, %s16410_s29  ;;  %v7705_v47 = vpop.f32.mrb[79].mxu0  ;;  %8130 = vrot.lane.b32.xlu0 %v7703_v46, %s16419_s8 }
 0xedd   : > { %v15585_v48 = vpop.f32.mrb[80].mxu0 }
 0xede   : > { %7712 = vrot.lane.b32.xlu1 %v7705_v47, %s16410_s29  ;;  %v14061_v49 = vpop.f32.mrb[81].mxu0  ;;  %8909 = vrot.lane.b32.xlu0 %v15585_v48, %s16416_s30 }
 0xee2   : > { %7872 = vrot.lane.b32.xlu1 %v7703_v46, %s16412_s11 }
 0xee6   : > { %7958 = vrot.lane.b32.xlu1 %v7703_v46, %s16414_s7 }
 0xeea   : > { %7874 = vrot.lane.b32.xlu1 %v7705_v47, %s16412_s11 }
 0xeee   : > { %8044 = vrot.lane.b32.xlu1 %v7703_v46, %s16415_s10 }
 0xef2   : > { %7960 = vrot.lane.b32.xlu1 %v7705_v47, %s16414_s7 }
 0xef6   : > { %8216 = vrot.lane.b32.xlu1 %v7703_v46, %s16416_s30 }
 0xefa   : > { %8046 = vrot.lane.b32.xlu1 %v7705_v47, %s16415_s10 }
 0xefe   : > { %8302 = vrot.lane.b32.xlu1 %v7703_v46, %s16411_s6 }
 0xf02   : > { %8132 = vrot.lane.b32.xlu1 %v7705_v47, %s16419_s8 }
 0xf06   : > { %8218 = vrot.lane.b32.xlu1 %v7705_v47, %s16416_s30 }
 0xf0a   : > { %8304 = vrot.lane.b32.xlu1 %v7705_v47, %s16411_s6 }
 0xf0e   : > { %8470 = vrot.lane.b32.xlu1 %v15585_v48, %s16410_s29 }
 0xf12   : > { %8613 = vrot.lane.b32.xlu1 %v15585_v48, %s16412_s11 }
 0xf16   : > { %8687 = vrot.lane.b32.xlu1 %v15585_v48, %s16414_s7 }
 0xf1a   : > { %8761 = vrot.lane.b32.xlu1 %v15585_v48, %s16415_s10 }
 0xf1e   : > { %8835 = vrot.lane.b32.xlu1 %v15585_v48, %s16419_s8 }
 0xf22   : > { %8983 = vrot.lane.b32.xlu1 %v15585_v48, %s16411_s6 }
 0xf4c   : > { %v7711_v51 = vpop.permute.xlu1 %7710  ;;  %v8131_v4 = vpop.permute.xlu0 %8130 }
 0xf50   : > { %v7713_v52 = vpop.permute.xlu1 %7712  ;;  %v8910_v45 = vpop.permute.xlu0 %8909 }
 0xf51   : > { %v7715_v54 = vsel %vm16371_vm4, %v7711_v51, %v7713_v52  ;;  %13216 = vmatprep.subr.msk.mxu1 %vm16458_vm12, %v7713_v52  ;;  %vm16463_vm4 = vmmov %vm16460_vm8 }
 0xf52   : > { %13217 = vmatpush1.msk.msra.mxu1 %vm16459_vm2, %v7715_v54  ;;  %vm16466_vm2 = vmmov %vm16463_vm4 }
 0xf53   : > { %13218 = vmatmul.mubr.msk.f32.vlgmr.msra.gmra.mrb[88].mxu1 %vm16460_vm8, %v7531_v53  ;;  %13219 = vmatprep.subr.msk.mxu1 %vm16461_vm1, %v7705_v47  ;;  %vm16464_vm8 = vmmov %vm16462_vm0  ;;  %v14376_v47 = vld [vmem:[%s16407_s0 + $0x38] sm:$0xff] }
 0xf54   : > { %13220 = vmatpush1.msk.msra.mxu1 %vm16462_vm0, %v7703_v46  ;;  %v7873_v57 = vpop.permute.xlu1 %7872  ;;  %7865 = vmatprep.mubr.f32.mxu1 %v14452_v2  ;;  %vm16465_vm1 = vmmov %vm16462_vm0  ;;  %vm16372_vm0 = vcmask 1022976  }
 0xf55   : > { %vm16468_vm12 = vmmov %vm16465_vm1 }
 0xf58   : > { %v7959_v58 = vpop.permute.xlu1 %7958 }
 0xf5b   : > { %13221 = vmatmul.mubr.msk.f32.vlgmr.msra.gmra.mrb[88].mxu1 %vm16463_vm4, %v7530_v59  ;;  %vm16467_vm4 = vmmov %vm16465_vm1 }
 0xf5c   : > { %v7875_v50 = vpop.permute.xlu1 %7874  ;;  %7949 = vmatprep.mubr.f32.mxu1 %v14452_v2 }
 0xf5d   : > { %v7877_v9 = vsel %vm16374_vm14, %v7873_v57, %v7875_v50  ;;  %13222 = vmatprep.subr.msk.mxu1 %vm16464_vm8, %v7875_v50  ;;  %vm16373_vm8 = vcmask 1014784  }
 0xf5e   : > { %13223 = vmatpush1.msk.msra.mxu1 %vm16465_vm1, %v7877_v9  ;;  %vm16469_vm1 = vmmov %vm16466_vm2 }
 0xf60   : > { %v8045_v11 = vpop.permute.xlu1 %8044 }
 0xf63   : > { %13224 = vmatmul.mubr.msk.f32.vlgmr.msra.gmra.mrb[88].mxu1 %vm16466_vm2, %v7532_v8  ;;  %vm16470_vm2 = vmmov %vm16467_vm4 }
 0xf64   : > { %v7961_v61 = vpop.permute.xlu1 %7960  ;;  %8035 = vmatprep.mubr.f32.mxu1 %v14452_v2 }
 0xf65   : > { %v7963_v62 = vsel %vm16372_vm0, %v7959_v58, %v7961_v61  ;;  %13225 = vmatprep.subr.msk.mxu1 %vm16467_vm4, %v7961_v61  ;;  %vm16471_vm0 = vmmov %vm16470_vm2  ;;  %vm8134_vm4 = vcmask 1006592  }
 0xf66   : > { %13226 = vmatpush1.msk.msra.mxu1 %vm16468_vm12, %v7963_v62  ;;  %vm16472_vm12 = vmmov %vm16469_vm1 }
 0xf67   : > { %vm16475_vm14 = vmmov %vm16471_vm0 }
 0xf68   : > { %v8217_v63 = vpop.permute.xlu1 %8216 }
 0xf6b   : > { %13227 = vmatmul.mubr.msk.f32.vlgmr.msra.gmra.mrb[88].mxu1 %vm16469_vm1, %v7533_v0  ;;  %vm16473_vm1 = vmmov %vm16471_vm0 }
 0xf6c   : > { %v8047_v6 = vpop.permute.xlu1 %8046  ;;  %8121 = vmatprep.mubr.f32.mxu1 %v14452_v2 }
 0xf6d   : > { %v8049_v7 = vsel %vm16373_vm8, %v8045_v11, %v8047_v6  ;;  %13228 = vmatprep.subr.msk.mxu1 %vm16470_vm2, %v8047_v6  ;;  %vm16474_vm8 = vmmov %vm16471_vm0  ;;  %vm8220_vm2 = vcmask 998400  }
 0xf6e   : > { %13229 = vmatpush1.msk.msra.mxu1 %vm16471_vm0, %v8049_v7 }
 0xf70   : > { %v8303_v16 = vpop.permute.xlu1 %8302 }
 0xf73   : > { %13230 = vmatmul.mubr.msk.f32.vlgmr.msra.gmra.mrb[88].mxu1 %vm16472_vm12, %v7534_v17 }
 0xf74   : > { %v8133_v20 = vpop.permute.xlu1 %8132  ;;  %8207 = vmatprep.mubr.f32.mxu1 %v14452_v2 }
 0xf75   : > { %v8135_v21 = vsel %vm8134_vm4, %v8131_v4, %v8133_v20  ;;  %13231 = vmatprep.subr.msk.mxu1 %vm16473_vm1, %v8133_v20  ;;  %vm16476_vm1 = vmmov %vm16471_vm0 }
 0xf76   : > { %13232 = vmatpush1.msk.msra.mxu1 %vm16474_vm8, %v8135_v21  ;;  %vm8306_vm8 = vcmask 990208  }
 0xf78   : > { %v8219_v22 = vpop.permute.xlu1 %8218 }
 0xf79   : > { %v8221_v33 = vsel %vm8220_vm2, %v8217_v63, %v8219_v22  ;;  %13234 = vmatprep.subr.msk.mxu1 %vm16471_vm0, %v8219_v22  ;;  %vm16477_vm0 = vcmask 64512  }
 0xf7b   : > { %13233 = vmatmul.mubr.msk.f32.vlgmr.msra.gmra.mrb[88].mxu1 %vm16472_vm12, %v7535_v29 }
 0xf7c   : > { %13235 = vmatpush1.msk.msra.mxu1 %vm16475_vm14, %v8221_v33  ;;  %v8305_v23 = vpop.permute.xlu1 %8304  ;;  %8293 = vmatprep.mubr.f32.mxu1 %v14452_v2  ;;  %vm16478_vm14 = vmmov %vm16472_vm12 }
 0xf7d   : > { %13237 = vmatprep.subr.msk.mxu1 %vm16476_vm1, %v8305_v23  ;;  %v8307_v28 = vsel %vm8306_vm8, %v8303_v16, %v8305_v23  ;;  %vm16479_vm12 = vmmov %vm16476_vm1  ;;  %v14378_v23 = vld [vmem:[%s16432_s18 + $0x8] sm:$0x3f] }
 0xf7e   : > { %vm16480_vm1 = vmmov %vm16477_vm0 }
 0xf80   : > { %v8471_v35 = vpop.permute.xlu1 %8470 }
 0xf81   : > { %14063 = vmatpush3.msra.mxu0 %v8471_v35 }
 0xf82   : > { %14067 = vmatprep.subr.mxu0 %v14452_v2  ;;  %14065 = vmatmul.mubr.msk.f32.vlgmr.msra.gmra.mrb[82].mxu0 %vm16477_vm0, %v14370_v19  ;;  %v14379_v19 = vld [vmem:[%s16432_s18 + $0x10] sm:$0x3f] }
 0xf83   : > { %13236 = vmatmul.mubr.msk.f32.vlgmr.msra.gmra.mrb[88].mxu1 %vm16478_vm14, %v7536_v36  ;;  %14068 = vmatpush3.msra.mxu0 %v15585_v48  ;;  %v14377_v48 = vld [vmem:[%s16407_s0 + $0x30] sm:$0xff] }
 0xf84   : > { %13238 = vmatpush1.msk.msra.mxu1 %vm16479_vm12, %v8307_v28  ;;  %v8614_v37 = vpop.permute.xlu1 %8613  ;;  %14069 = vmatprep.mubr.msk.f32.mxu0 %vm16456_vm11, %v14452_v2  ;;  %vm16481_vm12 = vmmov %vm16477_vm0  ;;  %v14380_v28 = vld [vmem:[%s16432_s18] sm:$0x3f] }
 0xf85   : > { %14077 = vmatprep.subr.mxu0 %v14452_v2  ;;  %8379 = vmatprep.mubr.f32.mxu1 %v14452_v2 }
 0xf86   : > { %14070 = vmatmul.mubr.msk.f32.vlgmr.msra.gmra.mrb[84].mxu0 %vm16480_vm1, %v14371_v32  ;;  %14072 = vmatprep.subr.mxu1 %v14452_v2  ;;  %vm16482_vm1 = vmmov %vm16477_vm0 }
 0xf87   : > { %14079 = vmatprep.mubr.msk.f32.mxu0 %vm16456_vm11, %v14452_v2 }
 0xf88   : > { %v8688_v39 = vpop.permute.xlu1 %8687 }
 0xf89   : > { %14078 = vmatpush3.msra.mxu0 %v8688_v39  ;;  %v14381_v39 = vld [vmem:[%s16432_s18 + $0x20] sm:$0x3f] }
 0xf8a   : > { %14080 = vmatmul.mubr.msk.f32.vlgmr.msra.gmra.mrb[86].mxu0 %vm16477_vm0, %v14372_v41  ;;  %14087 = vmatprep.subr.mxu0 %v14452_v2 }
 0xf8b   : > { %13239 = vmatmul.mubr.msk.f32.vlgmr.msra.gmra.mrb[88].mxu1 %vm16478_vm14, %v7537_v40  ;;  %14089 = vmatprep.mubr.msk.f32.mxu0 %vm16456_vm11, %v14452_v2  ;;  %vm16483_vm14 = vmmov %vm16477_vm0  ;;  %v14382_v40 = vld [vmem:[%s16432_s18 + $0x18] sm:$0x3f] }
 0xf8c   : > { %14073 = vmatpush3.msra.mxu1 %v8614_v37  ;;  %v8762_v5 = vpop.permute.xlu1 %8761  ;;  %14074 = vmatprep.mubr.msk.f32.mxu1 %vm16456_vm11, %v14452_v2 }
 0xf8d   : > { %14082 = vmatprep.subr.mxu1 %v14452_v2 }
 0xf8f   : > { %14075 = vmatmul.mubr.msk.f32.vlgmr.msra.gmra.mrb[90].mxu1 %vm16481_vm12, %v14373_v42  ;;  %vm16484_vm12 = vmmov %vm16477_vm0  ;;  %v14383_v42 = vld [vmem:[%s16432_s18 + $0x30] sm:$0x3f] }
 0xf90   : > { %14083 = vmatpush3.msra.mxu1 %v8762_v5  ;;  %v8836_v43 = vpop.permute.xlu1 %8835  ;;  %14084 = vmatprep.mubr.msk.f32.mxu1 %vm16456_vm11, %v14452_v2 }
 0xf91   : > { %14088 = vmatpush3.msra.mxu0 %v8836_v43  ;;  %14092 = vmatprep.subr.mxu1 %v14452_v2  ;;  %v14384_v43 = vld [vmem:[%s16432_s18 + $0x28] sm:$0x3f] }
 0xf92   : > { %14090 = vmatmul.mubr.msk.f32.vlgmr.msra.gmra.mrb[88].mxu0 %vm16482_vm1, %v14374_v44  ;;  %14097 = vmatprep.subr.mxu0 %v14452_v2  ;;  %vm16487_vm1 = vmmov %vm16477_vm0  ;;  %v14385_v44 = vld [vmem:[%s16432_s18 + $0x40] sm:$0x3f] }
 0xf93   : > { %14085 = vmatmul.mubr.msk.f32.vlgmr.msra.gmra.mrb[92].mxu1 %vm16477_vm0, %v14375_v34  ;;  %14099 = vmatprep.mubr.msk.f32.mxu0 %vm16456_vm11, %v14452_v2 }
 0xf94   : > { %14093 = vmatpush3.msra.mxu1 %v8910_v45  ;;  %v8984_v46 = vpop.permute.xlu1 %8983  ;;  %14094 = vmatprep.mubr.msk.f32.mxu1 %vm16456_vm11, %v14452_v2  ;;  %v14386_v45 = vld [vmem:[%s16432_s18 + $0x38] sm:$0x3f] }
 0xf95   : > { %14098 = vmatpush3.msra.mxu0 %v8984_v46  ;;  %14206 = vmatprep.subr.bf16.mxu1 %v14451_v1 }
 0xf96   : > { %14100 = vmatmul.mubr.msk.f32.vlgmr.msra.gmra.mrb[90].mxu0 %vm16483_vm14, %v14376_v47  ;;  %14113 = vmatprep.subr.mxu0 %v14452_v2  ;;  %vm16488_vm14 = vmmov %vm16477_vm0 }
 0xf97   : > { %14095 = vmatmul.mubr.msk.f32.vlgmr.msra.gmra.mrb[94].mxu1 %vm16484_vm12, %v14377_v48  ;;  %14115 = vmatprep.mubr.msk.f32.mxu0 %vm16456_vm11, %v14452_v2  ;;  %vm16489_vm12 = vmmov %vm16477_vm0 }
 0xf98   : > { %14208 = vmatpush3.bf16.msk.msra.mxu1 %vm15028_vm10, %v14454_v13  ;;  %14110 = vmatprep.mubr.msk.f32.mxu1 %vm16456_vm11, %v14452_v2  ;;  %vm16485_vm10 = vcmask 261120  }
 0xf99   : > { %14209 = vmatprep.subr.bf16.mxu1 %v14451_v1 }
 0xf9c   : > { %14211 = vmatpush3.bf16.msk.msra.mxu1 %vm15038_vm13, %v14454_v13  ;;  %vm16486_vm13 = vmmov %vm16477_vm0 }
 0xf9d   : > { %14123 = vmatprep.subr.mxu1 %v14452_v2 }
0x1055   : > { %v8539_v49 = vpop.f32.mrb[82].mxu0 }
0x1056   : > { %v14066_v51 = vpop.f32.mrb[83].mxu0 }
0x1059   : > { %v8609_v52 = vpop.f32.mrb[84].mxu0 }
0x105a   : > { %v8610_v53 = vadd.f32 %v8609_v52, %v8539_v49  ;;  %v14071_v54 = vpop.f32.mrb[85].mxu0 }
0x105d   : > { %v8756_v57 = vpop.f32.mrb[86].mxu0 }
0x105e   : > { %v15743_v58 = vpop.f32.mrb[88].mxu1  ;;  %v14081_v18 = vpop.f32.mrb[87].mxu0 }
0x105f   : > { %v15745_v59 = vpop.f32.mrb[89].mxu1 }
0x1062   : > { %v8682_v50 = vpop.f32.mrb[90].mxu1 }
0x1063   : > { %v8686_v9 = vadd.f32 %v8682_v50, %v8610_v53  ;;  %v14076_v1 = vpop.f32.mrb[91].mxu1 }
0x1065   : > { %v8760_v11 = vadd.f32 %v8756_v57, %v8686_v9  ;;  %v8904_v8 = vpop.f32.mrb[88].mxu0 }
0x1066   : > { %v8830_v31 = vpop.f32.mrb[92].mxu1  ;;  %v14091_v61 = vpop.f32.mrb[89].mxu0 }
0x1067   : > { %v8834_v62 = vadd.f32 %v8830_v31, %v8760_v11  ;;  %v14086_v63 = vpop.f32.mrb[93].mxu1 }
0x1069   : > { %v8908_v0 = vadd.f32 %v8904_v8, %v8834_v62  ;;  %v9052_v6 = vpop.f32.mrb[90].mxu0  ;;  %v9795_v62 = vld [vmem:[%s16304_s12 + $0x4] sm:$0xf] }
0x106a   : > { %v8978_v7 = vpop.f32.mrb[94].mxu1  ;;  %v14101_v16 = vpop.f32.mrb[91].mxu0 }
0x106b   : > { %v8982_v17 = vadd.f32 %v8978_v7, %v8908_v0  ;;  %v14096_v4 = vpop.f32.mrb[95].mxu1  ;;  %v9794_v7 = vld [vmem:[%s16304_s12] sm:$0xf] }
0x106d   : > { %v9056_v20 = vadd.f32 %v9052_v6, %v8982_v17 }
0x106f   : > { %v9057_v21 = vadd.f32 %v9056_v20, %v14860_v26  ;;  %v9796_v20 = vld [vmem:[%s16304_s12 + $0x8] sm:$0xf] }
0x1071   : > { %14111 = vmatmul.mubr.msk.f32.vlgmr.msra.gmra.mrb[96].mxu1 %vm16485_vm10, %v9057_v21  ;;  %vm16490_vm10 = vmmov %vm16477_vm0 }
0x1072   : > { %14125 = vmatprep.mubr.msk.f32.mxu1 %vm16456_vm11, %v14452_v2 }
0x1144   : > { %v9127_v22 = vpop.f32.mrb[96].mxu1 }
0x1145   : > { %9275 = vrot.lane.b32.xlu1 %v9127_v22, %s16412_s11  ;;  %9132 = vrot.lane.b32.xlu0 %v9127_v22, %s16410_s29  ;;  %v14112_v29 = vpop.f32.mrb[97].mxu1 }
0x1149   : > { %9423 = vrot.lane.b32.xlu1 %v9127_v22, %s16415_s10  ;;  %9349 = vrot.lane.b32.xlu0 %v9127_v22, %s16414_s7 }
0x114d   : > { %9571 = vrot.lane.b32.xlu1 %v9127_v22, %s16416_s30  ;;  %9497 = vrot.lane.b32.xlu0 %v9127_v22, %s16419_s8 }
0x1151   : > { %9719 = vrot.lane.b32.xlu1 %v9127_v22, %s16426_s16  ;;  %9645 = vrot.lane.b32.xlu0 %v9127_v22, %s16411_s6 }
0x11b7   : > { %v9276_v26 = vpop.permute.xlu1 %9275  ;;  %v9133_v33 = vpop.permute.xlu0 %9132 }
0x11b8   : > { %14114 = vmatpush3.msra.mxu0 %v9133_v33  ;;  %14124 = vmatpush3.msra.mxu1 %v9276_v26  ;;  %v9797_v26 = vld [vmem:[%s16304_s12 + $0xc] sm:$0xf] }
0x11b9   : > { %14116 = vmatmul.mubr.msk.f32.vlgmr.msra.gmra.mrb[92].mxu0 %vm16486_vm13, %v14378_v23  ;;  %14118 = vmatprep.subr.mxu0 %v14452_v2  ;;  %vm16491_vm13 = vmmov %vm16477_vm0 }
0x11ba   : > { %14119 = vmatpush3.msra.mxu0 %v9127_v22  ;;  %14133 = vmatprep.subr.mxu1 %v14452_v2 }
0x11bb   : > { %v9424_v35 = vpop.permute.xlu1 %9423  ;;  %v9350_v36 = vpop.permute.xlu0 %9349  ;;  %14120 = vmatprep.mubr.msk.f32.mxu0 %vm16456_vm11, %v14452_v2  ;;  %14126 = vmatmul.mubr.msk.f32.vlgmr.msra.gmra.mrb[98].mxu1 %vm16487_vm1, %v14379_v19  ;;  %vm16492_vm1 = vmmov %vm16477_vm0 }
0x11bc   : > { %14128 = vmatprep.subr.mxu0 %v14452_v2  ;;  %14134 = vmatpush3.msra.mxu1 %v9424_v35 }
0x11bd   : > { %14121 = vmatmul.mubr.msk.f32.vlgmr.msra.gmra.mrb[94].mxu0 %vm16477_vm0, %v14380_v28  ;;  %14135 = vmatprep.mubr.msk.f32.mxu1 %vm16456_vm11, %v14452_v2 }
0x11be   : > { %14129 = vmatpush3.msra.mxu0 %v9350_v36  ;;  %14143 = vmatprep.subr.mxu1 %v14452_v2  ;;  %v9798_v36 = vld [vmem:[%s16304_s12 + $0x10] sm:$0xf] }
0x11bf   : > { %v9572_v37 = vpop.permute.xlu1 %9571  ;;  %v9498_v32 = vpop.permute.xlu0 %9497  ;;  %14130 = vmatprep.mubr.msk.f32.mxu0 %vm16456_vm11, %v14452_v2  ;;  %14136 = vmatmul.mubr.msk.f32.vlgmr.msra.gmra.mrb[100].mxu1 %vm16488_vm14, %v14381_v39  ;;  %vm16500_vm14 = vcmask 1039360  }
0x11c0   : > { %14138 = vmatprep.subr.mxu0 %v14452_v2  ;;  %14144 = vmatpush3.msra.mxu1 %v9572_v37 }
0x11c1   : > { %14131 = vmatmul.mubr.msk.f32.vlgmr.msra.gmra.mrb[96].mxu0 %vm16489_vm12, %v14382_v40  ;;  %14145 = vmatprep.mubr.msk.f32.mxu1 %vm16456_vm11, %v14452_v2  ;;  %vm16501_vm12 = vcmask 1045504  }
0x11c2   : > { %14139 = vmatpush3.msra.mxu0 %v9498_v32  ;;  %14153 = vmatprep.subr.mxu1 %v14452_v2  ;;  %v9799_v32 = vld [vmem:[%s16304_s12 + $0x14] sm:$0xf] }
0x11c3   : > { %v9720_v41 = vpop.permute.xlu1 %9719  ;;  %v9646_v5 = vpop.permute.xlu0 %9645  ;;  %14140 = vmatprep.mubr.msk.f32.mxu0 %vm16456_vm11, %v14452_v2  ;;  %14146 = vmatmul.mubr.msk.f32.vlgmr.msra.gmra.mrb[102].mxu1 %vm16490_vm10, %v14383_v42  ;;  %vm16502_vm10 = vmmov %vm16501_vm12 }
0x11c4   : > { %14148 = vmatprep.subr.mxu0 %v14452_v2  ;;  %14154 = vmatpush3.msra.mxu1 %v9720_v41 }
0x11c5   : > { %14141 = vmatmul.mubr.msk.f32.vlgmr.msra.gmra.mrb[98].mxu0 %vm16491_vm13, %v14384_v43  ;;  %14155 = vmatprep.mubr.msk.f32.mxu1 %vm16456_vm11, %v14452_v2  ;;  %vm16503_vm13 = vcmask 48128   ;;  %v9801_v43 = vld [vmem:[%s16304_s12 + $0x1c] sm:$0xf] }
0x11c6   : > { %14149 = vmatpush3.msra.mxu0 %v9646_v5  ;;  %14150 = vmatprep.mubr.msk.f32.mxu0 %vm16456_vm11, %v14452_v2  ;;  %vm16499_vm11 = vcmask 785408   ;;  %v9800_v5 = vld [vmem:[%s16304_s12 + $0x18] sm:$0xf] }
0x11c7   : > { %14156 = vmatmul.mubr.msk.f32.vlgmr.msra.gmra.mrb[104].mxu1 %vm16492_vm1, %v14385_v44  ;;  %14213 = vmatprep.subr.msk.bf16.mxu0 %vm15463_vm9, %v14454_v13  ;;  %vm16494_vm9 = vnez %v16447_v27  ;;  %vm16504_vm1 = vmmov %vm16502_vm10 }
0x11c8   : > { %9954 = vmatprep.mubr.f32.mxu1 %v14452_v2 }
0x11c9   : > { %14151 = vmatmul.mubr.msk.f32.vlgmr.msra.gmra.mrb[100].mxu0 %vm16477_vm0, %v14386_v45  ;;  %vm16505_vm0 = vmmov %vm16504_vm1 }
0x11ca   : > { %14215 = vmatpush1.bf16.msk.msra.mxu0 %vm14685_vm3, %v14454_v13  ;;  %9869 = vmatprep.mubr.f32.mxu0 %v14452_v2  ;;  %vm16493_vm3 = vnez %v16445_v24 }
0x11cb   : > { %14217 = vmatprep.subr.msk.bf16.mxu0 %vm15477_vm15, %v14454_v13  ;;  %vm16495_vm15 = vnez %v16449_v25 }
0x11ce   : > { %14219 = vmatpush1.bf16.msk.msra.mxu0 %vm15486_vm6, %v14454_v13  ;;  %vm16496_vm6 = vnez %v16451_v3 }
0x11cf   : > { %14221 = vmatprep.subr.msk.bf16.mxu0 %vm15497_vm7, %v14454_v13  ;;  %vm16497_vm7 = vnez %v16453_v38 }
0x11d2   : > { %14223 = vmatpush1.bf16.msk.msra.mxu0 %vm15506_vm5, %v14454_v13  ;;  %vm16498_vm5 = vnez %v16455_v30 }
0x11d3   : > { %14225 = vmatprep.subr.msk.bf16.mxu0 %vm16493_vm3, %v14454_v13  ;;  %vm16506_vm3 = vmmov %vm16505_vm0 }
0x11d6   : > { %14227 = vmatpush1.bf16.msk.msra.mxu0 %vm16494_vm9, %v14454_v13  ;;  %vm16507_vm9 = vcmask 1031168  }
0x11d7   : > { %14229 = vmatprep.subr.msk.bf16.mxu0 %vm16495_vm15, %v14454_v13  ;;  %vm16508_vm15 = vmmov %vm16503_vm13 }
0x11da   : > { %14231 = vmatpush1.bf16.msk.msra.mxu0 %vm16496_vm6, %v14454_v13  ;;  %vm16509_vm6 = vmmov %vm16505_vm0 }
0x11db   : > { %14233 = vmatprep.subr.msk.bf16.mxu0 %vm16497_vm7, %v14454_v13  ;;  %vm16510_vm7 = vmmov %vm16505_vm0 }
0x11de   : > { %14235 = vmatpush1.bf16.msk.msra.mxu0 %vm16498_vm5, %v14454_v13  ;;  %vm16511_vm5 = vcmask 1022976  }
0x128c   : > { %v9201_v12 = vpop.f32.mrb[92].mxu0 }
0x128d   : > { %v14117_v55 = vpop.f32.mrb[93].mxu0 }
0x128e   : > { %v9344_v10 = vpop.f32.mrb[98].mxu1 }
0x128f   : > { %v14127_v60 = vpop.f32.mrb[99].mxu1 }
0x1290   : > { %v9271_v14 = vpop.f32.mrb[94].mxu0  ;;  %v8388_v60 = vld [vmem:[%s16307_s15] sm:$0xf] }
0x1291   : > { %v9272_v15 = vadd.f32 %v9271_v14, %v9201_v12  ;;  %v14122_v24 = vpop.f32.mrb[95].mxu0 }
0x1292   : > { %v9492_v27 = vpop.f32.mrb[100].mxu1 }
0x1293   : > { %v9348_v25 = vadd.f32 %v9344_v10, %v9272_v15  ;;  %v14137_v34 = vpop.f32.mrb[101].mxu1 }
0x1294   : > { %v9418_v3 = vpop.f32.mrb[96].mxu0 }
0x1295   : > { %v9422_v46 = vadd.f32 %v9418_v3, %v9348_v25  ;;  %v14132_v47 = vpop.f32.mrb[97].mxu0 }
0x1296   : > { %v9640_v48 = vpop.f32.mrb[102].mxu1  ;;  %v10558_v47 = vld [vmem:[%s16314_s22 + $0x4] sm:$0xf] }
0x1297   : > { %v9496_v38 = vadd.f32 %v9492_v27, %v9422_v46  ;;  %v14147_v49 = vpop.f32.mrb[103].mxu1 }
0x1298   : > { %v9566_v51 = vpop.f32.mrb[98].mxu0 }
0x1299   : > { %v9570_v52 = vadd.f32 %v9566_v51, %v9496_v38  ;;  %v14142_v30 = vpop.f32.mrb[99].mxu0  ;;  %v10557_v38 = vld [vmem:[%s16314_s22] sm:$0xf] }
0x129a   : > { %v9788_v13 = vpop.f32.mrb[104].mxu1 }
0x129b   : > { %v9644_v53 = vadd.f32 %v9640_v48, %v9570_v52  ;;  %v14157_v54 = vpop.f32.mrb[105].mxu1 }
0x129c   : > { %v9714_v57 = vpop.f32.mrb[100].mxu0 }
0x129d   : > { %v9718_v18 = vadd.f32 %v9714_v57, %v9644_v53  ;;  %v14152_v50 = vpop.f32.mrb[101].mxu0  ;;  %v10559_v57 = vld [vmem:[%s16314_s22 + $0x8] sm:$0xf] }
0x129f   : > { %v9792_v9 = vadd.f32 %v9788_v13, %v9718_v18 }
0x12a1   : > { %v9793_v1 = vadd.f32 %v9792_v9, %v15270_v56  ;;  %v10549_v56 = vld [vmem:[%s16305_s13] sm:$0xf] }
0x12a3   : > { %13289 = vmatmul.mubr.msk.f32.vlgmr.msra.gmra.mrb[102].mxu0 %vm16499_vm11, %v9793_v1  ;;  %vm16512_vm11 = vmmov %vm16503_vm13 }
0x12a4   : > { %10657 = vmatprep.mubr.f32.mxu0 %v14452_v2 }
0x1376   : > { %v9871_v11 = vpop.f32.mrb[102].mxu0 }
0x1377   : > { %9878 = vrot.lane.b32.xlu0 %v9871_v11, %s16410_s29  ;;  %v9873_v8 = vpop.f32.mrb[103].mxu0 }
0x1378   : > { %9880 = vrot.lane.b32.xlu1 %v9873_v8, %s16410_s29 }
0x137b   : > { %10039 = vrot.lane.b32.xlu0 %v9871_v11, %s16412_s11 }
0x137c   : > { %10041 = vrot.lane.b32.xlu1 %v9873_v8, %s16412_s11 }
0x137f   : > { %10124 = vrot.lane.b32.xlu0 %v9871_v11, %s16414_s7 }
0x1380   : > { %10126 = vrot.lane.b32.xlu1 %v9873_v8, %s16414_s7 }
0x1383   : > { %10209 = vrot.lane.b32.xlu0 %v9871_v11, %s16415_s10 }
0x1384   : > { %10211 = vrot.lane.b32.xlu1 %v9873_v8, %s16415_s10 }
0x1387   : > { %10294 = vrot.lane.b32.xlu0 %v9871_v11, %s16419_s8 }
0x1388   : > { %10296 = vrot.lane.b32.xlu1 %v9873_v8, %s16419_s8 }
0x138b   : > { %10379 = vrot.lane.b32.xlu0 %v9871_v11, %s16416_s30 }
0x138c   : > { %10381 = vrot.lane.b32.xlu1 %v9873_v8, %s16416_s30 }
0x138f   : > { %10464 = vrot.lane.b32.xlu0 %v9871_v11, %s16411_s6 }
0x1390   : > { %10466 = vrot.lane.b32.xlu1 %v9873_v8, %s16411_s6 }
0x1393   : > { %10552 = vperm.xlu0 %14367, %v10549_v56   ;;  %v10560_v56 = vld [vmem:[%s16314_s22 + $0xc] sm:$0xf] }
0x13e9   : > { %v9879_v31 = vpop.permute.xlu0 %9878 }
0x13ea   : > { %v9881_v61 = vpop.permute.xlu1 %9880 }
0x13eb   : > { %v9882_v63 = vsel %vm16500_vm14, %v9879_v31, %v9881_v61  ;;  %13290 = vmatprep.subr.msk.mxu1 %vm16501_vm12, %v9881_v61  ;;  %vm16513_vm14 = vmmov %vm16505_vm0 }
0x13ec   : > { %13291 = vmatpush1.msk.msra.mxu1 %vm16502_vm10, %v9882_v63  ;;  %vm16514_vm12 = vmmov %vm16505_vm0  ;;  %vm16515_vm10 = vcmask 1014784   ;;  %v10561_v63 = vld [vmem:[%s16314_s22 + $0x10] sm:$0xf] }
0x13ed   : > { %13292 = vmatmul.mubr.msk.f32.vlgmr.msra.gmra.mrb[106].mxu1 %vm16503_vm13, %v9795_v62  ;;  %13293 = vmatprep.subr.msk.mxu1 %vm16504_vm1, %v9873_v8  ;;  %v10040_v6 = vpop.permute.xlu0 %10039  ;;  %vm16516_vm13 = vmmov %vm16512_vm11 }
0x13ee   : > { %13294 = vmatpush1.msk.msra.mxu1 %vm16505_vm0, %v9871_v11  ;;  %v10042_v0 = vpop.permute.xlu1 %10041  ;;  %10032 = vmatprep.mubr.f32.mxu1 %v14452_v2  ;;  %vm16517_vm1 = vmmov %vm16505_vm0 }
0x13ef   : > { %13296 = vmatprep.subr.msk.mxu1 %vm16506_vm3, %v10042_v0  ;;  %v10043_v16 = vsel %vm16507_vm9, %v10040_v6, %v10042_v0  ;;  %vm16518_vm3 = vmmov %vm16512_vm11 }
0x13f0   : > { %vm16519_vm9 = vmmov %vm16505_vm0 }
0x13f1   : > { %v10125_v4 = vpop.permute.xlu0 %10124 }
0x13f2   : > { %v10127_v17 = vpop.permute.xlu1 %10126 }
0x13f3   : > { %v10128_v21 = vsel %vm16511_vm5, %v10125_v4, %v10127_v17  ;;  %vm16523_vm5 = vmmov %vm16505_vm0  ;;  %v12118_v4 = vld [vmem:[%s16316_s24] sm:$0xf] }
0x13f5   : > { %13295 = vmatmul.mubr.msk.f32.vlgmr.msra.gmra.mrb[106].mxu1 %vm16508_vm15, %v9794_v7  ;;  %v10210_v29 = vpop.permute.xlu0 %10209  ;;  %vm16520_vm15 = vmmov %vm16505_vm0 }
0x13f6   : > { %13297 = vmatpush1.msk.msra.mxu1 %vm16509_vm6, %v10043_v16  ;;  %10115 = vmatprep.mubr.f32.mxu1 %v14452_v2  ;;  %v10212_v22 = vpop.permute.xlu1 %10211  ;;  %vm16521_vm6 = vmmov %vm16518_vm3  ;;  %v10562_v16 = vld [vmem:[%s16314_s22 + $0x14] sm:$0xf] }
0x13f7   : > { %13299 = vmatprep.subr.msk.mxu1 %vm16510_vm7, %v10127_v17  ;;  %v10213_v33 = vsel %vm16515_vm10, %v10210_v29, %v10212_v22  ;;  %vm16522_vm7 = vmmov %vm16505_vm0  ;;  %vm10576_vm10 = vcmask 556032  }
0x13f9   : > { %v10295_v35 = vpop.permute.xlu0 %10294 }
0x13fa   : > { %v10297_v23 = vpop.permute.xlu1 %10296 }
0x13fb   : > { %v10298_v19 = vsel %vm8134_vm4, %v10295_v35, %v10297_v23 }
0x13fd   : > { %13298 = vmatmul.mubr.msk.f32.vlgmr.msra.gmra.mrb[106].mxu1 %vm16512_vm11, %v9796_v20  ;;  %v10380_v37 = vpop.permute.xlu0 %10379  ;;  %vm16524_vm11 = vmmov %vm16518_vm3 }
0x13fe   : > { %13300 = vmatpush1.msk.msra.mxu1 %vm16513_vm14, %v10128_v21  ;;  %10200 = vmatprep.mubr.f32.mxu1 %v14452_v2  ;;  %v10382_v28 = vpop.permute.xlu1 %10381  ;;  %vm16525_vm14 = vmmov %vm16505_vm0 }
0x13ff   : > { %13302 = vmatprep.subr.msk.mxu1 %vm16514_vm12, %v10212_v22  ;;  %v10383_v39 = vsel %vm8220_vm2, %v10380_v37, %v10382_v28  ;;  %vm16526_vm12 = vmmov %vm16518_vm3  ;;  %v10563_v22 = vld [vmem:[%s16314_s22 + $0x18] sm:$0xf]  ;;  %v11339_v37 = vld [vmem:[%s16315_s23 + $0x4] sm:$0xf] }
0x1401   : > { %v10465_v41 = vpop.permute.xlu0 %10464 }
0x1402   : > { %v10467_v40 = vpop.permute.xlu1 %10466 }
0x1403   : > { %v10468_v42 = vsel %vm8306_vm8, %v10465_v41, %v10467_v40  ;;  %v11338_v41 = vld [vmem:[%s16315_s23] sm:$0xf] }
0x1405   : > { %13301 = vmatmul.mubr.msk.f32.vlgmr.msra.gmra.mrb[106].mxu1 %vm16516_vm13, %v9797_v26  ;;  %vm16527_vm13 = vcmask 31744  }
0x1406   : > { %13303 = vmatpush1.msk.msra.mxu1 %vm16517_vm1, %v10213_v33  ;;  %10285 = vmatprep.mubr.f32.mxu1 %v14452_v2  ;;  %vm16528_vm1 = vmmov %vm16527_vm13 }
0x1407   : > { %13305 = vmatprep.subr.msk.mxu1 %vm16505_vm0, %v10297_v23  ;;  %vm10588_vm0 = vcmask 1043456   ;;  %v10564_v23 = vld [vmem:[%s16314_s22 + $0x1c] sm:$0xf] }
0x140d   : > { %13304 = vmatmul.mubr.msk.f32.vlgmr.msra.gmra.mrb[106].mxu1 %vm16518_vm3, %v9798_v36  ;;  %vm16529_vm3 = vcmask 1039360   ;;  %v10565_v36 = vld [vmem:[%s16314_s22 + $0x20] sm:$0xf] }
0x140e   : > { %13306 = vmatpush1.msk.msra.mxu1 %vm16519_vm9, %v10298_v19  ;;  %10370 = vmatprep.mubr.f32.mxu1 %v14452_v2  ;;  %vm16530_vm9 = vmmov %vm16528_vm1 }
0x140f   : > { %13308 = vmatprep.subr.msk.mxu1 %vm16520_vm15, %v10382_v28  ;;  %vm16531_vm15 = vmmov %vm16528_vm1 }
0x1412   : > { %v10553_v44 = vpop.permute.xlu0 %10552 }
0x1415   : > { %13307 = vmatmul.mubr.msk.f32.vlgmr.msra.gmra.mrb[106].mxu1 %vm16521_vm6, %v9799_v32  ;;  %vm16532_vm6 = vmmov %vm16528_vm1 }
0x1416   : > { %13309 = vmatpush1.msk.msra.mxu1 %vm16522_vm7, %v10383_v39  ;;  %10455 = vmatprep.mubr.f32.mxu1 %v14452_v2  ;;  %vm16533_vm7 = vmmov %vm16528_vm1 }
0x1417   : > { %13311 = vmatprep.subr.msk.mxu1 %vm16523_vm5, %v10467_v40  ;;  %vm16534_vm5 = vcmask 1031168  }
0x141d   : > { %13310 = vmatmul.mubr.msk.f32.vlgmr.msra.gmra.mrb[106].mxu1 %vm16524_vm11, %v9800_v5  ;;  %vm16535_vm11 = vmmov %vm16528_vm1 }
0x141e   : > { %13312 = vmatpush1.msk.msra.mxu1 %vm16525_vm14, %v10468_v42  ;;  %10540 = vmatprep.mubr.f32.mxu1 %v14452_v2  ;;  %vm16536_vm14 = vcmask 1022976  }
0x1425   : > { %13313 = vmatmul.mubr.msk.f32.vlgmr.msra.gmra.mrb[106].mxu1 %vm16526_vm12, %v9801_v43  ;;  %vm16537_vm12 = vcmask 1014784  }
0x1426   : > { %12226 = vmatprep.mubr.f32.mxu1 %v14452_v2 }
0x14f8   : > { %v10542_v45 = vpop.f32.mrb[106].mxu1 }
0x14f9   : > { %v10555_v12 = vadd.f32 %v10553_v44, %v10542_v45  ;;  %v10544_v55 = vpop.f32.mrb[107].mxu1 }
0x14fa   : > { %v10556_v10 = vadd.f32 %v10553_v44, %v10544_v55  ;;  %v11340_v44 = vld [vmem:[%s16315_s23 + $0x8] sm:$0xf] }
0x14fb   : > { %10568 = vrot.lane.b32.xlu1 %v10555_v12, %s16430_s5 }
0x14fc   : > { %10570 = vrot.lane.b32.xlu0 %v10556_v10, %s16430_s5  ;;  %v11341_v10 = vld [vmem:[%s16315_s23 + $0xc] sm:$0xf] }
0x14ff   : > { %8391 = vperm.xlu1 %14368, %v8388_v60  }
0x156d   : > { %v10569_v14 = vpop.permute.xlu1 %10568 }
0x156e   : > { %v10575_v15 = vsel %vm16527_vm13, 0.0, %v10569_v14  ;;  %v10571_v24 = vpop.permute.xlu0 %10570  ;;  %vm16538_vm13 = vmmov %vm16528_vm1 }
0x156f   : > { %v10572_v27 = vsel %vm16528_vm1, %v10569_v14, %v10571_v24  ;;  %10580 = vrot.lane.b32.xlu0 %v10575_v15, %s16410_s29  ;;  %v11342_v24 = vld [vmem:[%s16315_s23 + $0x10] sm:$0xf] }
0x1570   : > { %v10577_v25 = vsel %vm10576_vm10, %v10572_v27, 0.0 }
0x1571   : > { %10582 = vrot.lane.b32.xlu1 %v10577_v25, %s16410_s29 }
0x157e   : > { %v8392_v34 = vpop.permute.xlu1 %8391 }
0x157f   : > { %v8394_v3 = vadd.f32 %v8392_v34, %v15743_v58  ;;  %v8395_v46 = vadd.f32 %v8392_v34, %v15745_v59 }
0x1581   : > { %11349 = vrot.lane.b32.xlu0 %v8394_v3, %s16430_s5  ;;  %11351 = vrot.lane.b32.xlu1 %v8395_v46, %s16430_s5  ;;  %v11343_v3 = vld [vmem:[%s16315_s23 + $0x14] sm:$0xf] }
0x1585   : > { %10742 = vrot.lane.b32.xlu0 %v10575_v15, %s16412_s11  ;;  %10744 = vrot.lane.b32.xlu1 %v10577_v25, %s16412_s11 }
0x1589   : > { %10827 = vrot.lane.b32.xlu0 %v10575_v15, %s16414_s7  ;;  %10829 = vrot.lane.b32.xlu1 %v10577_v25, %s16414_s7 }
0x158d   : > { %10912 = vrot.lane.b32.xlu0 %v10575_v15, %s16415_s10  ;;  %10914 = vrot.lane.b32.xlu1 %v10577_v25, %s16415_s10 }
0x1591   : > { %10997 = vrot.lane.b32.xlu0 %v10575_v15, %s16419_s8  ;;  %10999 = vrot.lane.b32.xlu1 %v10577_v25, %s16419_s8 }
0x1595   : > { %11082 = vrot.lane.b32.xlu0 %v10575_v15, %s16416_s30  ;;  %11084 = vrot.lane.b32.xlu1 %v10577_v25, %s16416_s30 }
0x1599   : > { %11167 = vrot.lane.b32.xlu0 %v10575_v15, %s16411_s6  ;;  %11169 = vrot.lane.b32.xlu1 %v10577_v25, %s16411_s6 }
0x159d   : > { %11252 = vrot.lane.b32.xlu0 %v10575_v15, %s16426_s16  ;;  %11254 = vrot.lane.b32.xlu1 %v10577_v25, %s16426_s16 }
0x15e1   : > { %v10581_v58 = vpop.permute.xlu0 %10580 }
0x15e3   : > { %v10583_v59 = vpop.permute.xlu1 %10582 }
0x15e4   : > { %v10584_v48 = vsel %vm16529_vm3, %v10581_v58, %v10583_v59  ;;  %13314 = vmatprep.subr.msk.mxu0 %vm10588_vm0, %v10583_v59  ;;  %vm16539_vm3 = vmmov %vm16528_vm1 }
0x15e5   : > { %13315 = vmatpush1.msk.msra.mxu0 %vm10588_vm0, %v10584_v48 }
0x15e6   : > { %13317 = vmatprep.subr.msk.mxu0 %vm10588_vm0, %v10577_v25  ;;  %13316 = vmatmul.mubr.msk.f32.vlgmr.msra.gmra.mrb[104].mxu0 %vm16530_vm9, %v10558_v47  ;;  %vm16540_vm9 = vmmov %vm16528_vm1  ;;  %v11344_v47 = vld [vmem:[%s16315_s23 + $0x18] sm:$0xf] }
0x15e7   : > { %13318 = vmatpush1.msk.msra.mxu0 %vm10588_vm0, %v10575_v15  ;;  %10735 = vmatprep.mubr.f32.mxu0 %v14452_v2 }
0x15ee   : > { %13319 = vmatmul.mubr.msk.f32.vlgmr.msra.gmra.mrb[104].mxu0 %vm16531_vm15, %v10557_v38  ;;  %vm11256_vm15 = vcmask 982016  }
0x15ef   : > { %10818 = vmatprep.mubr.f32.mxu0 %v14452_v2 }
0x15f3   : > { %v11352_v49 = vpop.permute.xlu1 %11351  ;;  %v11350_v51 = vpop.permute.xlu0 %11349 }
0x15f4   : > { %v11353_v52 = vsel %vm16532_vm6, %v11350_v51, %v11352_v49  ;;  %v15982_v30 = vsel %vm16533_vm7, 0.0, %v11350_v51  ;;  %vm16541_vm6 = vmmov %vm16528_vm1  ;;  %v11345_v51 = vld [vmem:[%s16315_s23 + $0x1c] sm:$0xf] }
0x15f5   : > { %v15985_v13 = vsel %vm10576_vm10, %v11353_v52, 0.0  ;;  %11360 = vrot.lane.b32.xlu0 %v15982_v30, %s16410_s29  ;;  %vm16542_vm7 = vmmov %vm16528_vm1 }
0x15f6   : > { %11362 = vrot.lane.b32.xlu1 %v15985_v13, %s16410_s29 }
0x15f7   : > { %v10745_v53 = vpop.permute.xlu1 %10744  ;;  %v10743_v54 = vpop.permute.xlu0 %10742 }
0x15f8   : > { %v10746_v18 = vsel %vm16534_vm5, %v10743_v54, %v10745_v53  ;;  %13320 = vmatprep.subr.msk.mxu0 %vm10588_vm0, %v10745_v53  ;;  %vm16543_vm5 = vcmask 1039360  }
0x15f9   : > { %11521 = vrot.lane.b32.xlu0 %v15982_v30, %s16412_s11  ;;  %13321 = vmatpush1.msk.msra.mxu0 %vm10588_vm0, %v10746_v18 }
0x15fa   : > { %11523 = vrot.lane.b32.xlu1 %v15985_v13, %s16412_s11  ;;  %13322 = vmatmul.mubr.msk.f32.vlgmr.msra.gmra.mrb[104].mxu0 %vm16535_vm11, %v10559_v57  ;;  %vm16544_vm11 = vmmov %vm16528_vm1 }
0x15fb   : > { %v10830_v50 = vpop.permute.xlu1 %10829  ;;  %v10828_v9 = vpop.permute.xlu0 %10827  ;;  %10903 = vmatprep.mubr.f32.mxu0 %v14452_v2 }
0x15fc   : > { %v10831_v1 = vsel %vm16536_vm14, %v10828_v9, %v10830_v50  ;;  %13323 = vmatprep.subr.msk.mxu0 %vm10588_vm0, %v10830_v50  ;;  %vm16545_vm14 = vcmask 1031168  }
0x15fd   : > { %11606 = vrot.lane.b32.xlu0 %v15982_v30, %s16414_s7  ;;  %13324 = vmatpush1.msk.msra.mxu0 %vm10588_vm0, %v10831_v1 }
0x15fe   : > { %11608 = vrot.lane.b32.xlu1 %v15985_v13, %s16414_s7 }
0x15ff   : > { %v10915_v11 = vpop.permute.xlu1 %10914  ;;  %v10913_v8 = vpop.permute.xlu0 %10912 }
0x1600   : > { %v10916_v31 = vsel %vm16537_vm12, %v10913_v8, %v10915_v11  ;;  %13326 = vmatprep.subr.msk.mxu0 %vm10588_vm0, %v10915_v11  ;;  %vm16546_vm12 = vmmov %vm16528_vm1 }
0x1601   : > { %11691 = vrot.lane.b32.xlu0 %v15982_v30, %s16415_s10 }
0x1602   : > { %11693 = vrot.lane.b32.xlu1 %v15985_v13, %s16415_s10  ;;  %13325 = vmatmul.mubr.msk.f32.vlgmr.msra.gmra.mrb[104].mxu0 %vm16538_vm13, %v10560_v56  ;;  %vm16547_vm13 = vcmask 1022976  }
0x1603   : > { %13327 = vmatpush1.msk.msra.mxu0 %vm10588_vm0, %v10916_v31  ;;  %v11000_v61 = vpop.permute.xlu1 %10999  ;;  %10988 = vmatprep.mubr.f32.mxu0 %v14452_v2  ;;  %v10998_v62 = vpop.permute.xlu0 %10997 }
0x1604   : > { %13329 = vmatprep.subr.msk.mxu0 %vm10588_vm0, %v11000_v61  ;;  %v11001_v0 = vsel %vm8134_vm4, %v10998_v62, %v11000_v61  ;;  %v12906_v61 = vld [vmem:[%s16318_s26] sm:$0xf] }
0x1605   : > { %11776 = vrot.lane.b32.xlu0 %v15982_v30, %s16419_s8 }
0x1606   : > { %11778 = vrot.lane.b32.xlu1 %v15985_v13, %s16419_s8 }
0x1607   : > { %v11085_v6 = vpop.permute.xlu1 %11084  ;;  %v11083_v7 = vpop.permute.xlu0 %11082 }
0x1608   : > { %v11086_v17 = vsel %vm8220_vm2, %v11083_v7, %v11085_v6 }
0x1609   : > { %11861 = vrot.lane.b32.xlu0 %v15982_v30, %s16416_s30 }
0x160a   : > { %11863 = vrot.lane.b32.xlu1 %v15985_v13, %s16416_s30  ;;  %13328 = vmatmul.mubr.msk.f32.vlgmr.msra.gmra.mrb[104].mxu0 %vm16528_vm1, %v10561_v63 }
0x160b   : > { %13330 = vmatpush1.msk.msra.mxu0 %vm10588_vm0, %v11001_v0  ;;  %11073 = vmatprep.mubr.f32.mxu0 %v14452_v2  ;;  %v11170_v20 = vpop.permute.xlu1 %11169  ;;  %v11168_v21 = vpop.permute.xlu0 %11167 }
0x160c   : > { %13332 = vmatprep.subr.msk.mxu0 %vm10588_vm0, %v11085_v6  ;;  %v11171_v29 = vsel %vm8306_vm8, %v11168_v21, %v11170_v20 }
0x160d   : > { %11946 = vrot.lane.b32.xlu0 %v15982_v30, %s16411_s6 }
0x160e   : > { %11948 = vrot.lane.b32.xlu1 %v15985_v13, %s16411_s6 }
0x160f   : > { %v11255_v26 = vpop.permute.xlu1 %11254  ;;  %v11253_v33 = vpop.permute.xlu0 %11252 }
0x1610   : > { %v11257_v35 = vsel %vm11256_vm15, %v11253_v33, %v11255_v26 }
0x1611   : > { %12031 = vrot.lane.b32.xlu0 %v15982_v30, %s16426_s16 }
0x1612   : > { %12033 = vrot.lane.b32.xlu1 %v15985_v13, %s16426_s16  ;;  %13331 = vmatmul.mubr.msk.f32.vlgmr.msra.gmra.mrb[104].mxu0 %vm16539_vm3, %v10562_v16  ;;  %vm16548_vm3 = vcmask 1014784  }
0x1613   : > { %13333 = vmatpush1.msk.msra.mxu0 %vm10588_vm0, %v11086_v17  ;;  %11158 = vmatprep.mubr.f32.mxu0 %v14452_v2 }
0x1614   : > { %13335 = vmatprep.subr.msk.mxu0 %vm10588_vm0, %v11170_v20 }
0x1615   : > { %12121 = vperm.xlu0 %14367, %v12118_v4  }
0x161a   : > { %13334 = vmatmul.mubr.msk.f32.vlgmr.msra.gmra.mrb[104].mxu0 %vm16540_vm9, %v10563_v22  ;;  %vm16549_vm9 = vmmov %vm16528_vm1 }
0x161b   : > { %13336 = vmatpush1.msk.msra.mxu0 %vm10588_vm0, %v11171_v29  ;;  %11243 = vmatprep.mubr.f32.mxu0 %v14452_v2 }
0x161c   : > { %13338 = vmatprep.subr.msk.mxu0 %vm10588_vm0, %v11255_v26 }
0x1622   : > { %13337 = vmatmul.mubr.msk.f32.vlgmr.msra.gmra.mrb[104].mxu0 %vm16541_vm6, %v10564_v23  ;;  %vm16550_vm6 = vmmov %vm16528_vm1 }
0x1623   : > { %13339 = vmatpush1.msk.msra.mxu0 %vm10588_vm0, %v11257_v35  ;;  %11329 = vmatprep.mubr.f32.mxu0 %v14452_v2 }
0x162a   : > { %13340 = vmatmul.mubr.msk.f32.vlgmr.msra.gmra.mrb[104].mxu0 %vm16542_vm7, %v10565_v36  ;;  %vm16551_vm7 = vmmov %vm16528_vm1 }
0x162b   : > { %11436 = vmatprep.mubr.f32.mxu0 %v14452_v2 }
0x1667   : > { %v11361_v19 = vpop.permute.xlu0 %11360 }
0x1668   : > { %v11363_v28 = vpop.permute.xlu1 %11362 }
0x1669   : > { %v11364_v32 = vsel %vm16543_vm5, %v11361_v19, %v11363_v28  ;;  %13341 = vmatprep.subr.msk.mxu0 %vm10588_vm0, %v11363_v28  ;;  %vm16552_vm5 = vmmov %vm16528_vm1 }
0x166a   : > { %13342 = vmatpush1.msk.msra.mxu0 %vm10588_vm0, %v11364_v32 }
0x166b   : > { %13343 = vmatmul.mubr.msk.f32.vlgmr.msra.gmra.mrb[104].mxu0 %vm16544_vm11, %v11339_v37  ;;  %13344 = vmatprep.subr.msk.mxu0 %vm10588_vm0, %v15985_v13  ;;  %v11522_v40 = vpop.permute.xlu0 %11521  ;;  %vm16553_vm11 = vmmov %vm16528_vm1 }
0x166c   : > { %v11524_v39 = vpop.permute.xlu1 %11523  ;;  %13345 = vmatpush1.msk.msra.mxu0 %vm10588_vm0, %v15982_v30  ;;  %11514 = vmatprep.mubr.f32.mxu0 %v14452_v2  ;;  %v11346_v30 = vld [vmem:[%s16315_s23 + $0x20] sm:$0xf] }
0x166d   : > { %13347 = vmatprep.subr.msk.mxu0 %vm10588_vm0, %v11524_v39  ;;  %v11525_v5 = vsel %vm16545_vm14, %v11522_v40, %v11524_v39  ;;  %vm16554_vm14 = vmmov %vm16528_vm1 }
0x166f   : > { %v11607_v43 = vpop.permute.xlu0 %11606 }
0x1670   : > { %v11609_v42 = vpop.permute.xlu1 %11608 }
0x1671   : > { %v11610_v45 = vsel %vm16547_vm13, %v11607_v43, %v11609_v42  ;;  %vm16556_vm13 = vmmov %vm16528_vm1 }
0x1673   : > { %13346 = vmatmul.mubr.msk.f32.vlgmr.msra.gmra.mrb[104].mxu0 %vm16546_vm12, %v11338_v41  ;;  %v11692_v55 = vpop.permute.xlu0 %11691  ;;  %vm16555_vm12 = vmmov %vm16528_vm1 }
0x1674   : > { %13348 = vmatpush1.msk.msra.mxu0 %vm10588_vm0, %v11525_v5  ;;  %11597 = vmatprep.mubr.f32.mxu0 %v14452_v2  ;;  %v11694_v12 = vpop.permute.xlu1 %11693 }
0x1675   : > { %13350 = vmatprep.subr.msk.mxu0 %vm10588_vm0, %v11609_v42  ;;  %v11695_v60 = vsel %vm16548_vm3, %v11692_v55, %v11694_v12  ;;  %vm16560_vm3 = vcmask 1031168  }
0x1677   : > { %v11777_v15 = vpop.permute.xlu0 %11776 }
0x1678   : > { %v11779_v14 = vpop.permute.xlu1 %11778 }
0x1679   : > { %v11780_v27 = vsel %vm8134_vm4, %v11777_v15, %v11779_v14 }
0x167b   : > { %13349 = vmatmul.mubr.msk.f32.vlgmr.msra.gmra.mrb[104].mxu0 %vm16528_vm1, %v11340_v44  ;;  %v11862_v34 = vpop.permute.xlu0 %11861 }
0x167c   : > { %13351 = vmatpush1.msk.msra.mxu0 %vm10588_vm0, %v11610_v45  ;;  %11682 = vmatprep.mubr.f32.mxu0 %v14452_v2  ;;  %v11864_v25 = vpop.permute.xlu1 %11863 }
0x167d   : > { %13353 = vmatprep.subr.msk.mxu0 %vm10588_vm0, %v11694_v12  ;;  %v11865_v46 = vsel %vm8220_vm2, %v11862_v34, %v11864_v25 }
0x167f   : > { %v11947_v59 = vpop.permute.xlu0 %11946 }
0x1680   : > { %v11949_v58 = vpop.permute.xlu1 %11948 }
0x1681   : > { %v11950_v48 = vsel %vm8306_vm8, %v11947_v59, %v11949_v58 }
0x1683   : > { %13352 = vmatmul.mubr.msk.f32.vlgmr.msra.gmra.mrb[104].mxu0 %vm16549_vm9, %v11341_v10  ;;  %v12032_v49 = vpop.permute.xlu0 %12031  ;;  %vm16561_vm9 = vmmov %vm16528_vm1 }
0x1684   : > { %13354 = vmatpush1.msk.msra.mxu0 %vm10588_vm0, %v11695_v60  ;;  %11767 = vmatprep.mubr.f32.mxu0 %v14452_v2  ;;  %v12034_v38 = vpop.permute.xlu1 %12033 }
0x1685   : > { %13356 = vmatprep.subr.msk.mxu0 %vm10588_vm0, %v11779_v14  ;;  %v12035_v52 = vsel %vm11256_vm15, %v12032_v49, %v12034_v38 }
0x168b   : > { %13355 = vmatmul.mubr.msk.f32.vlgmr.msra.gmra.mrb[104].mxu0 %vm16550_vm6, %v11342_v24  ;;  %vm16562_vm6 = vcmask 1022976  }
0x168c   : > { %13357 = vmatpush1.msk.msra.mxu0 %vm10588_vm0, %v11780_v27  ;;  %11852 = vmatprep.mubr.f32.mxu0 %v14452_v2 }
0x168d   : > { %13359 = vmatprep.subr.msk.mxu0 %vm10588_vm0, %v11864_v25 }
0x1693   : > { %13358 = vmatmul.mubr.msk.f32.vlgmr.msra.gmra.mrb[104].mxu0 %vm16551_vm7, %v11343_v3  ;;  %vm16563_vm7 = vmmov %vm16528_vm1 }
0x1694   : > { %13360 = vmatpush1.msk.msra.mxu0 %vm10588_vm0, %v11865_v46  ;;  %11937 = vmatprep.mubr.f32.mxu0 %v14452_v2  ;;  %v12122_v13 = vpop.permute.xlu0 %12121 }
0x1695   : > { %13362 = vmatprep.subr.msk.mxu0 %vm10588_vm0, %v11949_v58 }
0x169b   : > { %13361 = vmatmul.mubr.msk.f32.vlgmr.msra.gmra.mrb[104].mxu0 %vm16552_vm5, %v11344_v47  ;;  %vm16564_vm5 = vcmask 1014784  }
0x169c   : > { %13363 = vmatpush1.msk.msra.mxu0 %vm10588_vm0, %v11950_v48  ;;  %12022 = vmatprep.mubr.f32.mxu0 %v14452_v2 }
0x169d   : > { %13365 = vmatprep.subr.msk.mxu0 %vm10588_vm0, %v12034_v38 }
0x16a3   : > { %13364 = vmatmul.mubr.msk.f32.vlgmr.msra.gmra.mrb[104].mxu0 %vm16553_vm11, %v11345_v51  ;;  %vm16565_vm11 = vmmov %vm16528_vm1 }
0x16a4   : > { %13366 = vmatpush1.msk.msra.mxu0 %vm10588_vm0, %v12035_v52  ;;  %12107 = vmatprep.mubr.f32.mxu0 %v14452_v2 }
0x16ab   : > { %13367 = vmatmul.mubr.msk.f32.vlgmr.msra.gmra.mrb[104].mxu0 %vm16554_vm14, %v11346_v30  ;;  %vm16566_vm14 = vmmov %vm16528_vm1 }
0x177e   : > { %v12109_v53 = vpop.f32.mrb[104].mxu0 }
0x177f   : > { %v12124_v54 = vadd.f32 %v12122_v13, %v12109_v53  ;;  %v12111_v57 = vpop.f32.mrb[105].mxu0 }
0x1780   : > { %v12125_v18 = vadd.f32 %v12122_v13, %v12111_v57 }
0x1781   : > { %v12126_v50 = vmax.f32 %v12124_v54, 0.0 }
0x1782   : > { %v12127_v9 = vmax.f32 %v12125_v18, 0.0 }
0x1783   : > { %12139 = vrot.lane.b32.xlu1 %v12126_v50, %s16430_s5 }
0x1784   : > { %12141 = vrot.lane.b32.xlu0 %v12127_v9, %s16430_s5 }
0x17f5   : > { %v12140_v1 = vpop.permute.xlu1 %12139 }
0x17f6   : > { %v12146_v11 = vsel %vm16555_vm12, 0.0, %v12140_v1  ;;  %v12142_v8 = vpop.permute.xlu0 %12141  ;;  %vm16567_vm12 = vmmov %vm16528_vm1 }
0x17f7   : > { %v12143_v56 = vsel %vm16556_vm13, %v12140_v1, %v12142_v8  ;;  %12150 = vrot.lane.b32.xlu1 %v12146_v11, %s16410_s29 }
0x17f8   : > { %v12147_v31 = vsel %vm10576_vm10, %v12143_v56, 0.0  ;;  %vm16559_vm10 = vcmask 1039360  }
0x17f9   : > { %12152 = vrot.lane.b32.xlu0 %v12147_v31, %s16410_s29  ;;  %s16568_s29 = sld [smem:[#allocation6_spill]] }
0x17fb   : > { %12311 = vrot.lane.b32.xlu1 %v12146_v11, %s16412_s11 }
0x17fd   : > { %12313 = vrot.lane.b32.xlu0 %v12147_v31, %s16412_s11 }
0x17ff   : > { %12396 = vrot.lane.b32.xlu1 %v12146_v11, %s16414_s7 }
0x1801   : > { %12398 = vrot.lane.b32.xlu0 %v12147_v31, %s16414_s7  ;;  %s16570_s7 = sld [smem:[#allocation9_spill]] }
0x1803   : > { %12481 = vrot.lane.b32.xlu1 %v12146_v11, %s16415_s10 }
0x1805   : > { %12483 = vrot.lane.b32.xlu0 %v12147_v31, %s16415_s10  ;;  %s14465_s10 = smov [#allocation2]  }
0x1807   : > { %12566 = vrot.lane.b32.xlu1 %v12146_v11, %s16419_s8  ;;  %s13404_s17 = sshll.u32 %s16570_s7, 7  ;;  %s14391_s7 = sshll.u32 %s14465_s10, 4  ;;  %s14392_s7 = int_to_ptr.vmem [resolvable:$false] %s14391_s7 }
0x1808   : > { %s16250_s28 = scalar_lea.hbm %s16574_s4, %s13404_s17 }
0x1809   : > { %12568 = vrot.lane.b32.xlu0 %v12147_v31, %s16419_s8  ;;  %s16557_s8 = sld [smem:[#allocation29_spill]] }
0x180b   : > { %12651 = vrot.lane.b32.xlu1 %v12146_v11, %s16416_s30 }
0x180d   : > { %12653 = vrot.lane.b32.xlu0 %v12147_v31, %s16416_s30 }
0x180f   : > { %12736 = vrot.lane.b32.xlu1 %v12146_v11, %s16411_s6  ;;  %s16558_s5 = smov %s16557_s8  ;;  %v12129_v0 = vld [vmem:[%s16557_s8 + $0x4] sm:$0xf]  ;;  %s14393_s8 = scalar_lea.vmem %s14392_s7, 256 }
0x1810   : > { %v12128_v16 = vld [vmem:[%s16558_s5] sm:$0xf]  ;;  %v12130_v21 = vld [vmem:[%s16558_s5 + $0x8] sm:$0xf]  ;;  %v12131_v33 = vld [vmem:[%s16558_s5 + $0xc] sm:$0xf] }
0x1811   : > { %12738 = vrot.lane.b32.xlu0 %v12147_v31, %s16411_s6  ;;  %v12132_v19 = vld [vmem:[%s16558_s5 + $0x10] sm:$0xf]  ;;  %v12133_v39 = vld [vmem:[%s16558_s5 + $0x14] sm:$0xf]  ;;  %v12134_v42 = vld [vmem:[%s16558_s5 + $0x18] sm:$0xf] }
0x1812   : > { %v12135_v12 = vld [vmem:[%s16558_s5 + $0x1c] sm:$0xf]  ;;  %v12136_v60 = vld [vmem:[%s16558_s5 + $0x20] sm:$0xf]  ;;  %s854_s6 = sand.u32 1, %s16568_s29  }
0x1813   : > { %12821 = vrot.lane.b32.xlu1 %v12146_v11, %s16426_s16  ;;  %s12924_s29 = scalar_lea.sflag [#allocation3], %s854_s6 }
0x1815   : > { %12823 = vrot.lane.b32.xlu0 %v12147_v31, %s16426_s16  ;;  %s13037_s16 = sshll.u32 %s854_s6, 3 }
0x1816   : > { %s856_s3 = scalar_lea.vmem [#allocation2], %s13037_s16 }
0x1817   : > { %12909 = vperm.xlu1 %14368, %v12906_v61   ;;  %s12938_s9 = sshll.u32 %s856_s3, 4  ;;  %s16252_s9 = int_to_ptr.vmem [resolvable:$true] %s12938_s9 }
0x1818   : > { %s14387_s11 = scalar_lea.vmem %s16252_s9, 128  ;;  %p14394_p0 = scmp.lt.s32.totalorder %s16252_s9, %s14392_s7 }
0x1819   : > { %p14388_p11 = scmp.ne.s32.totalorder %s16252_s9, %s14387_s11  ;;  %p14395_p1 = scmp.lt.s32.totalorder %s14393_s8, %s14387_s11 }
0x181b   : > { %p14389_p12 = pnand %p14388_p11, %p14644_p5  ;;  %p14396_p2 = por %p14395_p1, %p14394_p0 }
0x181d   : > { %p14390_p13 = pneg %p14389_p12 }
0x181f   : > { %p14397_p3 = pnand %p14396_p2, %p14390_p13 }
0x1869   : > { %v12151_v62 = vpop.permute.xlu1 %12150 }
0x186b   : > { %v12153_v63 = vpop.permute.xlu0 %12152 }
0x186c   : > { %v12154_v6 = vsel %vm16559_vm10, %v12151_v62, %v12153_v63  ;;  %13368 = vmatprep.subr.msk.mxu1 %vm10588_vm0, %v12153_v63 }
0x186d   : > { %13369 = vmatpush1.msk.msra.mxu1 %vm10588_vm0, %v12154_v6  ;;  %v12312_v17 = vpop.permute.xlu1 %12311 }
0x186e   : > { %13370 = vmatmul.mubr.msk.f32.vlgmr.msra.gmra.mrb[108].mxu1 %vm16528_vm1, %v12129_v0  ;;  %13371 = vmatprep.subr.msk.mxu1 %vm10588_vm0, %v12147_v31 }
0x186f   : > { %13372 = vmatpush1.msk.msra.mxu1 %vm10588_vm0, %v12146_v11  ;;  %v12314_v7 = vpop.permute.xlu0 %12313  ;;  %12304 = vmatprep.mubr.f32.mxu1 %v14452_v2 }
0x1870   : > { %13374 = vmatprep.subr.msk.mxu1 %vm10588_vm0, %v12314_v7  ;;  %v12315_v4 = vsel %vm16560_vm3, %v12312_v17, %v12314_v7 }
0x1871   : > { %v12397_v22 = vpop.permute.xlu1 %12396 }
0x1873   : > { %v12399_v20 = vpop.permute.xlu0 %12398 }
0x1874   : > { %v12400_v29 = vsel %vm16562_vm6, %v12397_v22, %v12399_v20 }
0x1875   : > { %v12482_v23 = vpop.permute.xlu1 %12481 }
0x1876   : > { %13373 = vmatmul.mubr.msk.f32.vlgmr.msra.gmra.mrb[108].mxu1 %vm16561_vm9, %v12128_v16 }
0x1877   : > { %13375 = vmatpush1.msk.msra.mxu1 %vm10588_vm0, %v12315_v4  ;;  %12387 = vmatprep.mubr.f32.mxu1 %v14452_v2  ;;  %v12484_v26 = vpop.permute.xlu0 %12483 }
0x1878   : > { %13377 = vmatprep.subr.msk.mxu1 %vm10588_vm0, %v12399_v20  ;;  %v12485_v35 = vsel %vm16564_vm5, %v12482_v23, %v12484_v26 }
0x1879   : > { %v12567_v28 = vpop.permute.xlu1 %12566 }
0x187b   : > { %v12569_v36 = vpop.permute.xlu0 %12568 }
0x187c   : > { %v12570_v37 = vsel %vm8134_vm4, %v12567_v28, %v12569_v36  ;;  %vm16569_vm4 = vmmov %vm16528_vm1 }
0x187d   : > { %v12652_v40 = vpop.permute.xlu1 %12651 }
0x187e   : > { %13376 = vmatmul.mubr.msk.f32.vlgmr.msra.gmra.mrb[108].mxu1 %vm16563_vm7, %v12130_v21 }
0x187f   : > { %13378 = vmatpush1.msk.msra.mxu1 %vm10588_vm0, %v12400_v29  ;;  %12472 = vmatprep.mubr.f32.mxu1 %v14452_v2  ;;  %v12654_v32 = vpop.permute.xlu0 %12653 }
0x1880   : > { %13380 = vmatprep.subr.msk.mxu1 %vm10588_vm0, %v12484_v26  ;;  %v12655_v41 = vsel %vm8220_vm2, %v12652_v40, %v12654_v32  ;;  %vm16571_vm2 = vmmov %vm16528_vm1 }
0x1881   : > { %v12737_v43 = vpop.permute.xlu1 %12736 }
0x1883   : > { %v12739_v5 = vpop.permute.xlu0 %12738 }
0x1884   : > { %v12740_v44 = vsel %vm8306_vm8, %v12737_v43, %v12739_v5  ;;  %vm16572_vm8 = vmmov %vm16528_vm1 }
0x1885   : > { %v12822_v55 = vpop.permute.xlu1 %12821 }
0x1886   : > { %13379 = vmatmul.mubr.msk.f32.vlgmr.msra.gmra.mrb[108].mxu1 %vm16565_vm11, %v12131_v33 }
0x1887   : > { %13381 = vmatpush1.msk.msra.mxu1 %vm10588_vm0, %v12485_v35  ;;  %12557 = vmatprep.mubr.f32.mxu1 %v14452_v2  ;;  %v12824_v45 = vpop.permute.xlu0 %12823 }
0x1888   : > { %13383 = vmatprep.subr.msk.mxu1 %vm10588_vm0, %v12569_v36  ;;  %v12825_v10 = vsel %vm11256_vm15, %v12822_v55, %v12824_v45  ;;  %vm12920_vm15 = vcmask 523268  }
0x1889   : > { %vm12921_vm13 = vmor %vm12920_vm15, %vm10588_vm0 }
0x188e   : > { %13382 = vmatmul.mubr.msk.f32.vlgmr.msra.gmra.mrb[108].mxu1 %vm16566_vm14, %v12132_v19 }
0x188f   : > { %13384 = vmatpush1.msk.msra.mxu1 %vm10588_vm0, %v12570_v37  ;;  %12642 = vmatprep.mubr.f32.mxu1 %v14452_v2 }
0x1890   : > { %13386 = vmatprep.subr.msk.mxu1 %vm10588_vm0, %v12654_v32 }
0x1896   : > { %13385 = vmatmul.mubr.msk.f32.vlgmr.msra.gmra.mrb[108].mxu1 %vm16567_vm12, %v12133_v39  ;;  %v12910_v14 = vpop.permute.xlu1 %12909 }
0x1897   : > { %13387 = vmatpush1.msk.msra.mxu1 %vm10588_vm0, %v12655_v41  ;;  %12727 = vmatprep.mubr.f32.mxu1 %v14452_v2 }
0x1898   : > { %13389 = vmatprep.subr.msk.mxu1 %vm10588_vm0, %v12739_v5 }
0x189e   : > { %13388 = vmatmul.mubr.msk.f32.vlgmr.msra.gmra.mrb[108].mxu1 %vm16569_vm4, %v12134_v42 }
0x189f   : > { %13390 = vmatpush1.msk.msra.mxu1 %vm10588_vm0, %v12740_v44  ;;  %12812 = vmatprep.mubr.f32.mxu1 %v14452_v2 }
0x18a0   : > { %13392 = vmatprep.subr.msk.mxu1 %vm10588_vm0, %v12824_v45 }
0x18a6   : > { %13391 = vmatmul.mubr.msk.f32.vlgmr.msra.gmra.mrb[108].mxu1 %vm16571_vm2, %v12135_v12 }
0x18a7   : > { %13393 = vmatpush1.msk.msra.mxu1 %vm10588_vm0, %v12825_v10  ;;  %12897 = vmatprep.mubr.f32.mxu1 %v14452_v2 }
0x18ae   : > { %13394 = vmatmul.mubr.msk.f32.vlgmr.msra.gmra.mrb[108].mxu1 %vm16572_vm8, %v12136_v60 }
0x1981   : > { %v12899_v15 = vpop.f32.mrb[108].mxu1 }
0x1982   : > { %v12912_v24 = vadd.f32 %v12910_v14, %v12899_v15  ;;  %v12901_v27 = vpop.f32.mrb[109].mxu1 }
0x1983   : > { %v12913_v25 = vadd.f32 %v12910_v14, %v12901_v27 }
0x1984   : > { %v12914_v34 = vmax.f32 %v12912_v24, 0.0 }
0x1985   : > { %v12915_v2 = vmax.f32 %v12913_v25, 0.0 }
0x1987   : > { %v12918_v3 = vcombine.low %v12914_v34, %v12915_v2 }
0x1989   : > { %12922 = vst.msk [vmem:[%s856_s3] sm:$0xff] %vm12921_vm13, %v12918_v3 }
0x198a   : > { %14400 = shalt.err (!%p14397_p3)
}
0x198b   : > { %s14401_s30 = scalar_lea.hbm %s16250_s28, 128  ;;  %s14405_s17 = scalar_lea.hbm %s16575_s25, 256 }
0x198c   : > { %p14402_p4 = scmp.ne.s32.totalorder %s16250_s28, %s14401_s30  ;;  %p14406_p9 = scmp.lt.u32.totalorder %s16250_s28, %s16575_s25 }
0x198d   : > { %p14407_p10 = scmp.lt.u32.totalorder %s14405_s17, %s14401_s30  ;;  %p14409_p12 = scmp.lt.u32.totalorder %s14401_s30, %s16250_s28 }
0x198e   : > { %p14403_p7 = pnand %p14402_p4, %p14644_p5 }
0x198f   : > { %p14408_p11 = por %p14407_p10, %p14406_p9 }
0x1990   : > { %p14404_p8 = pneg %p14403_p7 }
0x1991   : > { %p14410_p13 = por %p14409_p12, %p14408_p11 }
0x1993   : > { %p14411_p0 = pnand %p14410_p13, %p14404_p8 }
0x1995   : > { %14414 = shalt.err (!%p14411_p0)
}
0x1996   : > { %14314 = dma.vmem_to_hbm [thread:$0]  (%p14644_p5), %s16252_s9, 128, %s16250_s28, %s12924_s29  }
0x1997 PF: > { %s16576_s27 = sld [smem:[#allocation8_spill]]  ;;  %s16577_s4 = sld [smem:[#allocation5_spill]] }
0x199d   : > { %p14320_p1 = scmp.ge.s32.totalorder %s16576_s27, 2  ;;  %s12950_s10 = sand.u32 1, %s16577_s4  }
0x199e   : > { %s12951_s7 = scalar_lea.sflag [#allocation3], %s12950_s10 }
0x199f   : > { %p14317_p2 = pnand %p14320_p1, %p14648_p6 }
0x19a1   : > { %14432 = dma.done.wait (!%p14317_p2), %s12951_s7, 128  }
0x19a2   : > { %14434 = vsyncadd (!%p14317_p2), %s12951_s7, 4294967168  ;;  %s16579_s30 = sld [smem:[#allocation10_spill]]  ;;  %s16580_s7 = sld [smem:[#allocation6_spill]] }
0x19a3   : > { %s16581_s4 = sld [smem:[#allocation7_spill]]  ;;  %s16582_s8 = sld [smem:[#allocation11_spill]] }
0x19a8   : > { %p37_p3 = scmp.ge.s32.totalorder %s16579_s30, 4  }
0x19aa   :  { %39 = sbr.rel (!%p37_p3) target bundleno = 21 (0x15), region = 172 }
0x19b1   :  { %12956 = vsyncpa [#allocation3], 1 }
0x19b2   :  { %12958 = vsyncpa [#allocation3 + $0x1], 1 }

</bundles_post_ra>
